<compile_context>
chip_gen: v7x
topology: tpu7x:2x2x1
jax: 0.10.0
libtpu: 0.0.40
codegen_flags: <defaults>
</compile_context>

<pallas_src>
import functools

import jax
import jax.numpy as jnp
import numpy as np
from jax import lax
from jax.experimental import pallas as pl
from jax.experimental.pallas import tpu as pltpu


# ----------------------------------------------------------------------------
# Fused multi-layer decoder kernel (grid axis = layer index)
# ----------------------------------------------------------------------------
def _decoder_stack_kernel(
        x_ref, mem_ref,
        sa_wq, sa_bq, sa_wk, sa_bk, sa_wv, sa_bv, sa_wo, sa_bo, sa_g, sa_beta,
        ca_wq, ca_bq, ca_wk, ca_bk, ca_wv, ca_bv, ca_wo, ca_bo, ca_g, ca_beta,
        ff_w1, ff_b1, ff_w2, ff_b2, ff_g, ff_beta,
        o_ref, act_ref, *, nhead, T, B, S):
    """One grid step == one whole DecoderLayer on flattened token slabs.

    x_ref:  (T*B, E) decoder tokens, row index t*B + b  (f32, read at l == 0)
    mem_ref:(T*S, E) memory tokens,  row index t*S + s  (bf16, MXU operand)
    act_ref: VMEM-resident f32 residual stream carried across layers.
    """
    l = pl.program_id(0)
    E = x_ref.shape[-1]
    TB = T * B
    TS = T * S

    # Load the decoder activations into the VMEM-resident carry on layer 0.
    @pl.when(l == 0)
    def _():
        act_ref[...] = x_ref[...].astype(jnp.float32)

    x = act_ref[...]                       # (TB, E) f32 residual stream
    mem_b = mem_ref[...]                   # (TS, E) bf16

    # ---- additive score masks, built in-kernel (no HBM traffic) ------------
    #  - self-attn : (t_i, b_i) attends (t_j, b_j) iff b_i == b_j and t_j <= t_i
    #  - cross-attn: query (t_i, b) attends memory (t_j, s) iff t_i == t_j
    #    (the PyTorch CrossAttention transposes dims 0/1, so its batch is T).
    # floor(row / B) computed as truncating f32 multiply -- exact for these
    # integer ranges and avoids vector integer div/mod lowering.
    row_i = lax.broadcasted_iota(jnp.int32, (TB, TB), 0)
    col_i = lax.broadcasted_iota(jnp.int32, (TB, TB), 1)
    t_r = ((row_i.astype(jnp.float32) + 0.5) * (1.0 / B)).astype(jnp.int32)
    t_c = ((col_i.astype(jnp.float32) + 0.5) * (1.0 / B)).astype(jnp.int32)
    b_r = row_i - t_r * B
    b_c = col_i - t_c * B
    sa_bias = jnp.where((b_r == b_c) & (t_c <= t_r), 0.0, -1e30)

    qrow_i = lax.broadcasted_iota(jnp.int32, (TB, TS), 0)
    kcol_i = lax.broadcasted_iota(jnp.int32, (TB, TS), 1)
    tq = ((qrow_i.astype(jnp.float32) + 0.5) * (1.0 / B)).astype(jnp.int32)
    tk = ((kcol_i.astype(jnp.float32) + 0.5) * (1.0 / S)).astype(jnp.int32)
    ca_bias = jnp.where(tq == tk, 0.0, -1e30)

    def layer_norm(y, g_ref, b_ref):
        mu = jnp.mean(y, axis=-1, keepdims=True)
        var = jnp.mean((y - mu) ** 2, axis=-1, keepdims=True)
        return (y - mu) * lax.rsqrt(var + 1e-5) * g_ref[...] + b_ref[...]

    def mh_attention(q_in_b, kv_in_b, wq, bq, wk, bk, wv, bv, wo, bo, bias):
        # q_in_b: (Nq, E) bf16, kv_in_b: (Nk, E) bf16, bias: (Nq, Nk) f32.
        nq = q_in_b.shape[0]
        acc = jnp.zeros((nq, E), jnp.float32)
        # TODO(synk): use lax.fori_loop over heads at large nhead.
        for h in range(nhead):
            qh = jnp.dot(q_in_b, wq[h],
                         preferred_element_type=jnp.float32) + bq[h]
            kh = jnp.dot(kv_in_b, wk[h],
                         preferred_element_type=jnp.float32) + bk[h]
            vh = jnp.dot(kv_in_b, wv[h],
                         preferred_element_type=jnp.float32) + bv[h]
            s = jnp.dot(qh.astype(jnp.bfloat16), kh.astype(jnp.bfloat16).T,
                        preferred_element_type=jnp.float32) + bias
            m = jnp.max(s, axis=-1, keepdims=True)
            p = jnp.exp(s - m)
            denom = jnp.sum(p, axis=-1, keepdims=True)
            p = p * pl.reciprocal(denom, approx=True)          # EUP slot
            pv = jnp.dot(p.astype(jnp.bfloat16), vh.astype(jnp.bfloat16),
                         preferred_element_type=jnp.float32)
            # Fold the head concat into the output projection: acc += PV_h@Wo_h
            acc = acc + jnp.dot(pv.astype(jnp.bfloat16), wo[h],
                                preferred_element_type=jnp.float32)
        return acc + bo[...]

    # ---- causal self-attention + residual + LayerNorm ----------------------
    x_b = x.astype(jnp.bfloat16)
    attn = mh_attention(x_b, x_b, sa_wq, sa_bq, sa_wk, sa_bk, sa_wv, sa_bv,
                        sa_wo, sa_bo, sa_bias)
    y = layer_norm(x + attn, sa_g, sa_beta)

    # ---- cross-attention + residual + LayerNorm -----------------------------
    attn = mh_attention(y.astype(jnp.bfloat16), mem_b,
                        ca_wq, ca_bq, ca_wk, ca_bk, ca_wv, ca_bv,
                        ca_wo, ca_bo, ca_bias)
    z = layer_norm(y + attn, ca_g, ca_beta)

    # ---- feed-forward + residual + LayerNorm --------------------------------
    h1 = jnp.maximum(
        jnp.dot(z.astype(jnp.bfloat16), ff_w1[...],
                preferred_element_type=jnp.float32) + ff_b1[...], 0.0)
    y2 = jnp.dot(h1.astype(jnp.bfloat16), ff_w2[...],
                 preferred_element_type=jnp.float32) + ff_b2[...]
    out = layer_norm(z + y2, ff_g, ff_beta)

    act_ref[...] = out                      # carry to next layer (VMEM only)

    @pl.when(l == pl.num_programs(0) - 1)
    def _():
        o_ref[...] = out.astype(o_ref.dtype)   # single HBM writeback


# ----------------------------------------------------------------------------
# Host-side operand preparation (bf16 weights, per-head slabs, scale folding)
# ----------------------------------------------------------------------------
def _attn_layer_operands(p, nhead):
    E = p["out_w"].shape[0]
    hd = E // nhead
    scale = 1.0 / np.sqrt(hd)

    def split_heads(w):          # w: (E_out, E_in), used as x @ w.T
        return w.T.reshape(E, nhead, hd).transpose(1, 0, 2)   # (nhead, E, hd)

    wq, wk, wv = p["in_w"][:E], p["in_w"][E:2 * E], p["in_w"][2 * E:]
    bq, bk, bv = p["in_b"][:E], p["in_b"][E:2 * E], p["in_b"][2 * E:]
    return [
        (split_heads(wq) * scale).astype(jnp.bfloat16),              # Wq (scale folded)
        (bq * scale).reshape(nhead, 1, hd).astype(jnp.float32),      # bq (scale folded)
        split_heads(wk).astype(jnp.bfloat16),                        # Wk
        bk.reshape(nhead, 1, hd).astype(jnp.float32),                # bk
        split_heads(wv).astype(jnp.bfloat16),                        # Wv
        bv.reshape(nhead, 1, hd).astype(jnp.float32),                # bv
        p["out_w"].T.reshape(nhead, hd, E).astype(jnp.bfloat16),     # Wo per head
        p["out_b"].reshape(1, E).astype(jnp.float32),                # bo
        p["g"].reshape(1, E).astype(jnp.float32),                    # LN gamma
        p["beta"].reshape(1, E).astype(jnp.float32),                 # LN beta
    ]


def _ff_layer_operands(p):
    E = p["w2"].shape[0]
    H = p["w1"].shape[0]
    return [
        p["w1"].T.astype(jnp.bfloat16),
        p["b1"].reshape(1, H).astype(jnp.float32),
        p["w2"].T.astype(jnp.bfloat16),
        p["b2"].reshape(1, E).astype(jnp.float32),
        p["g"].reshape(1, E).astype(jnp.float32),
        p["beta"].reshape(1, E).astype(jnp.float32),
    ]


def _layer_block_index(l, *, nd):
    return (l,) + (0,) * (nd - 1)


@functools.partial(jax.jit, static_argnums=(3,))
def decoder_forward(x, memory, layer_params, nhead):
    """x: (T, B, E) decoder input (seq-first); memory: (T, S, E)."""
    T, B, E = x.shape
    S = memory.shape[1]
    num_layers = len(layer_params)

    x2 = x.reshape(T * B, E).astype(jnp.float32)        # token (t,b) -> row t*B+b
    mem2 = memory.reshape(T * S, E).astype(jnp.bfloat16)  # MXU operand only

    # Stack per-layer operands on a leading L axis: one pallas_call with a
    # layer grid axis pipelines the next layer's weight DMAs under compute.
    per_layer = [(_attn_layer_operands(p["sa"], nhead)
                  + _attn_layer_operands(p["ca"], nhead)
                  + _ff_layer_operands(p["ff"])) for p in layer_params]
    stacked = [jnp.stack([lp[i] for lp in per_layer], axis=0)
               for i in range(len(per_layer[0]))]

    in_specs = [
        pl.BlockSpec((T * B, E), lambda l: (0, 0)),      # x: DMA'd once
        pl.BlockSpec((T * S, E), lambda l: (0, 0)),      # memory: DMA'd once
    ]
    for a in stacked:
        in_specs.append(pl.BlockSpec(
            (None,) + a.shape[1:],
            functools.partial(_layer_block_index, nd=a.ndim)))

    kernel = functools.partial(_decoder_stack_kernel,
                               nhead=nhead, T=T, B=B, S=S)
    out = pl.pallas_call(
        kernel,
        out_shape=jax.ShapeDtypeStruct((T * B, E), jnp.float32),
        grid=(num_layers,),
        in_specs=in_specs,
        out_specs=pl.BlockSpec((T * B, E), lambda l: (0, 0)),
        scratch_shapes=[pltpu.VMEM((T * B, E), jnp.float32)],   # residual carry
        compiler_params=pltpu.CompilerParams(
            dimension_semantics=("arbitrary",),      # layers are sequential
            vmem_limit_bytes=64 * 1024 * 1024),      # explicit scoped limit
    )(x2, mem2, *stacked)
    return out.reshape(T, B, E)


# ----------------------------------------------------------------------------
# Pure-JAX reference (mirrors torch.nn.MultiheadAttention / LayerNorm math)
# ----------------------------------------------------------------------------
def _ref_ln(x, g, b):
    mu = jnp.mean(x, axis=-1, keepdims=True)
    var = jnp.mean((x - mu) ** 2, axis=-1, keepdims=True)
    return (x - mu) / jnp.sqrt(var + 1e-5) * g + b


def _ref_mha(q_in, k_in, v_in, p, nhead, attn_mask=None):
    # q_in: (L, N, E) seq-first, exactly like torch MHA (batch_first=False).
    L, N, E = q_in.shape
    S = k_in.shape[0]
    hd = E // nhead
    wq, wk, wv = jnp.split(p["in_w"], 3, axis=0)
    bq, bk, bv = jnp.split(p["in_b"], 3, axis=0)
    q = q_in @ wq.T + bq
    k = k_in @ wk.T + bk
    v = v_in @ wv.T + bv
    q = q.reshape(L, N * nhead, hd).transpose(1, 0, 2) * (1.0 / np.sqrt(hd))
    k = k.reshape(S, N * nhead, hd).transpose(1, 0, 2)
    v = v.reshape(S, N * nhead, hd).transpose(1, 0, 2)
    s = q @ jnp.swapaxes(k, -2, -1)
    if attn_mask is not None:
        s = jnp.where(attn_mask[None], -jnp.inf, s)
    a = jax.nn.softmax(s, axis=-1)
    o = (a @ v).transpose(1, 0, 2).reshape(L, N, E)
    return o @ p["out_w"].T + p["out_b"]


def decoder_reference(x, memory, layer_params, nhead):
    for p in layer_params:
        T = x.shape[0]
        mask = jnp.triu(jnp.ones((T, T), dtype=bool), k=1)
        attn = _ref_mha(x, x, x, p["sa"], nhead, mask)
        x = _ref_ln(x + attn, p["sa"]["g"], p["sa"]["beta"])

        oq = jnp.transpose(x, (1, 0, 2))
        ik = jnp.transpose(memory, (1, 0, 2))
        attn = _ref_mha(oq, ik, ik, p["ca"], nhead, None)
        oq = _ref_ln(oq + attn, p["ca"]["g"], p["ca"]["beta"])
        x = jnp.transpose(oq, (1, 0, 2))

        h = jnp.maximum(x @ p["ff"]["w1"].T + p["ff"]["b1"], 0.0)
        y2 = h @ p["ff"]["w2"].T + p["ff"]["b2"]
        x = _ref_ln(x + y2, p["ff"]["g"], p["ff"]["beta"])
    return x


# ----------------------------------------------------------------------------
# Deterministic parameter init
# ----------------------------------------------------------------------------
def _init_attn(key, E):
    k1, k2, k3, k4 = jax.random.split(key, 4)
    return {
        "in_w": 0.05 * jax.random.normal(k1, (3 * E, E), jnp.float32),
        "in_b": 0.05 * jax.random.normal(k2, (3 * E,), jnp.float32),
        "out_w": 0.05 * jax.random.normal(k3, (E, E), jnp.float32),
        "out_b": 0.05 * jax.random.normal(k4, (E,), jnp.float32),
        "g": jnp.ones((E,), jnp.float32),
        "beta": jnp.zeros((E,), jnp.float32),
    }


def _init_ff(key, E):
    k1, k2, k3, k4 = jax.random.split(key, 4)
    return {
        "w1": 0.05 * jax.random.normal(k1, (2 * E, E), jnp.float32),
        "b1": 0.05 * jax.random.normal(k2, (2 * E,), jnp.float32),
        "w2": 0.05 * jax.random.normal(k3, (E, 2 * E), jnp.float32),
        "b2": 0.05 * jax.random.normal(k4, (E,), jnp.float32),
        "g": jnp.ones((E,), jnp.float32),
        "beta": jnp.zeros((E,), jnp.float32),
    }


def init_decoder(key, num_layers, E):
    layers = []
    for i in range(num_layers):
        k_sa, k_ca, k_ff = jax.random.split(jax.random.fold_in(key, i), 3)
        layers.append({"sa": _init_attn(k_sa, E),
                       "ca": _init_attn(k_ca, E),
                       "ff": _init_ff(k_ff, E)})
    return layers


# ----------------------------------------------------------------------------
# Main
# ----------------------------------------------------------------------------
if __name__ == "__main__":
    T, B, S, E = 8, 2, 6, 32     # seq len, batch, memory len, d_model
    NHEAD = 2
    NUM_LAYERS = 2

    key = jax.random.PRNGKey(0)
    kx, km, kp = jax.random.split(key, 3)
    x = jax.random.normal(kx, (T, B, E), jnp.float32)        # decoder input (T, B, E)
    memory = jax.random.normal(km, (T, S, E), jnp.float32)   # memory (T, S, E)
    params = init_decoder(kp, NUM_LAYERS, E)

    out = decoder_forward(x, memory, params, NHEAD)
    out = jax.block_until_ready(out)

    ref = decoder_reference(x, memory, params, NHEAD)
    # Tolerance accounts for bf16 MXU operands (f32 accumulation) and the
    # approximate EUP reciprocal used for softmax normalization.
    np.testing.assert_allclose(np.asarray(out), np.asarray(ref),
                               rtol=3e-2, atol=3e-2)

    print("KERNEL_OK")
</pallas_src>

<mosaic_0001>
module attributes {stable_mosaic.version = 11 : i64} {
  func.func @_decoder_stack_kernel(%arg0: i32, %arg1: memref<16x32xf32, #tpu.memory_space<vmem>>, %arg2: memref<48x32xbf16, #tpu.memory_space<vmem>>, %arg3: memref<1x2x32x16xbf16, #tpu.memory_space<vmem>>, %arg4: memref<1x2x1x16xf32, #tpu.memory_space<vmem>>, %arg5: memref<1x2x32x16xbf16, #tpu.memory_space<vmem>>, %arg6: memref<1x2x1x16xf32, #tpu.memory_space<vmem>>, %arg7: memref<1x2x32x16xbf16, #tpu.memory_space<vmem>>, %arg8: memref<1x2x1x16xf32, #tpu.memory_space<vmem>>, %arg9: memref<1x2x16x32xbf16, #tpu.memory_space<vmem>>, %arg10: memref<1x1x32xf32, #tpu.memory_space<vmem>>, %arg11: memref<1x1x32xf32, #tpu.memory_space<vmem>>, %arg12: memref<1x1x32xf32, #tpu.memory_space<vmem>>, %arg13: memref<1x2x32x16xbf16, #tpu.memory_space<vmem>>, %arg14: memref<1x2x1x16xf32, #tpu.memory_space<vmem>>, %arg15: memref<1x2x32x16xbf16, #tpu.memory_space<vmem>>, %arg16: memref<1x2x1x16xf32, #tpu.memory_space<vmem>>, %arg17: memref<1x2x32x16xbf16, #tpu.memory_space<vmem>>, %arg18: memref<1x2x1x16xf32, #tpu.memory_space<vmem>>, %arg19: memref<1x2x16x32xbf16, #tpu.memory_space<vmem>>, %arg20: memref<1x1x32xf32, #tpu.memory_space<vmem>>, %arg21: memref<1x1x32xf32, #tpu.memory_space<vmem>>, %arg22: memref<1x1x32xf32, #tpu.memory_space<vmem>>, %arg23: memref<1x32x64xbf16, #tpu.memory_space<vmem>>, %arg24: memref<1x1x64xf32, #tpu.memory_space<vmem>>, %arg25: memref<1x64x32xbf16, #tpu.memory_space<vmem>>, %arg26: memref<1x1x32xf32, #tpu.memory_space<vmem>>, %arg27: memref<1x1x32xf32, #tpu.memory_space<vmem>>, %arg28: memref<1x1x32xf32, #tpu.memory_space<vmem>>, %arg29: memref<16x32xf32, #tpu.memory_space<vmem>>, %arg30: memref<16x32xf32, #tpu.memory_space<vmem>>) attributes {dimension_semantics = [#tpu.dimension_semantics<arbitrary>], iteration_bounds = array<i64: 2>, scalar_prefetch = 0 : i64, scratch_operands = 1 : i64, tpu.core_type = #tpu.core_type<tc>, window_params = [{pipeline_mode = #tpu.pipeline_mode<synchronous>, transform_indices = @transform_0, window_bounds = array<i64: 16, 32>}, {pipeline_mode = #tpu.pipeline_mode<synchronous>, transform_indices = @transform_1, window_bounds = array<i64: 48, 32>}, {transform_indices = @transform_2, window_bounds = array<i64: 1, 2, 32, 16>}, {transform_indices = @transform_3, window_bounds = array<i64: 1, 2, 1, 16>}, {transform_indices = @transform_4, window_bounds = array<i64: 1, 2, 32, 16>}, {transform_indices = @transform_5, window_bounds = array<i64: 1, 2, 1, 16>}, {transform_indices = @transform_6, window_bounds = array<i64: 1, 2, 32, 16>}, {transform_indices = @transform_7, window_bounds = array<i64: 1, 2, 1, 16>}, {transform_indices = @transform_8, window_bounds = array<i64: 1, 2, 16, 32>}, {transform_indices = @transform_9, window_bounds = array<i64: 1, 1, 32>}, {transform_indices = @transform_10, window_bounds = array<i64: 1, 1, 32>}, {transform_indices = @transform_11, window_bounds = array<i64: 1, 1, 32>}, {transform_indices = @transform_12, window_bounds = array<i64: 1, 2, 32, 16>}, {transform_indices = @transform_13, window_bounds = array<i64: 1, 2, 1, 16>}, {transform_indices = @transform_14, window_bounds = array<i64: 1, 2, 32, 16>}, {transform_indices = @transform_15, window_bounds = array<i64: 1, 2, 1, 16>}, {transform_indices = @transform_16, window_bounds = array<i64: 1, 2, 32, 16>}, {transform_indices = @transform_17, window_bounds = array<i64: 1, 2, 1, 16>}, {transform_indices = @transform_18, window_bounds = array<i64: 1, 2, 16, 32>}, {transform_indices = @transform_19, window_bounds = array<i64: 1, 1, 32>}, {transform_indices = @transform_20, window_bounds = array<i64: 1, 1, 32>}, {transform_indices = @transform_21, window_bounds = array<i64: 1, 1, 32>}, {transform_indices = @transform_22, window_bounds = array<i64: 1, 32, 64>}, {transform_indices = @transform_23, window_bounds = array<i64: 1, 1, 64>}, {transform_indices = @transform_24, window_bounds = array<i64: 1, 64, 32>}, {transform_indices = @transform_25, window_bounds = array<i64: 1, 1, 32>}, {transform_indices = @transform_26, window_bounds = array<i64: 1, 1, 32>}, {transform_indices = @transform_27, window_bounds = array<i64: 1, 1, 32>}, {pipeline_mode = #tpu.pipeline_mode<synchronous>, transform_indices = @transform_28, window_bounds = array<i64: 16, 32>}]} {
    %c0_i32 = arith.constant 0 : i32
    %0 = arith.cmpi eq, %arg0, %c0_i32 : i32
    %1 = arith.extui %0 : i1 to i32
    %c0_i32_0 = arith.constant 0 : i32
    %2 = arith.cmpi ne, %1, %c0_i32_0 : i32
    scf.if %2 {
      %c0_218 = arith.constant 0 : index
      %c0_219 = arith.constant 0 : index
      %340 = vector.load %arg1[%c0_218, %c0_219] : memref<16x32xf32, #tpu.memory_space<vmem>>, vector<16x32xf32>
      %c0_220 = arith.constant 0 : index
      %c0_221 = arith.constant 0 : index
      %341 = vector.load %arg30[%c0_220, %c0_221] : memref<16x32xf32, #tpu.memory_space<vmem>>, vector<16x32xf32>
      tpu.vector_store %arg30[%c0_220, %c0_221], %340 {strides = array<i32>} : memref<16x32xf32, #tpu.memory_space<vmem>>, vector<16x32xf32>,
    } else {
    }
    %c0 = arith.constant 0 : index
    %c0_1 = arith.constant 0 : index
    %3 = vector.load %arg30[%c0, %c0_1] : memref<16x32xf32, #tpu.memory_space<vmem>>, vector<16x32xf32>
    %c0_2 = arith.constant 0 : index
    %c0_3 = arith.constant 0 : index
    %4 = vector.load %arg2[%c0_2, %c0_3] : memref<48x32xbf16, #tpu.memory_space<vmem>>, vector<48x32xbf16>
    %5 = tpu.iota {dimensions = array<i32: 0>} : vector<16x16xi32>
    %6 = tpu.iota {dimensions = array<i32: 1>} : vector<16x16xi32>
    %7 = arith.sitofp %5 : vector<16x16xi32> to vector<16x16xf32>
    %cst = arith.constant 5.000000e-01 : f32
    %8 = vector.broadcast %cst : f32 to vector<16x16xf32>
    %9 = arith.addf %7, %8 : vector<16x16xf32>
    %cst_4 = arith.constant 5.000000e-01 : f32
    %10 = vector.broadcast %cst_4 : f32 to vector<16x16xf32>
    %11 = arith.mulf %9, %10 : vector<16x16xf32>
    %12 = arith.fptosi %11 : vector<16x16xf32> to vector<16x16xi32>
    %13 = arith.sitofp %6 : vector<16x16xi32> to vector<16x16xf32>
    %cst_5 = arith.constant 5.000000e-01 : f32
    %14 = vector.broadcast %cst_5 : f32 to vector<16x16xf32>
    %15 = arith.addf %13, %14 : vector<16x16xf32>
    %cst_6 = arith.constant 5.000000e-01 : f32
    %16 = vector.broadcast %cst_6 : f32 to vector<16x16xf32>
    %17 = arith.mulf %15, %16 : vector<16x16xf32>
    %18 = arith.fptosi %17 : vector<16x16xf32> to vector<16x16xi32>
    %c2_i32 = arith.constant 2 : i32
    %19 = vector.broadcast %c2_i32 : i32 to vector<16x16xi32>
    %20 = arith.muli %12, %19 : vector<16x16xi32>
    %21 = arith.subi %5, %20 : vector<16x16xi32>
    %c2_i32_7 = arith.constant 2 : i32
    %22 = vector.broadcast %c2_i32_7 : i32 to vector<16x16xi32>
    %23 = arith.muli %18, %22 : vector<16x16xi32>
    %24 = arith.subi %6, %23 : vector<16x16xi32>
    %25 = arith.cmpi eq, %21, %24 : vector<16x16xi32>
    %26 = arith.cmpi sle, %18, %12 : vector<16x16xi32>
    %27 = arith.andi %25, %26 : vector<16x16xi1>
    %cst_8 = arith.constant 0.000000e+00 : f32
    %cst_9 = arith.constant -1.000000e+30 : f32
    %28 = vector.broadcast %cst_8 : f32 to vector<16x16xf32>
    %29 = vector.broadcast %cst_9 : f32 to vector<16x16xf32>
    %30 = arith.select %27, %28, %29 : vector<16x16xi1>, vector<16x16xf32>
    %31 = tpu.iota {dimensions = array<i32: 0>} : vector<16x48xi32>
    %32 = tpu.iota {dimensions = array<i32: 1>} : vector<16x48xi32>
    %33 = arith.sitofp %31 : vector<16x48xi32> to vector<16x48xf32>
    %cst_10 = arith.constant 5.000000e-01 : f32
    %34 = vector.broadcast %cst_10 : f32 to vector<16x48xf32>
    %35 = arith.addf %33, %34 : vector<16x48xf32>
    %cst_11 = arith.constant 5.000000e-01 : f32
    %36 = vector.broadcast %cst_11 : f32 to vector<16x48xf32>
    %37 = arith.mulf %35, %36 : vector<16x48xf32>
    %38 = arith.fptosi %37 : vector<16x48xf32> to vector<16x48xi32>
    %39 = arith.sitofp %32 : vector<16x48xi32> to vector<16x48xf32>
    %cst_12 = arith.constant 5.000000e-01 : f32
    %40 = vector.broadcast %cst_12 : f32 to vector<16x48xf32>
    %41 = arith.addf %39, %40 : vector<16x48xf32>
    %cst_13 = arith.constant 0.166666672 : f32
    %42 = vector.broadcast %cst_13 : f32 to vector<16x48xf32>
    %43 = arith.mulf %41, %42 : vector<16x48xf32>
    %44 = arith.fptosi %43 : vector<16x48xf32> to vector<16x48xi32>
    %45 = arith.cmpi eq, %38, %44 : vector<16x48xi32>
    %cst_14 = arith.constant 0.000000e+00 : f32
    %cst_15 = arith.constant -1.000000e+30 : f32
    %46 = vector.broadcast %cst_14 : f32 to vector<16x48xf32>
    %47 = vector.broadcast %cst_15 : f32 to vector<16x48xf32>
    %48 = arith.select %45, %46, %47 : vector<16x48xi1>, vector<16x48xf32>
    %49 = arith.truncf %3 : vector<16x32xf32> to vector<16x32xbf16>
    %cst_16 = arith.constant 0.000000e+00 : f32
    %50 = vector.broadcast %cst_16 : f32 to vector<16x32xf32>
    %c0_17 = arith.constant 0 : index
    %c0_18 = arith.constant 0 : index
    %c0_19 = arith.constant 0 : index
    %c0_20 = arith.constant 0 : index
    %51 = vector.load %arg3[%c0_17, %c0_18, %c0_19, %c0_20] : memref<1x2x32x16xbf16, #tpu.memory_space<vmem>>, vector<1x1x32x16xbf16>
    %52 = vector.shape_cast %51 : vector<1x1x32x16xbf16> to vector<32x16xbf16>
    %cst_21 = arith.constant dense<0.000000e+00> : vector<16x16xf32>
    %53 = tpu.matmul %49, %52, %cst_21 {dimension_numbers = #tpu.dot_dimension_numbers<[1], [0], [0], [1], [0, 0, 1, 1], [], []>} : vector<16x32xbf16>, vector<32x16xbf16>, vector<16x16xf32> -> vector<16x16xf32>
    %c0_22 = arith.constant 0 : index
    %c0_23 = arith.constant 0 : index
    %c0_24 = arith.constant 0 : index
    %c0_25 = arith.constant 0 : index
    %54 = vector.load %arg4[%c0_22, %c0_23, %c0_24, %c0_25] : memref<1x2x1x16xf32, #tpu.memory_space<vmem>>, vector<1x1x1x16xf32>
    %55 = vector.shape_cast %54 : vector<1x1x1x16xf32> to vector<1x16xf32>
    %56 = vector.broadcast %55 : vector<1x16xf32> to vector<16x16xf32>
    %57 = arith.addf %53, %56 : vector<16x16xf32>
    %c0_26 = arith.constant 0 : index
    %c0_27 = arith.constant 0 : index
    %c0_28 = arith.constant 0 : index
    %c0_29 = arith.constant 0 : index
    %58 = vector.load %arg5[%c0_26, %c0_27, %c0_28, %c0_29] : memref<1x2x32x16xbf16, #tpu.memory_space<vmem>>, vector<1x1x32x16xbf16>
    %59 = vector.shape_cast %58 : vector<1x1x32x16xbf16> to vector<32x16xbf16>
    %cst_30 = arith.constant dense<0.000000e+00> : vector<16x16xf32>
    %60 = tpu.matmul %49, %59, %cst_30 {dimension_numbers = #tpu.dot_dimension_numbers<[1], [0], [0], [1], [0, 0, 1, 1], [], []>} : vector<16x32xbf16>, vector<32x16xbf16>, vector<16x16xf32> -> vector<16x16xf32>
    %c0_31 = arith.constant 0 : index
    %c0_32 = arith.constant 0 : index
    %c0_33 = arith.constant 0 : index
    %c0_34 = arith.constant 0 : index
    %61 = vector.load %arg6[%c0_31, %c0_32, %c0_33, %c0_34] : memref<1x2x1x16xf32, #tpu.memory_space<vmem>>, vector<1x1x1x16xf32>
    %62 = vector.shape_cast %61 : vector<1x1x1x16xf32> to vector<1x16xf32>
    %63 = vector.broadcast %62 : vector<1x16xf32> to vector<16x16xf32>
    %64 = arith.addf %60, %63 : vector<16x16xf32>
    %c0_35 = arith.constant 0 : index
    %c0_36 = arith.constant 0 : index
    %c0_37 = arith.constant 0 : index
    %c0_38 = arith.constant 0 : index
    %65 = vector.load %arg7[%c0_35, %c0_36, %c0_37, %c0_38] : memref<1x2x32x16xbf16, #tpu.memory_space<vmem>>, vector<1x1x32x16xbf16>
    %66 = vector.shape_cast %65 : vector<1x1x32x16xbf16> to vector<32x16xbf16>
    %cst_39 = arith.constant dense<0.000000e+00> : vector<16x16xf32>
    %67 = tpu.matmul %49, %66, %cst_39 {dimension_numbers = #tpu.dot_dimension_numbers<[1], [0], [0], [1], [0, 0, 1, 1], [], []>} : vector<16x32xbf16>, vector<32x16xbf16>, vector<16x16xf32> -> vector<16x16xf32>
    %c0_40 = arith.constant 0 : index
    %c0_41 = arith.constant 0 : index
    %c0_42 = arith.constant 0 : index
    %c0_43 = arith.constant 0 : index
    %68 = vector.load %arg8[%c0_40, %c0_41, %c0_42, %c0_43] : memref<1x2x1x16xf32, #tpu.memory_space<vmem>>, vector<1x1x1x16xf32>
    %69 = vector.shape_cast %68 : vector<1x1x1x16xf32> to vector<1x16xf32>
    %70 = vector.broadcast %69 : vector<1x16xf32> to vector<16x16xf32>
    %71 = arith.addf %67, %70 : vector<16x16xf32>
    %72 = arith.truncf %57 : vector<16x16xf32> to vector<16x16xbf16>
    %73 = arith.truncf %64 : vector<16x16xf32> to vector<16x16xbf16>
    %74 = tpu.transpose %73, [1, 0] : vector<16x16xbf16> -> vector<16x16xbf16>
    %cst_44 = arith.constant dense<0.000000e+00> : vector<16x16xf32>
    %75 = tpu.matmul %72, %74, %cst_44 {dimension_numbers = #tpu.dot_dimension_numbers<[1], [0], [0], [1], [0, 0, 1, 1], [], []>} : vector<16x16xbf16>, vector<16x16xbf16>, vector<16x16xf32> -> vector<16x16xf32>
    %76 = arith.addf %75, %30 : vector<16x16xf32>
    %cst_45 = arith.constant dense<0xFF800000> : vector<16xf32>
    %77 = vector.multi_reduction <maximumf>, %76, %cst_45 [1] : vector<16x16xf32> to vector<16xf32>
    %78 = vector.shape_cast %77 : vector<16xf32> to vector<16x1xf32>
    %79 = vector.broadcast %78 : vector<16x1xf32> to vector<16x16xf32>
    %80 = arith.subf %76, %79 : vector<16x16xf32>
    %81 = math.exp %80 : vector<16x16xf32>
    %cst_46 = arith.constant dense<0.000000e+00> : vector<16xf32>
    %82 = vector.multi_reduction <add>, %81, %cst_46 [1] : vector<16x16xf32> to vector<16xf32>
    %83 = vector.shape_cast %82 : vector<16xf32> to vector<16x1xf32>
    %84 = tpu.reciprocal %83 {approx = true} : vector<16x1xf32> -> vector<16x1xf32>
    %85 = vector.broadcast %84 : vector<16x1xf32> to vector<16x16xf32>
    %86 = arith.mulf %81, %85 : vector<16x16xf32>
    %87 = arith.truncf %86 : vector<16x16xf32> to vector<16x16xbf16>
    %88 = arith.truncf %71 : vector<16x16xf32> to vector<16x16xbf16>
    %cst_47 = arith.constant dense<0.000000e+00> : vector<16x16xf32>
    %89 = tpu.matmul %87, %88, %cst_47 {dimension_numbers = #tpu.dot_dimension_numbers<[1], [0], [0], [1], [0, 0, 1, 1], [], []>} : vector<16x16xbf16>, vector<16x16xbf16>, vector<16x16xf32> -> vector<16x16xf32>
    %90 = arith.truncf %89 : vector<16x16xf32> to vector<16x16xbf16>
    %c0_48 = arith.constant 0 : index
    %c0_49 = arith.constant 0 : index
    %c0_50 = arith.constant 0 : index
    %c0_51 = arith.constant 0 : index
    %91 = vector.load %arg9[%c0_48, %c0_49, %c0_50, %c0_51] : memref<1x2x16x32xbf16, #tpu.memory_space<vmem>>, vector<1x1x16x32xbf16>
    %92 = vector.shape_cast %91 : vector<1x1x16x32xbf16> to vector<16x32xbf16>
    %cst_52 = arith.constant dense<0.000000e+00> : vector<16x32xf32>
    %93 = tpu.matmul %90, %92, %cst_52 {dimension_numbers = #tpu.dot_dimension_numbers<[1], [0], [0], [1], [0, 0, 1, 1], [], []>} : vector<16x16xbf16>, vector<16x32xbf16>, vector<16x32xf32> -> vector<16x32xf32>
    %94 = arith.addf %50, %93 : vector<16x32xf32>
    %c0_53 = arith.constant 0 : index
    %c1 = arith.constant 1 : index
    %c0_54 = arith.constant 0 : index
    %c0_55 = arith.constant 0 : index
    %95 = vector.load %arg3[%c0_53, %c1, %c0_54, %c0_55] : memref<1x2x32x16xbf16, #tpu.memory_space<vmem>>, vector<1x1x32x16xbf16>
    %96 = vector.shape_cast %95 : vector<1x1x32x16xbf16> to vector<32x16xbf16>
    %cst_56 = arith.constant dense<0.000000e+00> : vector<16x16xf32>
    %97 = tpu.matmul %49, %96, %cst_56 {dimension_numbers = #tpu.dot_dimension_numbers<[1], [0], [0], [1], [0, 0, 1, 1], [], []>} : vector<16x32xbf16>, vector<32x16xbf16>, vector<16x16xf32> -> vector<16x16xf32>
    %c0_57 = arith.constant 0 : index
    %c1_58 = arith.constant 1 : index
    %c0_59 = arith.constant 0 : index
    %c0_60 = arith.constant 0 : index
    %98 = vector.load %arg4[%c0_57, %c1_58, %c0_59, %c0_60] : memref<1x2x1x16xf32, #tpu.memory_space<vmem>>, vector<1x1x1x16xf32>
    %99 = vector.shape_cast %98 : vector<1x1x1x16xf32> to vector<1x16xf32>
    %100 = vector.broadcast %99 : vector<1x16xf32> to vector<16x16xf32>
    %101 = arith.addf %97, %100 : vector<16x16xf32>
    %c0_61 = arith.constant 0 : index
    %c1_62 = arith.constant 1 : index
    %c0_63 = arith.constant 0 : index
    %c0_64 = arith.constant 0 : index
    %102 = vector.load %arg5[%c0_61, %c1_62, %c0_63, %c0_64] : memref<1x2x32x16xbf16, #tpu.memory_space<vmem>>, vector<1x1x32x16xbf16>
    %103 = vector.shape_cast %102 : vector<1x1x32x16xbf16> to vector<32x16xbf16>
    %cst_65 = arith.constant dense<0.000000e+00> : vector<16x16xf32>
    %104 = tpu.matmul %49, %103, %cst_65 {dimension_numbers = #tpu.dot_dimension_numbers<[1], [0], [0], [1], [0, 0, 1, 1], [], []>} : vector<16x32xbf16>, vector<32x16xbf16>, vector<16x16xf32> -> vector<16x16xf32>
    %c0_66 = arith.constant 0 : index
    %c1_67 = arith.constant 1 : index
    %c0_68 = arith.constant 0 : index
    %c0_69 = arith.constant 0 : index
    %105 = vector.load %arg6[%c0_66, %c1_67, %c0_68, %c0_69] : memref<1x2x1x16xf32, #tpu.memory_space<vmem>>, vector<1x1x1x16xf32>
    %106 = vector.shape_cast %105 : vector<1x1x1x16xf32> to vector<1x16xf32>
    %107 = vector.broadcast %106 : vector<1x16xf32> to vector<16x16xf32>
    %108 = arith.addf %104, %107 : vector<16x16xf32>
    %c0_70 = arith.constant 0 : index
    %c1_71 = arith.constant 1 : index
    %c0_72 = arith.constant 0 : index
    %c0_73 = arith.constant 0 : index
    %109 = vector.load %arg7[%c0_70, %c1_71, %c0_72, %c0_73] : memref<1x2x32x16xbf16, #tpu.memory_space<vmem>>, vector<1x1x32x16xbf16>
    %110 = vector.shape_cast %109 : vector<1x1x32x16xbf16> to vector<32x16xbf16>
    %cst_74 = arith.constant dense<0.000000e+00> : vector<16x16xf32>
    %111 = tpu.matmul %49, %110, %cst_74 {dimension_numbers = #tpu.dot_dimension_numbers<[1], [0], [0], [1], [0, 0, 1, 1], [], []>} : vector<16x32xbf16>, vector<32x16xbf16>, vector<16x16xf32> -> vector<16x16xf32>
    %c0_75 = arith.constant 0 : index
    %c1_76 = arith.constant 1 : index
    %c0_77 = arith.constant 0 : index
    %c0_78 = arith.constant 0 : index
    %112 = vector.load %arg8[%c0_75, %c1_76, %c0_77, %c0_78] : memref<1x2x1x16xf32, #tpu.memory_space<vmem>>, vector<1x1x1x16xf32>
    %113 = vector.shape_cast %112 : vector<1x1x1x16xf32> to vector<1x16xf32>
    %114 = vector.broadcast %113 : vector<1x16xf32> to vector<16x16xf32>
    %115 = arith.addf %111, %114 : vector<16x16xf32>
    %116 = arith.truncf %101 : vector<16x16xf32> to vector<16x16xbf16>
    %117 = arith.truncf %108 : vector<16x16xf32> to vector<16x16xbf16>
    %118 = tpu.transpose %117, [1, 0] : vector<16x16xbf16> -> vector<16x16xbf16>
    %cst_79 = arith.constant dense<0.000000e+00> : vector<16x16xf32>
    %119 = tpu.matmul %116, %118, %cst_79 {dimension_numbers = #tpu.dot_dimension_numbers<[1], [0], [0], [1], [0, 0, 1, 1], [], []>} : vector<16x16xbf16>, vector<16x16xbf16>, vector<16x16xf32> -> vector<16x16xf32>
    %120 = arith.addf %119, %30 : vector<16x16xf32>
    %cst_80 = arith.constant dense<0xFF800000> : vector<16xf32>
    %121 = vector.multi_reduction <maximumf>, %120, %cst_80 [1] : vector<16x16xf32> to vector<16xf32>
    %122 = vector.shape_cast %121 : vector<16xf32> to vector<16x1xf32>
    %123 = vector.broadcast %122 : vector<16x1xf32> to vector<16x16xf32>
    %124 = arith.subf %120, %123 : vector<16x16xf32>
    %125 = math.exp %124 : vector<16x16xf32>
    %cst_81 = arith.constant dense<0.000000e+00> : vector<16xf32>
    %126 = vector.multi_reduction <add>, %125, %cst_81 [1] : vector<16x16xf32> to vector<16xf32>
    %127 = vector.shape_cast %126 : vector<16xf32> to vector<16x1xf32>
    %128 = tpu.reciprocal %127 {approx = true} : vector<16x1xf32> -> vector<16x1xf32>
    %129 = vector.broadcast %128 : vector<16x1xf32> to vector<16x16xf32>
    %130 = arith.mulf %125, %129 : vector<16x16xf32>
    %131 = arith.truncf %130 : vector<16x16xf32> to vector<16x16xbf16>
    %132 = arith.truncf %115 : vector<16x16xf32> to vector<16x16xbf16>
    %cst_82 = arith.constant dense<0.000000e+00> : vector<16x16xf32>
    %133 = tpu.matmul %131, %132, %cst_82 {dimension_numbers = #tpu.dot_dimension_numbers<[1], [0], [0], [1], [0, 0, 1, 1], [], []>} : vector<16x16xbf16>, vector<16x16xbf16>, vector<16x16xf32> -> vector<16x16xf32>
    %134 = arith.truncf %133 : vector<16x16xf32> to vector<16x16xbf16>
    %c0_83 = arith.constant 0 : index
    %c1_84 = arith.constant 1 : index
    %c0_85 = arith.constant 0 : index
    %c0_86 = arith.constant 0 : index
    %135 = vector.load %arg9[%c0_83, %c1_84, %c0_85, %c0_86] : memref<1x2x16x32xbf16, #tpu.memory_space<vmem>>, vector<1x1x16x32xbf16>
    %136 = vector.shape_cast %135 : vector<1x1x16x32xbf16> to vector<16x32xbf16>
    %cst_87 = arith.constant dense<0.000000e+00> : vector<16x32xf32>
    %137 = tpu.matmul %134, %136, %cst_87 {dimension_numbers = #tpu.dot_dimension_numbers<[1], [0], [0], [1], [0, 0, 1, 1], [], []>} : vector<16x16xbf16>, vector<16x32xbf16>, vector<16x32xf32> -> vector<16x32xf32>
    %138 = arith.addf %94, %137 : vector<16x32xf32>
    %c0_88 = arith.constant 0 : index
    %c0_89 = arith.constant 0 : index
    %c0_90 = arith.constant 0 : index
    %139 = vector.load %arg10[%c0_88, %c0_89, %c0_90] : memref<1x1x32xf32, #tpu.memory_space<vmem>>, vector<1x1x32xf32>
    %140 = vector.shape_cast %139 : vector<1x1x32xf32> to vector<1x32xf32>
    %141 = vector.broadcast %140 : vector<1x32xf32> to vector<16x32xf32>
    %142 = arith.addf %138, %141 : vector<16x32xf32>
    %143 = arith.addf %3, %142 : vector<16x32xf32>
    %cst_91 = arith.constant dense<0.000000e+00> : vector<16xf32>
    %144 = vector.multi_reduction <add>, %143, %cst_91 [1] : vector<16x32xf32> to vector<16xf32>
    %145 = vector.shape_cast %144 : vector<16xf32> to vector<16x1xf32>
    %cst_92 = arith.constant 3.200000e+01 : f32
    %146 = vector.broadcast %cst_92 : f32 to vector<16x1xf32>
    %147 = arith.divf %145, %146 : vector<16x1xf32>
    %148 = vector.broadcast %147 : vector<16x1xf32> to vector<16x32xf32>
    %149 = arith.subf %143, %148 : vector<16x32xf32>
    %150 = arith.mulf %149, %149 : vector<16x32xf32>
    %cst_93 = arith.constant dense<0.000000e+00> : vector<16xf32>
    %151 = vector.multi_reduction <add>, %150, %cst_93 [1] : vector<16x32xf32> to vector<16xf32>
    %152 = vector.shape_cast %151 : vector<16xf32> to vector<16x1xf32>
    %cst_94 = arith.constant 3.200000e+01 : f32
    %153 = vector.broadcast %cst_94 : f32 to vector<16x1xf32>
    %154 = arith.divf %152, %153 : vector<16x1xf32>
    %155 = vector.broadcast %147 : vector<16x1xf32> to vector<16x32xf32>
    %156 = arith.subf %143, %155 : vector<16x32xf32>
    %cst_95 = arith.constant 9.99999974E-6 : f32
    %157 = vector.broadcast %cst_95 : f32 to vector<16x1xf32>
    %158 = arith.addf %154, %157 : vector<16x1xf32>
    %159 = math.rsqrt %158 : vector<16x1xf32>
    %160 = vector.broadcast %159 : vector<16x1xf32> to vector<16x32xf32>
    %161 = arith.mulf %156, %160 : vector<16x32xf32>
    %c0_96 = arith.constant 0 : index
    %c0_97 = arith.constant 0 : index
    %c0_98 = arith.constant 0 : index
    %162 = vector.load %arg11[%c0_96, %c0_97, %c0_98] : memref<1x1x32xf32, #tpu.memory_space<vmem>>, vector<1x1x32xf32>
    %163 = vector.shape_cast %162 : vector<1x1x32xf32> to vector<1x32xf32>
    %164 = vector.broadcast %163 : vector<1x32xf32> to vector<16x32xf32>
    %165 = arith.mulf %161, %164 : vector<16x32xf32>
    %c0_99 = arith.constant 0 : index
    %c0_100 = arith.constant 0 : index
    %c0_101 = arith.constant 0 : index
    %166 = vector.load %arg12[%c0_99, %c0_100, %c0_101] : memref<1x1x32xf32, #tpu.memory_space<vmem>>, vector<1x1x32xf32>
    %167 = vector.shape_cast %166 : vector<1x1x32xf32> to vector<1x32xf32>
    %168 = vector.broadcast %167 : vector<1x32xf32> to vector<16x32xf32>
    %169 = arith.addf %165, %168 : vector<16x32xf32>
    %170 = arith.truncf %169 : vector<16x32xf32> to vector<16x32xbf16>
    %cst_102 = arith.constant 0.000000e+00 : f32
    %171 = vector.broadcast %cst_102 : f32 to vector<16x32xf32>
    %c0_103 = arith.constant 0 : index
    %c0_104 = arith.constant 0 : index
    %c0_105 = arith.constant 0 : index
    %c0_106 = arith.constant 0 : index
    %172 = vector.load %arg13[%c0_103, %c0_104, %c0_105, %c0_106] : memref<1x2x32x16xbf16, #tpu.memory_space<vmem>>, vector<1x1x32x16xbf16>
    %173 = vector.shape_cast %172 : vector<1x1x32x16xbf16> to vector<32x16xbf16>
    %cst_107 = arith.constant dense<0.000000e+00> : vector<16x16xf32>
    %174 = tpu.matmul %170, %173, %cst_107 {dimension_numbers = #tpu.dot_dimension_numbers<[1], [0], [0], [1], [0, 0, 1, 1], [], []>} : vector<16x32xbf16>, vector<32x16xbf16>, vector<16x16xf32> -> vector<16x16xf32>
    %c0_108 = arith.constant 0 : index
    %c0_109 = arith.constant 0 : index
    %c0_110 = arith.constant 0 : index
    %c0_111 = arith.constant 0 : index
    %175 = vector.load %arg14[%c0_108, %c0_109, %c0_110, %c0_111] : memref<1x2x1x16xf32, #tpu.memory_space<vmem>>, vector<1x1x1x16xf32>
    %176 = vector.shape_cast %175 : vector<1x1x1x16xf32> to vector<1x16xf32>
    %177 = vector.broadcast %176 : vector<1x16xf32> to vector<16x16xf32>
    %178 = arith.addf %174, %177 : vector<16x16xf32>
    %c0_112 = arith.constant 0 : index
    %c0_113 = arith.constant 0 : index
    %c0_114 = arith.constant 0 : index
    %c0_115 = arith.constant 0 : index
    %179 = vector.load %arg15[%c0_112, %c0_113, %c0_114, %c0_115] : memref<1x2x32x16xbf16, #tpu.memory_space<vmem>>, vector<1x1x32x16xbf16>
    %180 = vector.shape_cast %179 : vector<1x1x32x16xbf16> to vector<32x16xbf16>
    %cst_116 = arith.constant dense<0.000000e+00> : vector<48x16xf32>
    %181 = tpu.matmul %4, %180, %cst_116 {dimension_numbers = #tpu.dot_dimension_numbers<[1], [0], [0], [1], [0, 0, 1, 1], [], []>} : vector<48x32xbf16>, vector<32x16xbf16>, vector<48x16xf32> -> vector<48x16xf32>
    %c0_117 = arith.constant 0 : index
    %c0_118 = arith.constant 0 : index
    %c0_119 = arith.constant 0 : index
    %c0_120 = arith.constant 0 : index
    %182 = vector.load %arg16[%c0_117, %c0_118, %c0_119, %c0_120] : memref<1x2x1x16xf32, #tpu.memory_space<vmem>>, vector<1x1x1x16xf32>
    %183 = vector.shape_cast %182 : vector<1x1x1x16xf32> to vector<1x16xf32>
    %184 = vector.broadcast %183 : vector<1x16xf32> to vector<48x16xf32>
    %185 = arith.addf %181, %184 : vector<48x16xf32>
    %c0_121 = arith.constant 0 : index
    %c0_122 = arith.constant 0 : index
    %c0_123 = arith.constant 0 : index
    %c0_124 = arith.constant 0 : index
    %186 = vector.load %arg17[%c0_121, %c0_122, %c0_123, %c0_124] : memref<1x2x32x16xbf16, #tpu.memory_space<vmem>>, vector<1x1x32x16xbf16>
    %187 = vector.shape_cast %186 : vector<1x1x32x16xbf16> to vector<32x16xbf16>
    %cst_125 = arith.constant dense<0.000000e+00> : vector<48x16xf32>
    %188 = tpu.matmul %4, %187, %cst_125 {dimension_numbers = #tpu.dot_dimension_numbers<[1], [0], [0], [1], [0, 0, 1, 1], [], []>} : vector<48x32xbf16>, vector<32x16xbf16>, vector<48x16xf32> -> vector<48x16xf32>
    %c0_126 = arith.constant 0 : index
    %c0_127 = arith.constant 0 : index
    %c0_128 = arith.constant 0 : index
    %c0_129 = arith.constant 0 : index
    %189 = vector.load %arg18[%c0_126, %c0_127, %c0_128, %c0_129] : memref<1x2x1x16xf32, #tpu.memory_space<vmem>>, vector<1x1x1x16xf32>
    %190 = vector.shape_cast %189 : vector<1x1x1x16xf32> to vector<1x16xf32>
    %191 = vector.broadcast %190 : vector<1x16xf32> to vector<48x16xf32>
    %192 = arith.addf %188, %191 : vector<48x16xf32>
    %193 = arith.truncf %178 : vector<16x16xf32> to vector<16x16xbf16>
    %194 = arith.truncf %185 : vector<48x16xf32> to vector<48x16xbf16>
    %195 = tpu.transpose %194, [1, 0] : vector<48x16xbf16> -> vector<16x48xbf16>
    %cst_130 = arith.constant dense<0.000000e+00> : vector<16x48xf32>
    %196 = tpu.matmul %193, %195, %cst_130 {dimension_numbers = #tpu.dot_dimension_numbers<[1], [0], [0], [1], [0, 0, 1, 1], [], []>} : vector<16x16xbf16>, vector<16x48xbf16>, vector<16x48xf32> -> vector<16x48xf32>
    %197 = arith.addf %196, %48 : vector<16x48xf32>
    %cst_131 = arith.constant dense<0xFF800000> : vector<16xf32>
    %198 = vector.multi_reduction <maximumf>, %197, %cst_131 [1] : vector<16x48xf32> to vector<16xf32>
    %199 = vector.shape_cast %198 : vector<16xf32> to vector<16x1xf32>
    %200 = vector.broadcast %199 : vector<16x1xf32> to vector<16x48xf32>
    %201 = arith.subf %197, %200 : vector<16x48xf32>
    %202 = math.exp %201 : vector<16x48xf32>
    %cst_132 = arith.constant dense<0.000000e+00> : vector<16xf32>
    %203 = vector.multi_reduction <add>, %202, %cst_132 [1] : vector<16x48xf32> to vector<16xf32>
    %204 = vector.shape_cast %203 : vector<16xf32> to vector<16x1xf32>
    %205 = tpu.reciprocal %204 {approx = true} : vector<16x1xf32> -> vector<16x1xf32>
    %206 = vector.broadcast %205 : vector<16x1xf32> to vector<16x48xf32>
    %207 = arith.mulf %202, %206 : vector<16x48xf32>
    %208 = arith.truncf %207 : vector<16x48xf32> to vector<16x48xbf16>
    %209 = arith.truncf %192 : vector<48x16xf32> to vector<48x16xbf16>
    %cst_133 = arith.constant dense<0.000000e+00> : vector<16x16xf32>
    %210 = tpu.matmul %208, %209, %cst_133 {dimension_numbers = #tpu.dot_dimension_numbers<[1], [0], [0], [1], [0, 0, 1, 1], [], []>} : vector<16x48xbf16>, vector<48x16xbf16>, vector<16x16xf32> -> vector<16x16xf32>
    %211 = arith.truncf %210 : vector<16x16xf32> to vector<16x16xbf16>
    %c0_134 = arith.constant 0 : index
    %c0_135 = arith.constant 0 : index
    %c0_136 = arith.constant 0 : index
    %c0_137 = arith.constant 0 : index
    %212 = vector.load %arg19[%c0_134, %c0_135, %c0_136, %c0_137] : memref<1x2x16x32xbf16, #tpu.memory_space<vmem>>, vector<1x1x16x32xbf16>
    %213 = vector.shape_cast %212 : vector<1x1x16x32xbf16> to vector<16x32xbf16>
    %cst_138 = arith.constant dense<0.000000e+00> : vector<16x32xf32>
    %214 = tpu.matmul %211, %213, %cst_138 {dimension_numbers = #tpu.dot_dimension_numbers<[1], [0], [0], [1], [0, 0, 1, 1], [], []>} : vector<16x16xbf16>, vector<16x32xbf16>, vector<16x32xf32> -> vector<16x32xf32>
    %215 = arith.addf %171, %214 : vector<16x32xf32>
    %c0_139 = arith.constant 0 : index
    %c1_140 = arith.constant 1 : index
    %c0_141 = arith.constant 0 : index
    %c0_142 = arith.constant 0 : index
    %216 = vector.load %arg13[%c0_139, %c1_140, %c0_141, %c0_142] : memref<1x2x32x16xbf16, #tpu.memory_space<vmem>>, vector<1x1x32x16xbf16>
    %217 = vector.shape_cast %216 : vector<1x1x32x16xbf16> to vector<32x16xbf16>
    %cst_143 = arith.constant dense<0.000000e+00> : vector<16x16xf32>
    %218 = tpu.matmul %170, %217, %cst_143 {dimension_numbers = #tpu.dot_dimension_numbers<[1], [0], [0], [1], [0, 0, 1, 1], [], []>} : vector<16x32xbf16>, vector<32x16xbf16>, vector<16x16xf32> -> vector<16x16xf32>
    %c0_144 = arith.constant 0 : index
    %c1_145 = arith.constant 1 : index
    %c0_146 = arith.constant 0 : index
    %c0_147 = arith.constant 0 : index
    %219 = vector.load %arg14[%c0_144, %c1_145, %c0_146, %c0_147] : memref<1x2x1x16xf32, #tpu.memory_space<vmem>>, vector<1x1x1x16xf32>
    %220 = vector.shape_cast %219 : vector<1x1x1x16xf32> to vector<1x16xf32>
    %221 = vector.broadcast %220 : vector<1x16xf32> to vector<16x16xf32>
    %222 = arith.addf %218, %221 : vector<16x16xf32>
    %c0_148 = arith.constant 0 : index
    %c1_149 = arith.constant 1 : index
    %c0_150 = arith.constant 0 : index
    %c0_151 = arith.constant 0 : index
    %223 = vector.load %arg15[%c0_148, %c1_149, %c0_150, %c0_151] : memref<1x2x32x16xbf16, #tpu.memory_space<vmem>>, vector<1x1x32x16xbf16>
    %224 = vector.shape_cast %223 : vector<1x1x32x16xbf16> to vector<32x16xbf16>
    %cst_152 = arith.constant dense<0.000000e+00> : vector<48x16xf32>
    %225 = tpu.matmul %4, %224, %cst_152 {dimension_numbers = #tpu.dot_dimension_numbers<[1], [0], [0], [1], [0, 0, 1, 1], [], []>} : vector<48x32xbf16>, vector<32x16xbf16>, vector<48x16xf32> -> vector<48x16xf32>
    %c0_153 = arith.constant 0 : index
    %c1_154 = arith.constant 1 : index
    %c0_155 = arith.constant 0 : index
    %c0_156 = arith.constant 0 : index
    %226 = vector.load %arg16[%c0_153, %c1_154, %c0_155, %c0_156] : memref<1x2x1x16xf32, #tpu.memory_space<vmem>>, vector<1x1x1x16xf32>
    %227 = vector.shape_cast %226 : vector<1x1x1x16xf32> to vector<1x16xf32>
    %228 = vector.broadcast %227 : vector<1x16xf32> to vector<48x16xf32>
    %229 = arith.addf %225, %228 : vector<48x16xf32>
    %c0_157 = arith.constant 0 : index
    %c1_158 = arith.constant 1 : index
    %c0_159 = arith.constant 0 : index
    %c0_160 = arith.constant 0 : index
    %230 = vector.load %arg17[%c0_157, %c1_158, %c0_159, %c0_160] : memref<1x2x32x16xbf16, #tpu.memory_space<vmem>>, vector<1x1x32x16xbf16>
    %231 = vector.shape_cast %230 : vector<1x1x32x16xbf16> to vector<32x16xbf16>
    %cst_161 = arith.constant dense<0.000000e+00> : vector<48x16xf32>
    %232 = tpu.matmul %4, %231, %cst_161 {dimension_numbers = #tpu.dot_dimension_numbers<[1], [0], [0], [1], [0, 0, 1, 1], [], []>} : vector<48x32xbf16>, vector<32x16xbf16>, vector<48x16xf32> -> vector<48x16xf32>
    %c0_162 = arith.constant 0 : index
    %c1_163 = arith.constant 1 : index
    %c0_164 = arith.constant 0 : index
    %c0_165 = arith.constant 0 : index
    %233 = vector.load %arg18[%c0_162, %c1_163, %c0_164, %c0_165] : memref<1x2x1x16xf32, #tpu.memory_space<vmem>>, vector<1x1x1x16xf32>
    %234 = vector.shape_cast %233 : vector<1x1x1x16xf32> to vector<1x16xf32>
    %235 = vector.broadcast %234 : vector<1x16xf32> to vector<48x16xf32>
    %236 = arith.addf %232, %235 : vector<48x16xf32>
    %237 = arith.truncf %222 : vector<16x16xf32> to vector<16x16xbf16>
    %238 = arith.truncf %229 : vector<48x16xf32> to vector<48x16xbf16>
    %239 = tpu.transpose %238, [1, 0] : vector<48x16xbf16> -> vector<16x48xbf16>
    %cst_166 = arith.constant dense<0.000000e+00> : vector<16x48xf32>
    %240 = tpu.matmul %237, %239, %cst_166 {dimension_numbers = #tpu.dot_dimension_numbers<[1], [0], [0], [1], [0, 0, 1, 1], [], []>} : vector<16x16xbf16>, vector<16x48xbf16>, vector<16x48xf32> -> vector<16x48xf32>
    %241 = arith.addf %240, %48 : vector<16x48xf32>
    %cst_167 = arith.constant dense<0xFF800000> : vector<16xf32>
    %242 = vector.multi_reduction <maximumf>, %241, %cst_167 [1] : vector<16x48xf32> to vector<16xf32>
    %243 = vector.shape_cast %242 : vector<16xf32> to vector<16x1xf32>
    %244 = vector.broadcast %243 : vector<16x1xf32> to vector<16x48xf32>
    %245 = arith.subf %241, %244 : vector<16x48xf32>
    %246 = math.exp %245 : vector<16x48xf32>
    %cst_168 = arith.constant dense<0.000000e+00> : vector<16xf32>
    %247 = vector.multi_reduction <add>, %246, %cst_168 [1] : vector<16x48xf32> to vector<16xf32>
    %248 = vector.shape_cast %247 : vector<16xf32> to vector<16x1xf32>
    %249 = tpu.reciprocal %248 {approx = true} : vector<16x1xf32> -> vector<16x1xf32>
    %250 = vector.broadcast %249 : vector<16x1xf32> to vector<16x48xf32>
    %251 = arith.mulf %246, %250 : vector<16x48xf32>
    %252 = arith.truncf %251 : vector<16x48xf32> to vector<16x48xbf16>
    %253 = arith.truncf %236 : vector<48x16xf32> to vector<48x16xbf16>
    %cst_169 = arith.constant dense<0.000000e+00> : vector<16x16xf32>
    %254 = tpu.matmul %252, %253, %cst_169 {dimension_numbers = #tpu.dot_dimension_numbers<[1], [0], [0], [1], [0, 0, 1, 1], [], []>} : vector<16x48xbf16>, vector<48x16xbf16>, vector<16x16xf32> -> vector<16x16xf32>
    %255 = arith.truncf %254 : vector<16x16xf32> to vector<16x16xbf16>
    %c0_170 = arith.constant 0 : index
    %c1_171 = arith.constant 1 : index
    %c0_172 = arith.constant 0 : index
    %c0_173 = arith.constant 0 : index
    %256 = vector.load %arg19[%c0_170, %c1_171, %c0_172, %c0_173] : memref<1x2x16x32xbf16, #tpu.memory_space<vmem>>, vector<1x1x16x32xbf16>
    %257 = vector.shape_cast %256 : vector<1x1x16x32xbf16> to vector<16x32xbf16>
    %cst_174 = arith.constant dense<0.000000e+00> : vector<16x32xf32>
    %258 = tpu.matmul %255, %257, %cst_174 {dimension_numbers = #tpu.dot_dimension_numbers<[1], [0], [0], [1], [0, 0, 1, 1], [], []>} : vector<16x16xbf16>, vector<16x32xbf16>, vector<16x32xf32> -> vector<16x32xf32>
    %259 = arith.addf %215, %258 : vector<16x32xf32>
    %c0_175 = arith.constant 0 : index
    %c0_176 = arith.constant 0 : index
    %c0_177 = arith.constant 0 : index
    %260 = vector.load %arg20[%c0_175, %c0_176, %c0_177] : memref<1x1x32xf32, #tpu.memory_space<vmem>>, vector<1x1x32xf32>
    %261 = vector.shape_cast %260 : vector<1x1x32xf32> to vector<1x32xf32>
    %262 = vector.broadcast %261 : vector<1x32xf32> to vector<16x32xf32>
    %263 = arith.addf %259, %262 : vector<16x32xf32>
    %264 = arith.addf %169, %263 : vector<16x32xf32>
    %cst_178 = arith.constant dense<0.000000e+00> : vector<16xf32>
    %265 = vector.multi_reduction <add>, %264, %cst_178 [1] : vector<16x32xf32> to vector<16xf32>
    %266 = vector.shape_cast %265 : vector<16xf32> to vector<16x1xf32>
    %cst_179 = arith.constant 3.200000e+01 : f32
    %267 = vector.broadcast %cst_179 : f32 to vector<16x1xf32>
    %268 = arith.divf %266, %267 : vector<16x1xf32>
    %269 = vector.broadcast %268 : vector<16x1xf32> to vector<16x32xf32>
    %270 = arith.subf %264, %269 : vector<16x32xf32>
    %271 = arith.mulf %270, %270 : vector<16x32xf32>
    %cst_180 = arith.constant dense<0.000000e+00> : vector<16xf32>
    %272 = vector.multi_reduction <add>, %271, %cst_180 [1] : vector<16x32xf32> to vector<16xf32>
    %273 = vector.shape_cast %272 : vector<16xf32> to vector<16x1xf32>
    %cst_181 = arith.constant 3.200000e+01 : f32
    %274 = vector.broadcast %cst_181 : f32 to vector<16x1xf32>
    %275 = arith.divf %273, %274 : vector<16x1xf32>
    %276 = vector.broadcast %268 : vector<16x1xf32> to vector<16x32xf32>
    %277 = arith.subf %264, %276 : vector<16x32xf32>
    %cst_182 = arith.constant 9.99999974E-6 : f32
    %278 = vector.broadcast %cst_182 : f32 to vector<16x1xf32>
    %279 = arith.addf %275, %278 : vector<16x1xf32>
    %280 = math.rsqrt %279 : vector<16x1xf32>
    %281 = vector.broadcast %280 : vector<16x1xf32> to vector<16x32xf32>
    %282 = arith.mulf %277, %281 : vector<16x32xf32>
    %c0_183 = arith.constant 0 : index
    %c0_184 = arith.constant 0 : index
    %c0_185 = arith.constant 0 : index
    %283 = vector.load %arg21[%c0_183, %c0_184, %c0_185] : memref<1x1x32xf32, #tpu.memory_space<vmem>>, vector<1x1x32xf32>
    %284 = vector.shape_cast %283 : vector<1x1x32xf32> to vector<1x32xf32>
    %285 = vector.broadcast %284 : vector<1x32xf32> to vector<16x32xf32>
    %286 = arith.mulf %282, %285 : vector<16x32xf32>
    %c0_186 = arith.constant 0 : index
    %c0_187 = arith.constant 0 : index
    %c0_188 = arith.constant 0 : index
    %287 = vector.load %arg22[%c0_186, %c0_187, %c0_188] : memref<1x1x32xf32, #tpu.memory_space<vmem>>, vector<1x1x32xf32>
    %288 = vector.shape_cast %287 : vector<1x1x32xf32> to vector<1x32xf32>
    %289 = vector.broadcast %288 : vector<1x32xf32> to vector<16x32xf32>
    %290 = arith.addf %286, %289 : vector<16x32xf32>
    %291 = arith.truncf %290 : vector<16x32xf32> to vector<16x32xbf16>
    %c0_189 = arith.constant 0 : index
    %c0_190 = arith.constant 0 : index
    %c0_191 = arith.constant 0 : index
    %292 = vector.load %arg23[%c0_189, %c0_190, %c0_191] : memref<1x32x64xbf16, #tpu.memory_space<vmem>>, vector<1x32x64xbf16>
    %293 = vector.shape_cast %292 : vector<1x32x64xbf16> to vector<32x64xbf16>
    %cst_192 = arith.constant dense<0.000000e+00> : vector<16x64xf32>
    %294 = tpu.matmul %291, %293, %cst_192 {dimension_numbers = #tpu.dot_dimension_numbers<[1], [0], [0], [1], [0, 0, 1, 1], [], []>} : vector<16x32xbf16>, vector<32x64xbf16>, vector<16x64xf32> -> vector<16x64xf32>
    %c0_193 = arith.constant 0 : index
    %c0_194 = arith.constant 0 : index
    %c0_195 = arith.constant 0 : index
    %295 = vector.load %arg24[%c0_193, %c0_194, %c0_195] : memref<1x1x64xf32, #tpu.memory_space<vmem>>, vector<1x1x64xf32>
    %296 = vector.shape_cast %295 : vector<1x1x64xf32> to vector<1x64xf32>
    %297 = vector.broadcast %296 : vector<1x64xf32> to vector<16x64xf32>
    %298 = arith.addf %294, %297 : vector<16x64xf32>
    %cst_196 = arith.constant 0.000000e+00 : f32
    %299 = vector.broadcast %cst_196 : f32 to vector<16x64xf32>
    %300 = arith.maximumf %298, %299 : vector<16x64xf32>
    %301 = arith.truncf %300 : vector<16x64xf32> to vector<16x64xbf16>
    %c0_197 = arith.constant 0 : index
    %c0_198 = arith.constant 0 : index
    %c0_199 = arith.constant 0 : index
    %302 = vector.load %arg25[%c0_197, %c0_198, %c0_199] : memref<1x64x32xbf16, #tpu.memory_space<vmem>>, vector<1x64x32xbf16>
    %303 = vector.shape_cast %302 : vector<1x64x32xbf16> to vector<64x32xbf16>
    %cst_200 = arith.constant dense<0.000000e+00> : vector<16x32xf32>
    %304 = tpu.matmul %301, %303, %cst_200 {dimension_numbers = #tpu.dot_dimension_numbers<[1], [0], [0], [1], [0, 0, 1, 1], [], []>} : vector<16x64xbf16>, vector<64x32xbf16>, vector<16x32xf32> -> vector<16x32xf32>
    %c0_201 = arith.constant 0 : index
    %c0_202 = arith.constant 0 : index
    %c0_203 = arith.constant 0 : index
    %305 = vector.load %arg26[%c0_201, %c0_202, %c0_203] : memref<1x1x32xf32, #tpu.memory_space<vmem>>, vector<1x1x32xf32>
    %306 = vector.shape_cast %305 : vector<1x1x32xf32> to vector<1x32xf32>
    %307 = vector.broadcast %306 : vector<1x32xf32> to vector<16x32xf32>
    %308 = arith.addf %304, %307 : vector<16x32xf32>
    %309 = arith.addf %290, %308 : vector<16x32xf32>
    %cst_204 = arith.constant dense<0.000000e+00> : vector<16xf32>
    %310 = vector.multi_reduction <add>, %309, %cst_204 [1] : vector<16x32xf32> to vector<16xf32>
    %311 = vector.shape_cast %310 : vector<16xf32> to vector<16x1xf32>
    %cst_205 = arith.constant 3.200000e+01 : f32
    %312 = vector.broadcast %cst_205 : f32 to vector<16x1xf32>
    %313 = arith.divf %311, %312 : vector<16x1xf32>
    %314 = vector.broadcast %313 : vector<16x1xf32> to vector<16x32xf32>
    %315 = arith.subf %309, %314 : vector<16x32xf32>
    %316 = arith.mulf %315, %315 : vector<16x32xf32>
    %cst_206 = arith.constant dense<0.000000e+00> : vector<16xf32>
    %317 = vector.multi_reduction <add>, %316, %cst_206 [1] : vector<16x32xf32> to vector<16xf32>
    %318 = vector.shape_cast %317 : vector<16xf32> to vector<16x1xf32>
    %cst_207 = arith.constant 3.200000e+01 : f32
    %319 = vector.broadcast %cst_207 : f32 to vector<16x1xf32>
    %320 = arith.divf %318, %319 : vector<16x1xf32>
    %321 = vector.broadcast %313 : vector<16x1xf32> to vector<16x32xf32>
    %322 = arith.subf %309, %321 : vector<16x32xf32>
    %cst_208 = arith.constant 9.99999974E-6 : f32
    %323 = vector.broadcast %cst_208 : f32 to vector<16x1xf32>
    %324 = arith.addf %320, %323 : vector<16x1xf32>
    %325 = math.rsqrt %324 : vector<16x1xf32>
    %326 = vector.broadcast %325 : vector<16x1xf32> to vector<16x32xf32>
    %327 = arith.mulf %322, %326 : vector<16x32xf32>
    %c0_209 = arith.constant 0 : index
    %c0_210 = arith.constant 0 : index
    %c0_211 = arith.constant 0 : index
    %328 = vector.load %arg27[%c0_209, %c0_210, %c0_211] : memref<1x1x32xf32, #tpu.memory_space<vmem>>, vector<1x1x32xf32>
    %329 = vector.shape_cast %328 : vector<1x1x32xf32> to vector<1x32xf32>
    %330 = vector.broadcast %329 : vector<1x32xf32> to vector<16x32xf32>
    %331 = arith.mulf %327, %330 : vector<16x32xf32>
    %c0_212 = arith.constant 0 : index
    %c0_213 = arith.constant 0 : index
    %c0_214 = arith.constant 0 : index
    %332 = vector.load %arg28[%c0_212, %c0_213, %c0_214] : memref<1x1x32xf32, #tpu.memory_space<vmem>>, vector<1x1x32xf32>
    %333 = vector.shape_cast %332 : vector<1x1x32xf32> to vector<1x32xf32>
    %334 = vector.broadcast %333 : vector<1x32xf32> to vector<16x32xf32>
    %335 = arith.addf %331, %334 : vector<16x32xf32>
    %c0_215 = arith.constant 0 : index
    %c0_216 = arith.constant 0 : index
    %336 = vector.load %arg30[%c0_215, %c0_216] : memref<16x32xf32, #tpu.memory_space<vmem>>, vector<16x32xf32>
    tpu.vector_store %arg30[%c0_215, %c0_216], %335 {strides = array<i32>} : memref<16x32xf32, #tpu.memory_space<vmem>>, vector<16x32xf32>,
    %c1_i32 = arith.constant 1 : i32
    %337 = arith.cmpi eq, %arg0, %c1_i32 : i32
    %338 = arith.extui %337 : i1 to i32
    %c0_i32_217 = arith.constant 0 : i32
    %339 = arith.cmpi ne, %338, %c0_i32_217 : i32
    scf.if %339 {
      %c0_218 = arith.constant 0 : index
      %c0_219 = arith.constant 0 : index
      %340 = vector.load %arg29[%c0_218, %c0_219] : memref<16x32xf32, #tpu.memory_space<vmem>>, vector<16x32xf32>
      tpu.vector_store %arg29[%c0_218, %c0_219], %335 {strides = array<i32>} : memref<16x32xf32, #tpu.memory_space<vmem>>, vector<16x32xf32>,
    } else {
    }
    return
  }
  func.func @transform_0(%arg0: i32) -> (i32, i32) {
    %c0_i32 = arith.constant 0 : i32
    %c0_i32_0 = arith.constant 0 : i32
    %c0_i32_1 = arith.constant 0 : i32
    return %c0_i32, %c0_i32_0 : i32, i32
  }
  func.func @transform_1(%arg0: i32) -> (i32, i32) {
    %c0_i32 = arith.constant 0 : i32
    %c0_i32_0 = arith.constant 0 : i32
    %c0_i32_1 = arith.constant 0 : i32
    return %c0_i32, %c0_i32_0 : i32, i32
  }
  func.func @transform_2(%arg0: i32) -> (i32, i32, i32, i32) {
    %c0_i32 = arith.constant 0 : i32
    %c0_i32_0 = arith.constant 0 : i32
    %c0_i32_1 = arith.constant 0 : i32
    %c0_i32_2 = arith.constant 0 : i32
    return %arg0, %c0_i32, %c0_i32_0, %c0_i32_1 : i32, i32, i32, i32
  }
  func.func @transform_3(%arg0: i32) -> (i32, i32, i32, i32) {
    %c0_i32 = arith.constant 0 : i32
    %c0_i32_0 = arith.constant 0 : i32
    %c0_i32_1 = arith.constant 0 : i32
    %c0_i32_2 = arith.constant 0 : i32
    return %arg0, %c0_i32, %c0_i32_0, %c0_i32_1 : i32, i32, i32, i32
  }
  func.func @transform_4(%arg0: i32) -> (i32, i32, i32, i32) {
    %c0_i32 = arith.constant 0 : i32
    %c0_i32_0 = arith.constant 0 : i32
    %c0_i32_1 = arith.constant 0 : i32
    %c0_i32_2 = arith.constant 0 : i32
    return %arg0, %c0_i32, %c0_i32_0, %c0_i32_1 : i32, i32, i32, i32
  }
  func.func @transform_5(%arg0: i32) -> (i32, i32, i32, i32) {
    %c0_i32 = arith.constant 0 : i32
    %c0_i32_0 = arith.constant 0 : i32
    %c0_i32_1 = arith.constant 0 : i32
    %c0_i32_2 = arith.constant 0 : i32
    return %arg0, %c0_i32, %c0_i32_0, %c0_i32_1 : i32, i32, i32, i32
  }
  func.func @transform_6(%arg0: i32) -> (i32, i32, i32, i32) {
    %c0_i32 = arith.constant 0 : i32
    %c0_i32_0 = arith.constant 0 : i32
    %c0_i32_1 = arith.constant 0 : i32
    %c0_i32_2 = arith.constant 0 : i32
    return %arg0, %c0_i32, %c0_i32_0, %c0_i32_1 : i32, i32, i32, i32
  }
  func.func @transform_7(%arg0: i32) -> (i32, i32, i32, i32) {
    %c0_i32 = arith.constant 0 : i32
    %c0_i32_0 = arith.constant 0 : i32
    %c0_i32_1 = arith.constant 0 : i32
    %c0_i32_2 = arith.constant 0 : i32
    return %arg0, %c0_i32, %c0_i32_0, %c0_i32_1 : i32, i32, i32, i32
  }
  func.func @transform_8(%arg0: i32) -> (i32, i32, i32, i32) {
    %c0_i32 = arith.constant 0 : i32
    %c0_i32_0 = arith.constant 0 : i32
    %c0_i32_1 = arith.constant 0 : i32
    %c0_i32_2 = arith.constant 0 : i32
    return %arg0, %c0_i32, %c0_i32_0, %c0_i32_1 : i32, i32, i32, i32
  }
  func.func @transform_9(%arg0: i32) -> (i32, i32, i32) {
    %c0_i32 = arith.constant 0 : i32
    %c0_i32_0 = arith.constant 0 : i32
    %c0_i32_1 = arith.constant 0 : i32
    return %arg0, %c0_i32, %c0_i32_0 : i32, i32, i32
  }
  func.func @transform_10(%arg0: i32) -> (i32, i32, i32) {
    %c0_i32 = arith.constant 0 : i32
    %c0_i32_0 = arith.constant 0 : i32
    %c0_i32_1 = arith.constant 0 : i32
    return %arg0, %c0_i32, %c0_i32_0 : i32, i32, i32
  }
  func.func @transform_11(%arg0: i32) -> (i32, i32, i32) {
    %c0_i32 = arith.constant 0 : i32
    %c0_i32_0 = arith.constant 0 : i32
    %c0_i32_1 = arith.constant 0 : i32
    return %arg0, %c0_i32, %c0_i32_0 : i32, i32, i32
  }
  func.func @transform_12(%arg0: i32) -> (i32, i32, i32, i32) {
    %c0_i32 = arith.constant 0 : i32
    %c0_i32_0 = arith.constant 0 : i32
    %c0_i32_1 = arith.constant 0 : i32
    %c0_i32_2 = arith.constant 0 : i32
    return %arg0, %c0_i32, %c0_i32_0, %c0_i32_1 : i32, i32, i32, i32
  }
  func.func @transform_13(%arg0: i32) -> (i32, i32, i32, i32) {
    %c0_i32 = arith.constant 0 : i32
    %c0_i32_0 = arith.constant 0 : i32
    %c0_i32_1 = arith.constant 0 : i32
    %c0_i32_2 = arith.constant 0 : i32
    return %arg0, %c0_i32, %c0_i32_0, %c0_i32_1 : i32, i32, i32, i32
  }
  func.func @transform_14(%arg0: i32) -> (i32, i32, i32, i32) {
    %c0_i32 = arith.constant 0 : i32
    %c0_i32_0 = arith.constant 0 : i32
    %c0_i32_1 = arith.constant 0 : i32
    %c0_i32_2 = arith.constant 0 : i32
    return %arg0, %c0_i32, %c0_i32_0, %c0_i32_1 : i32, i32, i32, i32
  }
  func.func @transform_15(%arg0: i32) -> (i32, i32, i32, i32) {
    %c0_i32 = arith.constant 0 : i32
    %c0_i32_0 = arith.constant 0 : i32
    %c0_i32_1 = arith.constant 0 : i32
    %c0_i32_2 = arith.constant 0 : i32
    return %arg0, %c0_i32, %c0_i32_0, %c0_i32_1 : i32, i32, i32, i32
  }
  func.func @transform_16(%arg0: i32) -> (i32, i32, i32, i32) {
    %c0_i32 = arith.constant 0 : i32
    %c0_i32_0 = arith.constant 0 : i32
    %c0_i32_1 = arith.constant 0 : i32
    %c0_i32_2 = arith.constant 0 : i32
    return %arg0, %c0_i32, %c0_i32_0, %c0_i32_1 : i32, i32, i32, i32
  }
  func.func @transform_17(%arg0: i32) -> (i32, i32, i32, i32) {
    %c0_i32 = arith.constant 0 : i32
    %c0_i32_0 = arith.constant 0 : i32
    %c0_i32_1 = arith.constant 0 : i32
    %c0_i32_2 = arith.constant 0 : i32
    return %arg0, %c0_i32, %c0_i32_0, %c0_i32_1 : i32, i32, i32, i32
  }
  func.func @transform_18(%arg0: i32) -> (i32, i32, i32, i32) {
    %c0_i32 = arith.constant 0 : i32
    %c0_i32_0 = arith.constant 0 : i32
    %c0_i32_1 = arith.constant 0 : i32
    %c0_i32_2 = arith.constant 0 : i32
    return %arg0, %c0_i32, %c0_i32_0, %c0_i32_1 : i32, i32, i32, i32
  }
  func.func @transform_19(%arg0: i32) -> (i32, i32, i32) {
    %c0_i32 = arith.constant 0 : i32
    %c0_i32_0 = arith.constant 0 : i32
    %c0_i32_1 = arith.constant 0 : i32
    return %arg0, %c0_i32, %c0_i32_0 : i32, i32, i32
  }
  func.func @transform_20(%arg0: i32) -> (i32, i32, i32) {
    %c0_i32 = arith.constant 0 : i32
    %c0_i32_0 = arith.constant 0 : i32
    %c0_i32_1 = arith.constant 0 : i32
    return %arg0, %c0_i32, %c0_i32_0 : i32, i32, i32
  }
  func.func @transform_21(%arg0: i32) -> (i32, i32, i32) {
    %c0_i32 = arith.constant 0 : i32
    %c0_i32_0 = arith.constant 0 : i32
    %c0_i32_1 = arith.constant 0 : i32
    return %arg0, %c0_i32, %c0_i32_0 : i32, i32, i32
  }
  func.func @transform_22(%arg0: i32) -> (i32, i32, i32) {
    %c0_i32 = arith.constant 0 : i32
    %c0_i32_0 = arith.constant 0 : i32
    %c0_i32_1 = arith.constant 0 : i32
    return %arg0, %c0_i32, %c0_i32_0 : i32, i32, i32
  }
  func.func @transform_23(%arg0: i32) -> (i32, i32, i32) {
    %c0_i32 = arith.constant 0 : i32
    %c0_i32_0 = arith.constant 0 : i32
    %c0_i32_1 = arith.constant 0 : i32
    return %arg0, %c0_i32, %c0_i32_0 : i32, i32, i32
  }
  func.func @transform_24(%arg0: i32) -> (i32, i32, i32) {
    %c0_i32 = arith.constant 0 : i32
    %c0_i32_0 = arith.constant 0 : i32
    %c0_i32_1 = arith.constant 0 : i32
    return %arg0, %c0_i32, %c0_i32_0 : i32, i32, i32
  }
  func.func @transform_25(%arg0: i32) -> (i32, i32, i32) {
    %c0_i32 = arith.constant 0 : i32
    %c0_i32_0 = arith.constant 0 : i32
    %c0_i32_1 = arith.constant 0 : i32
    return %arg0, %c0_i32, %c0_i32_0 : i32, i32, i32
  }
  func.func @transform_26(%arg0: i32) -> (i32, i32, i32) {
    %c0_i32 = arith.constant 0 : i32
    %c0_i32_0 = arith.constant 0 : i32
    %c0_i32_1 = arith.constant 0 : i32
    return %arg0, %c0_i32, %c0_i32_0 : i32, i32, i32
  }
  func.func @transform_27(%arg0: i32) -> (i32, i32, i32) {
    %c0_i32 = arith.constant 0 : i32
    %c0_i32_0 = arith.constant 0 : i32
    %c0_i32_1 = arith.constant 0 : i32
    return %arg0, %c0_i32, %c0_i32_0 : i32, i32, i32
  }
  func.func @transform_28(%arg0: i32) -> (i32, i32) {
    %c0_i32 = arith.constant 0 : i32
    %c0_i32_0 = arith.constant 0 : i32
    %c0_i32_1 = arith.constant 0 : i32
    return %c0_i32, %c0_i32_0 : i32, i32
  }
}

</mosaic_0001>

<bundles_post_ra>
// kernel: decoder_forward.1
= control target key start
LH: loop header
LB: loop body
LE: loop exit
PB: predicated region body
PF: predicated region fallthrough
CT: control target
= control target key end

     0   :  { %s7457_s0 = inlined_call_operand.hbm [shape: f32[16,32], index: 0, kind: input, shape index: {}]   ;;  %s7458_s1 = inlined_call_operand.hbm [shape: bf16[48,32], index: 1, kind: input, shape index: {}]   ;;  %s7459_s2 = inlined_call_operand.hbm [shape: bf16[2,2,32,16], index: 2, kind: input, shape index: {}]   ;;  %s7460_s3 = inlined_call_operand.hbm [shape: f32[2,2,1,16], index: 3, kind: input, shape index: {}]   ;;  %s7461_s4 = inlined_call_operand.hbm [shape: bf16[2,2,32,16], index: 4, kind: input, shape index: {}]   ;;  %s7462_s5 = inlined_call_operand.hbm [shape: f32[2,2,1,16], index: 5, kind: input, shape index: {}]   ;;  %s7463_s6 = inlined_call_operand.hbm [shape: bf16[2,2,32,16], index: 6, kind: input, shape index: {}]   ;;  %s7464_s7 = inlined_call_operand.hbm [shape: f32[2,2,1,16], index: 7, kind: input, shape index: {}]   ;;  %s7465_s8 = inlined_call_operand.hbm [shape: bf16[2,2,16,32], index: 8, kind: input, shape index: {}]   ;;  %s7466_s9 = inlined_call_operand.hbm [shape: f32[2,1,32], index: 9, kind: input, shape index: {}]   ;;  %s7467_s10 = inlined_call_operand.hbm [shape: f32[2,1,32], index: 10, kind: input, shape index: {}]   ;;  %s7468_s11 = inlined_call_operand.hbm [shape: f32[2,1,32], index: 11, kind: input, shape index: {}]   ;;  %s7469_s12 = inlined_call_operand.hbm [shape: bf16[2,2,32,16], index: 12, kind: input, shape index: {}]   ;;  %s7470_s13 = inlined_call_operand.hbm [shape: f32[2,2,1,16], index: 13, kind: input, shape index: {}]   ;;  %s7471_s14 = inlined_call_operand.hbm [shape: bf16[2,2,32,16], index: 14, kind: input, shape index: {}]   ;;  %s7472_s15 = inlined_call_operand.hbm [shape: f32[2,2,1,16], index: 15, kind: input, shape index: {}]   ;;  %s7473_s16 = inlined_call_operand.hbm [shape: bf16[2,2,32,16], index: 16, kind: input, shape index: {}]   ;;  %s7474_s17 = inlined_call_operand.hbm [shape: f32[2,2,1,16], index: 17, kind: input, shape index: {}]   ;;  %s7475_s18 = inlined_call_operand.hbm [shape: bf16[2,2,16,32], index: 18, kind: input, shape index: {}]   ;;  %s7476_s19 = inlined_call_operand.hbm [shape: f32[2,1,32], index: 19, kind: input, shape index: {}]   ;;  %s7477_s20 = inlined_call_operand.hbm [shape: f32[2,1,32], index: 20, kind: input, shape index: {}]   ;;  %s7478_s21 = inlined_call_operand.hbm [shape: f32[2,1,32], index: 21, kind: input, shape index: {}]   ;;  %s7479_s22 = inlined_call_operand.hbm [shape: bf16[2,32,64], index: 22, kind: input, shape index: {}]   ;;  %s7480_s23 = inlined_call_operand.hbm [shape: f32[2,1,64], index: 23, kind: input, shape index: {}]   ;;  %s7481_s24 = inlined_call_operand.hbm [shape: bf16[2,64,32], index: 24, kind: input, shape index: {}]   ;;  %s7482_s25 = inlined_call_operand.hbm [shape: f32[2,1,32], index: 25, kind: input, shape index: {}]   ;;  %s7483_s26 = inlined_call_operand.hbm [shape: f32[2,1,32], index: 26, kind: input, shape index: {}]   ;;  %s7484_s27 = inlined_call_operand.hbm [shape: f32[2,1,32], index: 27, kind: input, shape index: {}]   ;;  %s7485_s28 = inlined_call_operand.hbm [shape: f32[16,32], index: 28, kind: output, shape index: {}]  }
   0x1   :  { %7557 = sst [smem:[#allocation49_spill]] %s7457_s0 }
   0x2   :  { %7558 = sst [smem:[#allocation50_spill]] %s7458_s1 }
   0x3   :  { %7559 = sst [smem:[#allocation51_spill]] %s7459_s2 }
   0x4   :  { %7560 = sst [smem:[#allocation52_spill]] %s7460_s3 }
   0x5   :  { %7561 = sst [smem:[#allocation53_spill]] %s7461_s4 }
   0x6   :  { %7562 = sst [smem:[#allocation54_spill]] %s7462_s5 }
   0x7   :  { %7563 = sst [smem:[#allocation55_spill]] %s7463_s6 }
   0x8   :  { %7564 = sst [smem:[#allocation56_spill]] %s7464_s7 }
   0x9   :  { %7565 = sst [smem:[#allocation57_spill]] %s7465_s8 }
   0xa   :  { %7566 = sst [smem:[#allocation58_spill]] %s7466_s9 }
   0xb   :  { %7567 = sst [smem:[#allocation59_spill]] %s7467_s10 }
   0xc   :  { %7568 = sst [smem:[#allocation60_spill]] %s7468_s11 }
   0xd   :  { %7569 = sst [smem:[#allocation61_spill]] %s7469_s12 }
   0xe   :  { %7570 = sst [smem:[#allocation62_spill]] %s7470_s13 }
   0xf   :  { %7571 = sst [smem:[#allocation63_spill]] %s7471_s14 }
  0x10   :  { %7572 = sst [smem:[#allocation64_spill]] %s7472_s15 }
  0x11   :  { %7573 = sst [smem:[#allocation65_spill]] %s7474_s17 }
  0x12   :  { %7574 = sst [smem:[#allocation66_spill]] %s7475_s18 }
  0x13   :  { %7575 = sst [smem:[#allocation67_spill]] %s7476_s19 }
  0x14   :  { %7576 = sst [smem:[#allocation68_spill]] %s7477_s20 }
  0x15   :  { %7577 = sst [smem:[#allocation69_spill]] %s7478_s21 }
  0x16   :  { %7578 = sst [smem:[#allocation70_spill]] %s7479_s22 }
  0x17   :  { %7579 = sst [smem:[#allocation71_spill]] %s7480_s23 }
  0x18   :  { %7580 = sst [smem:[#allocation72_spill]] %s7481_s24 }
  0x19   :  { %7581 = sst [smem:[#allocation73_spill]] %s7482_s25 }
  0x1a   :  { %7582 = sst [smem:[#allocation74_spill]] %s7483_s26 }
  0x1b   :  { %7583 = sst [smem:[#allocation75_spill]] %s7484_s27 }
  0x1c   :  { %7584 = sst [smem:[#allocation76_spill]] %s7485_s28 }
  0x1d   :  { %33 = vsyncpa [#allocation4], 0 }
  0x1e   :  { %34 = vsyncpa [#allocation7], 0 }
  0x1f   :  { %35 = vsyncpa [#allocation5], 0  ;;  %s6058_s8 = smov 0   ;;  %s6060_s5 = smov 0  }
  0x20   :  { %s6062_s9 = smov 0   ;;  %s6064_s30 = smov 0  }
  0x21 LB: > { %7585 = sst [smem:[#allocation39_spill]] %s5861_s5  ;;  %s6077_s3 = sadd.s32 4294967295, %s5869_s30   ;;  %s5869_s30 = sphi %s6064_s30, %s7667_s30   ;;  %s5865_s9 = sphi %s6062_s9, %s7670_s9   ;;  %s5861_s5 = sphi %s6060_s5, %s7669_s5   ;;  %s5857_s8 = sphi %s6058_s8, %s7668_s8  }
  0x22   : > { %7586 = sst [smem:[#allocation40_spill]] %s5865_s9  ;;  %s6080_s6 = sadd.s32 1, %s5869_s30  }
  0x23   : > { %7587 = sst [smem:[#allocation41_spill]] %s6077_s3  ;;  %s87_s10 = ssub.s32 %s5869_s30, %s6080_s6 }
  0x24   : > { %7588 = sst [smem:[#allocation42_spill]] %s6080_s6  ;;  %s90_s0 = sadd.s32 1, %s5865_s9 }
  0x25   : > { %p88_p0 = scmp.eq.s32.totalorder %s87_s10, 0  ;;  %p97_p1 = scmp.ne.s32.totalorder %s5865_s9, %s5861_s5 }
  0x26   : > { %p98_p2 = scmp.eq.s32.totalorder %s5869_s30, 0  ;;  %p103_p3 = scmp.ne.s32.totalorder %s5861_s5, %s5857_s8 }
  0x27   : > { %s6090_s11 = scalar_select %p88_p0, %s5865_s9, %s90_s0  }
  0x28   : > { %p6092_p4 = por %p98_p2, %p97_p1  ;;  %p7508_p5 = scmp.eq.s32.totalorder %s6077_s3, 0 }
  0x29   : > { %7589 = sst [smem:[#allocation43_spill]] %s6090_s11  ;;  %p4249_p6 = scmp.ge.s32.totalorder %s5869_s30, 1 }
  0x2a   : > { %s7590_s29 = scalar_select %p6092_p4, 1, 0 }
  0x2b   : > { %p785_p7 = scmp.lt.s32.totalorder %s5869_s30, 3  ;;  %p6101_p8 = por %p7508_p5, %p103_p3 }
  0x2c   : > { %s5871_s12 = smov [#allocation3]   ;;  %s5872_s8 = smov [#allocation6]  }
  0x2d   : > { %s7591_s2 = scalar_select %p6101_p8, 1, 0 }
  0x2e   : > { %p6106_p10 = pnand %p4249_p6, %p785_p7  ;;  %s797_s1 = sshll.u32 %s5871_s12, 4  ;;  %s798_s1 = int_to_ptr.vmem [resolvable:$true] %s797_s1 }
  0x2f   : > { %7592 = sst [smem:[#allocation44_spill]] %s7591_s2  ;;  %s810_s10 = sshll.u32 %s5872_s8, 4  ;;  %s6118_s10 = int_to_ptr.vmem [resolvable:$true] %s810_s10 }
  0x30   : > { %s7593_s7 = scalar_select %p6106_p10, 1, 0 }
  0x31   : > { %p4871_p11 = pneg %p6106_p10  ;;  %s7596_s6 = sld [smem:[#allocation49_spill]] }
  0x32   : > { %7594 = sst [smem:[#allocation45_spill]] %s7593_s7 }
  0x33   : > { %p6114_p12 = pnand %p4871_p11, %p7508_p5 }
  0x35   : > { %p5015_p0 = pneg %p6114_p12 }
  0x37   : > { %s5013_s28 = scalar_lea.hbm %s7596_s6, 256 }
  0x38   : > { %p5014_p13 = scmp.ne.s32.totalorder %s7596_s6, %s5013_s28  ;;  %p5020_p3 = scmp.lt.u32.totalorder %s5013_s28, %s7596_s6 }
  0x3a   : > { %p5016_p1 = pnand %p5015_p0, %p5014_p13 }
  0x3c   : > { %p5017_p2 = pneg %p5016_p1 }
  0x3e   : > { %p5022_p6 = pnand %p5020_p3, %p5017_p2 }
  0x40   : > { %5025 = shalt.err (!%p5022_p6)
}
  0x41   : > { %s5026_s8 = scalar_lea.vmem %s798_s1, 256  ;;  %p5034_p5 = scmp.lt.s32.totalorder %s798_s1, %s798_s1 }
  0x42   : > { %p5027_p7 = scmp.ne.s32.totalorder %s798_s1, %s5026_s8  ;;  %p5035_p8 = scmp.lt.s32.totalorder %s5026_s8, %s5026_s8 }
  0x44   : > { %p5029_p11 = pnand %p5027_p7, %p5015_p0  ;;  %p5036_p10 = por %p5035_p8, %p5034_p5 }
  0x46   : > { %p5030_p9 = pneg %p5029_p11 }
  0x48   : > { %p5037_p4 = pnand %p5036_p10, %p5030_p9 }
  0x4a   : > { %5040 = shalt.err (!%p5037_p4)
}
  0x4b   : > { %s5873_s11 = smov 128   ;;  %s5874_s2 = smov 8  }
  0x4c   : > { %4874 = dma.hbm_to_vmem [thread:$0]  (!%p6114_p12), %s7596_s6, 256, %s798_s1, [#allocation4], %s5873_s11, %s5873_s11, %s5874_s2  }
  0x4d   : > { %s7597_s12 = sld [smem:[#allocation50_spill]] }
  0x53   : > { %s5041_s7 = scalar_lea.hbm %s7597_s12, 384 }
  0x54   : > { %p5042_p13 = scmp.ne.s32.totalorder %s7597_s12, %s5041_s7  ;;  %p5048_p8 = scmp.lt.u32.totalorder %s5041_s7, %s7597_s12 }
  0x56   : > { %p5044_p4 = pnand %p5042_p13, %p5015_p0 }
  0x58   : > { %p5045_p5 = pneg %p5044_p4 }
  0x5a   : > { %p5050_p9 = pnand %p5048_p8, %p5045_p5 }
  0x5c   : > { %5053 = shalt.err (!%p5050_p9)
}
  0x5d   : > { %s5054_s1 = scalar_lea.vmem %s6118_s10, 384  ;;  %p5062_p3 = scmp.lt.s32.totalorder %s6118_s10, %s6118_s10 }
  0x5e   : > { %p5055_p10 = scmp.ne.s32.totalorder %s6118_s10, %s5054_s1  ;;  %p5063_p6 = scmp.lt.s32.totalorder %s5054_s1, %s5054_s1 }
  0x60   : > { %p5057_p1 = pnand %p5055_p10, %p5015_p0  ;;  %p5064_p7 = por %p5063_p6, %p5062_p3 }
  0x62   : > { %p5058_p2 = pneg %p5057_p1 }
  0x64   : > { %p5065_p11 = pnand %p5064_p7, %p5058_p2 }
  0x66   : > { %5068 = shalt.err (!%p5065_p11)
}
  0x67   : > { %s5875_s25 = smov 64   ;;  %s5876_s26 = smov 4  }
  0x68   : > { %4877 = dma.hbm_to_vmem [thread:$0]  (!%p6114_p12), %s7597_s12, 384, %s6118_s10, [#allocation7], %s5875_s25, %s5875_s25, %s5876_s26  }
  0x69   : > { %p4252_p13 = scmp.ge.s32.totalorder %s5869_s30, 2 }
  0x6b   : > { %820 = sbr.rel (%p4252_p13) target bundleno = 770 (0x302), region = 24 }
  0x72   : > { %s824_s11 = sand.u32 1, %s5869_s30   ;;  %s6170_s2 = sand.u32 1, %s5865_s9  }
  0x73   : > { %s6173_s28 = sshll.u32 %s6170_s2, 5  ;;  %s6176_s4 = sshll.u32 %s5869_s30, 9 }
  0x74   : > { %s7598_s3 = sld [smem:[#allocation51_spill]]  ;;  %s828_s8 = scalar_lea.vmem [#allocation8], %s6173_s28 }
  0x75   : > { %s835_s1 = sshll.u32 %s828_s8, 4  ;;  %s6188_s25 = sshll.u32 %s6170_s2, 1  ;;  %s6185_s1 = int_to_ptr.vmem [resolvable:$true] %s835_s1 }
  0x76   : > { %s6190_s26 = scalar_lea.sflag [#allocation4], %s824_s11  ;;  %p7599_p0 = scmp.ne.s32.totalorder %s7590_s29, 0 }
  0x7a   : > { %s6182_s0 = scalar_lea.hbm %s7598_s3, %s6176_s4  ;;  %s5073_s10 = scalar_lea.hbm %s7598_s3, 1024 }
  0x7b   : > { %s5069_s27 = scalar_lea.hbm %s6182_s0, 512  ;;  %p5074_p8 = scmp.lt.u32.totalorder %s6182_s0, %s7598_s3 }
  0x7c   : > { %p5070_p12 = scmp.ne.s32.totalorder %s6182_s0, %s5069_s27  ;;  %p5075_p9 = scmp.lt.u32.totalorder %s5073_s10, %s5069_s27 }
  0x7d   : > { %p5077_p1 = scmp.lt.u32.totalorder %s5069_s27, %s6182_s0 }
  0x7e   : > { %p5071_p4 = pnand %p5070_p12, %p7599_p0  ;;  %p5076_p10 = por %p5075_p9, %p5074_p8 }
  0x80   : > { %p5072_p5 = pneg %p5071_p4  ;;  %p5078_p2 = por %p5077_p1, %p5076_p10 }
  0x82   : > { %p5079_p3 = pnand %p5078_p2, %p5072_p5 }
  0x84   : > { %5082 = shalt.err (!%p5079_p3)
}
  0x85   : > { %s5083_s11 = scalar_lea.vmem %s6185_s1, 512  ;;  %s5877_s8 = smov [#allocation8]  }
  0x86   : > { %p5084_p6 = scmp.ne.s32.totalorder %s6185_s1, %s5083_s11  ;;  %s5087_s7 = sshll.u32 %s5877_s8, 4  ;;  %s5088_s7 = int_to_ptr.vmem [resolvable:$false] %s5087_s7 }
  0x87   : > { %s5089_s6 = scalar_lea.vmem %s5088_s7, 1024  ;;  %p5090_p13 = scmp.lt.s32.totalorder %s6185_s1, %s5088_s7 }
  0x88   : > { %p5085_p7 = pnand %p5084_p6, %p7599_p0  ;;  %p5091_p12 = scmp.lt.s32.totalorder %s5089_s6, %s5083_s11 }
  0x8a   : > { %p5086_p11 = pneg %p5085_p7  ;;  %p5092_p4 = por %p5091_p12, %p5090_p13 }
  0x8c   : > { %p5093_p8 = pnand %p5092_p4, %p5086_p11 }
  0x8e   : > { %5096 = shalt.err (!%p5093_p8)
}
  0x8f   : > { %s7521_s12 = smov 64   ;;  %s7523_s27 = smov 4  }
  0x90   : > { %4811 = dma.hbm_to_vmem [thread:$0]  (%p7599_p0), %s6182_s0, 512, %s6185_s1, %s6190_s26, %s7521_s12, %s7521_s12, %s7523_s27  }
  0x91   : > { %s6218_s5 = sshll.u32 %s5869_s30, 5  ;;  %s7600_s8 = sld [smem:[#allocation52_spill]] }
  0x92   : > { %s849_s3 = scalar_lea.vmem [#allocation9], %s6188_s25 }
  0x93   : > { %s856_s9 = sshll.u32 %s849_s3, 4  ;;  %s6227_s9 = int_to_ptr.vmem [resolvable:$true] %s856_s9 }
  0x97   : > { %s7601_s7 = smov %s7600_s8  ;;  %s6224_s6 = scalar_lea.hbm %s7600_s8, %s6218_s5 }
  0x98   : > { %s5097_s24 = scalar_lea.hbm %s6224_s6, 32  ;;  %s5101_s12 = scalar_lea.hbm %s7601_s7, 64 }
  0x99   : > { %p5098_p5 = scmp.ne.s32.totalorder %s6224_s6, %s5097_s24  ;;  %p5102_p1 = scmp.lt.u32.totalorder %s6224_s6, %s7601_s7 }
  0x9a   : > { %p5103_p2 = scmp.lt.u32.totalorder %s5101_s12, %s5097_s24  ;;  %p5105_p6 = scmp.lt.u32.totalorder %s5097_s24, %s6224_s6 }
  0x9b   : > { %p5099_p9 = pnand %p5098_p5, %p7599_p0 }
  0x9c   : > { %p5104_p3 = por %p5103_p2, %p5102_p1 }
  0x9d   : > { %p5100_p10 = pneg %p5099_p9 }
  0x9e   : > { %p5106_p7 = por %p5105_p6, %p5104_p3 }
  0xa0   : > { %p5107_p11 = pnand %p5106_p7, %p5100_p10 }
  0xa2   : > { %5110 = shalt.err (!%p5107_p11)
}
  0xa3   : > { %s5111_s3 = scalar_lea.vmem %s6227_s9, 32  ;;  %s5880_s8 = smov [#allocation9]  }
  0xa4   : > { %p5112_p13 = scmp.ne.s32.totalorder %s6227_s9, %s5111_s3  ;;  %s5115_s0 = sshll.u32 %s5880_s8, 4  ;;  %s5116_s0 = int_to_ptr.vmem [resolvable:$false] %s5115_s0 }
  0xa5   : > { %s5117_s1 = scalar_lea.vmem %s5116_s0, 64  ;;  %p5118_p8 = scmp.lt.s32.totalorder %s6227_s9, %s5116_s0 }
  0xa6   : > { %p5113_p12 = pnand %p5112_p13, %p7599_p0  ;;  %p5119_p5 = scmp.lt.s32.totalorder %s5117_s1, %s5111_s3 }
  0xa8   : > { %p5114_p4 = pneg %p5113_p12  ;;  %p5120_p9 = por %p5119_p5, %p5118_p8 }
  0xaa   : > { %p5121_p1 = pnand %p5120_p9, %p5114_p4 }
  0xac   : > { %5124 = shalt.err (!%p5121_p1)
}
  0xad   : > { %s7526_s24 = smov 16   ;;  %s7528_s12 = smov 1  }
  0xae   : > { %4812 = dma.hbm_to_vmem [thread:$0]  (%p7599_p0), %s6224_s6, 32, %s6227_s9, %s6190_s26, %s7526_s24, %s7526_s24, %s7528_s12  }
  0xaf   : > { %s7602_s3 = sld [smem:[#allocation53_spill]]  ;;  %s870_s0 = scalar_lea.vmem [#allocation10], %s6173_s28 }
  0xb0   : > { %s877_s1 = sshll.u32 %s870_s0, 4  ;;  %s6261_s1 = int_to_ptr.vmem [resolvable:$true] %s877_s1 }
  0xb5   : > { %s6258_s8 = scalar_lea.hbm %s7602_s3, %s6176_s4  ;;  %s5129_s6 = scalar_lea.hbm %s7602_s3, 1024 }
  0xb6   : > { %s5125_s27 = scalar_lea.hbm %s6258_s8, 512  ;;  %p5130_p6 = scmp.lt.u32.totalorder %s6258_s8, %s7602_s3 }
  0xb7   : > { %p5126_p10 = scmp.ne.s32.totalorder %s6258_s8, %s5125_s27  ;;  %p5131_p7 = scmp.lt.u32.totalorder %s5129_s6, %s5125_s27 }
  0xb8   : > { %p5133_p13 = scmp.lt.u32.totalorder %s5125_s27, %s6258_s8 }
  0xb9   : > { %p5127_p2 = pnand %p5126_p10, %p7599_p0  ;;  %p5132_p11 = por %p5131_p7, %p5130_p6 }
  0xbb   : > { %p5128_p3 = pneg %p5127_p2  ;;  %p5134_p12 = por %p5133_p13, %p5132_p11 }
  0xbd   : > { %p5135_p4 = pnand %p5134_p12, %p5128_p3 }
  0xbf   : > { %5138 = shalt.err (!%p5135_p4)
}
  0xc0   : > { %s5139_s0 = scalar_lea.vmem %s6261_s1, 512  ;;  %s5883_s7 = smov [#allocation10]  }
  0xc1   : > { %p5140_p8 = scmp.ne.s32.totalorder %s6261_s1, %s5139_s0  ;;  %s5143_s9 = sshll.u32 %s5883_s7, 4  ;;  %s5144_s9 = int_to_ptr.vmem [resolvable:$false] %s5143_s9 }
  0xc2   : > { %s5145_s10 = scalar_lea.vmem %s5144_s9, 1024  ;;  %p5146_p1 = scmp.lt.s32.totalorder %s6261_s1, %s5144_s9 }
  0xc3   : > { %p5141_p5 = pnand %p5140_p8, %p7599_p0  ;;  %p5147_p10 = scmp.lt.s32.totalorder %s5145_s10, %s5139_s0 }
  0xc5   : > { %p5142_p9 = pneg %p5141_p5  ;;  %p5148_p2 = por %p5147_p10, %p5146_p1 }
  0xc7   : > { %p5149_p6 = pnand %p5148_p2, %p5142_p9 }
  0xc9   : > { %5152 = shalt.err (!%p5149_p6)
}
  0xca   : > { %s7603_s27 = smov 4   ;;  %s7604_s6 = smov 64  }
  0xcb   : > { %4813 = dma.hbm_to_vmem [thread:$0]  (%p7599_p0), %s6258_s8, 512, %s6261_s1, %s6190_s26, %s7604_s6, %s7604_s6, %s7603_s27  }
  0xcc   : > { %s7605_s24 = sld [smem:[#allocation54_spill]]  ;;  %s891_s0 = scalar_lea.vmem [#allocation11], %s6188_s25 }
  0xcd   : > { %s898_s10 = sshll.u32 %s891_s0, 4  ;;  %s6295_s10 = int_to_ptr.vmem [resolvable:$true] %s898_s10 }
  0xd2   : > { %s6292_s9 = scalar_lea.hbm %s7605_s24, %s6218_s5  ;;  %s5157_s1 = scalar_lea.hbm %s7605_s24, 64 }
  0xd3   : > { %s5153_s12 = scalar_lea.hbm %s6292_s9, 32  ;;  %p5158_p13 = scmp.lt.u32.totalorder %s6292_s9, %s7605_s24 }
  0xd4   : > { %p5154_p3 = scmp.ne.s32.totalorder %s6292_s9, %s5153_s12  ;;  %p5159_p12 = scmp.lt.u32.totalorder %s5157_s1, %s5153_s12 }
  0xd5   : > { %p5161_p8 = scmp.lt.u32.totalorder %s5153_s12, %s6292_s9 }
  0xd6   : > { %p5155_p7 = pnand %p5154_p3, %p7599_p0  ;;  %p5160_p4 = por %p5159_p12, %p5158_p13 }
  0xd8   : > { %p5156_p11 = pneg %p5155_p7  ;;  %p5162_p5 = por %p5161_p8, %p5160_p4 }
  0xda   : > { %p5163_p9 = pnand %p5162_p5, %p5156_p11 }
  0xdc   : > { %5166 = shalt.err (!%p5163_p9)
}
  0xdd   : > { %s5167_s0 = scalar_lea.vmem %s6295_s10, 32  ;;  %s5884_s3 = smov [#allocation11]  }
  0xde   : > { %p5168_p1 = scmp.ne.s32.totalorder %s6295_s10, %s5167_s0  ;;  %s5171_s8 = sshll.u32 %s5884_s3, 4  ;;  %s5172_s8 = int_to_ptr.vmem [resolvable:$false] %s5171_s8 }
  0xdf   : > { %s5173_s11 = scalar_lea.vmem %s5172_s8, 64  ;;  %p5174_p6 = scmp.lt.s32.totalorder %s6295_s10, %s5172_s8 }
  0xe0   : > { %p5169_p10 = pnand %p5168_p1, %p7599_p0  ;;  %p5175_p3 = scmp.lt.s32.totalorder %s5173_s11, %s5167_s0 }
  0xe2   : > { %p5170_p2 = pneg %p5169_p10  ;;  %p5176_p7 = por %p5175_p3, %p5174_p6 }
  0xe4   : > { %p5177_p13 = pnand %p5176_p7, %p5170_p2 }
  0xe6   : > { %5180 = shalt.err (!%p5177_p13)
}
  0xe7   : > { %s7606_s12 = smov 1   ;;  %s7607_s1 = smov 16  }
  0xe8   : > { %4814 = dma.hbm_to_vmem [thread:$0]  (%p7599_p0), %s6292_s9, 32, %s6295_s10, %s6190_s26, %s7607_s1, %s7607_s1, %s7606_s12  }
  0xe9   : > { %s7608_s24 = sld [smem:[#allocation55_spill]]  ;;  %s912_s0 = scalar_lea.vmem [#allocation12], %s6173_s28 }
  0xea   : > { %s919_s11 = sshll.u32 %s912_s0, 4  ;;  %s6329_s11 = int_to_ptr.vmem [resolvable:$true] %s919_s11 }
  0xef   : > { %s6326_s8 = scalar_lea.hbm %s7608_s24, %s6176_s4  ;;  %s5185_s10 = scalar_lea.hbm %s7608_s24, 1024 }
  0xf0   : > { %s5181_s23 = scalar_lea.hbm %s6326_s8, 512  ;;  %p5186_p8 = scmp.lt.u32.totalorder %s6326_s8, %s7608_s24 }
  0xf1   : > { %p5182_p11 = scmp.ne.s32.totalorder %s6326_s8, %s5181_s23  ;;  %p5187_p5 = scmp.lt.u32.totalorder %s5185_s10, %s5181_s23 }
  0xf2   : > { %p5189_p1 = scmp.lt.u32.totalorder %s5181_s23, %s6326_s8 }
  0xf3   : > { %p5183_p12 = pnand %p5182_p11, %p7599_p0  ;;  %p5188_p9 = por %p5187_p5, %p5186_p8 }
  0xf5   : > { %p5184_p4 = pneg %p5183_p12  ;;  %p5190_p10 = por %p5189_p1, %p5188_p9 }
  0xf7   : > { %p5191_p2 = pnand %p5190_p10, %p5184_p4 }
  0xf9   : > { %5194 = shalt.err (!%p5191_p2)
}
  0xfa   : > { %s5195_s0 = scalar_lea.vmem %s6329_s11, 512  ;;  %s5885_s22 = smov [#allocation12]  }
  0xfb   : > { %p5196_p6 = scmp.ne.s32.totalorder %s6329_s11, %s5195_s0  ;;  %s5199_s9 = sshll.u32 %s5885_s22, 4  ;;  %s5200_s9 = int_to_ptr.vmem [resolvable:$false] %s5199_s9 }
  0xfc   : > { %s5201_s7 = scalar_lea.vmem %s5200_s9, 1024  ;;  %p5202_p13 = scmp.lt.s32.totalorder %s6329_s11, %s5200_s9 }
  0xfd   : > { %p5197_p3 = pnand %p5196_p6, %p7599_p0  ;;  %p5203_p11 = scmp.lt.s32.totalorder %s5201_s7, %s5195_s0 }
  0xff   : > { %p5198_p7 = pneg %p5197_p3  ;;  %p5204_p12 = por %p5203_p11, %p5202_p13 }
 0x101   : > { %p5205_p8 = pnand %p5204_p12, %p5198_p7 }
 0x103   : > { %5208 = shalt.err (!%p5205_p8)
}
 0x104   : > { %4815 = dma.hbm_to_vmem [thread:$0]  (%p7599_p0), %s6326_s8, 512, %s6329_s11, %s6190_s26, %s7604_s6, %s7604_s6, %s7603_s27  }
 0x105   : > { %s7609_s3 = sld [smem:[#allocation56_spill]]  ;;  %s933_s22 = scalar_lea.vmem [#allocation13], %s6188_s25 }
 0x106   : > { %s940_s9 = sshll.u32 %s933_s22, 4  ;;  %s6366_s7 = sshll.u32 %s6170_s2, 4  ;;  %s6363_s9 = int_to_ptr.vmem [resolvable:$true] %s940_s9 }
 0x107   : > { %7610 = sst [smem:[#allocation46_spill]] %s6366_s7 }
 0x10b   : > { %s6360_s0 = scalar_lea.hbm %s7609_s3, %s6218_s5  ;;  %s5213_s23 = scalar_lea.hbm %s7609_s3, 64 }
 0x10c   : > { %s5209_s24 = scalar_lea.hbm %s6360_s0, 32  ;;  %p5214_p1 = scmp.lt.u32.totalorder %s6360_s0, %s7609_s3 }
 0x10d   : > { %p5210_p4 = scmp.ne.s32.totalorder %s6360_s0, %s5209_s24  ;;  %p5215_p10 = scmp.lt.u32.totalorder %s5213_s23, %s5209_s24 }
 0x10e   : > { %p5217_p6 = scmp.lt.u32.totalorder %s5209_s24, %s6360_s0 }
 0x10f   : > { %p5211_p5 = pnand %p5210_p4, %p7599_p0  ;;  %p5216_p2 = por %p5215_p10, %p5214_p1 }
 0x111   : > { %p5212_p9 = pneg %p5211_p5  ;;  %p5218_p3 = por %p5217_p6, %p5216_p2 }
 0x113   : > { %p5219_p7 = pnand %p5218_p3, %p5212_p9 }
 0x115   : > { %5222 = shalt.err (!%p5219_p7)
}
 0x116   : > { %s5223_s22 = scalar_lea.vmem %s6363_s9, 32  ;;  %s5886_s8 = smov [#allocation13]  }
 0x117   : > { %p5224_p13 = scmp.ne.s32.totalorder %s6363_s9, %s5223_s22  ;;  %s5227_s11 = sshll.u32 %s5886_s8, 4  ;;  %s5228_s11 = int_to_ptr.vmem [resolvable:$false] %s5227_s11 }
 0x118   : > { %s5229_s21 = scalar_lea.vmem %s5228_s11, 64  ;;  %p5230_p8 = scmp.lt.s32.totalorder %s6363_s9, %s5228_s11 }
 0x119   : > { %p5225_p11 = pnand %p5224_p13, %p7599_p0  ;;  %p5231_p4 = scmp.lt.s32.totalorder %s5229_s21, %s5223_s22 }
 0x11b   : > { %p5226_p12 = pneg %p5225_p11  ;;  %p5232_p5 = por %p5231_p4, %p5230_p8 }
 0x11d   : > { %p5233_p1 = pnand %p5232_p5, %p5226_p12 }
 0x11f   : > { %5236 = shalt.err (!%p5233_p1)
}
 0x120   : > { %4816 = dma.hbm_to_vmem [thread:$0]  (%p7599_p0), %s6360_s0, 32, %s6363_s9, %s6190_s26, %s7607_s1, %s7607_s1, %s7606_s12  }
 0x121   : > { %s6394_s24 = sshll.u32 %s5869_s30, 8  ;;  %s7612_s22 = sld [smem:[#allocation57_spill]] }
 0x122   : > { %7611 = sst [smem:[#allocation47_spill]] %s6394_s24  ;;  %s954_s11 = scalar_lea.vmem [#allocation14], %s6366_s7 }
 0x123   : > { %s961_s21 = sshll.u32 %s954_s11, 4  ;;  %s6403_s21 = int_to_ptr.vmem [resolvable:$true] %s961_s21 }
 0x127   : > { %s6400_s8 = scalar_lea.hbm %s7612_s22, %s6394_s24  ;;  %s5241_s20 = scalar_lea.hbm %s7612_s22, 512 }
 0x128   : > { %s5237_s3 = scalar_lea.hbm %s6400_s8, 256  ;;  %p5242_p6 = scmp.lt.u32.totalorder %s6400_s8, %s7612_s22 }
 0x129   : > { %p5238_p9 = scmp.ne.s32.totalorder %s6400_s8, %s5237_s3  ;;  %p5243_p3 = scmp.lt.u32.totalorder %s5241_s20, %s5237_s3 }
 0x12a   : > { %p5245_p13 = scmp.lt.u32.totalorder %s5237_s3, %s6400_s8 }
 0x12b   : > { %p5239_p10 = pnand %p5238_p9, %p7599_p0  ;;  %p5244_p7 = por %p5243_p3, %p5242_p6 }
 0x12d   : > { %p5240_p2 = pneg %p5239_p10  ;;  %p5246_p11 = por %p5245_p13, %p5244_p7 }
 0x12f   : > { %p5247_p12 = pnand %p5246_p11, %p5240_p2 }
 0x131   : > { %5250 = shalt.err (!%p5247_p12)
}
 0x132   : > { %s5251_s11 = scalar_lea.vmem %s6403_s21, 256  ;;  %s5887_s0 = smov [#allocation14]  }
 0x133   : > { %p5252_p8 = scmp.ne.s32.totalorder %s6403_s21, %s5251_s11  ;;  %s5255_s9 = sshll.u32 %s5887_s0, 4  ;;  %s5256_s9 = int_to_ptr.vmem [resolvable:$false] %s5255_s9 }
 0x134   : > { %s5257_s23 = scalar_lea.vmem %s5256_s9, 512  ;;  %p5258_p1 = scmp.lt.s32.totalorder %s6403_s21, %s5256_s9 }
 0x135   : > { %p5253_p4 = pnand %p5252_p8, %p7599_p0  ;;  %p5259_p9 = scmp.lt.s32.totalorder %s5257_s23, %s5251_s11 }
 0x137   : > { %p5254_p5 = pneg %p5253_p4  ;;  %p5260_p10 = por %p5259_p9, %p5258_p1 }
 0x139   : > { %p5261_p6 = pnand %p5260_p10, %p5254_p5 }
 0x13b   : > { %5264 = shalt.err (!%p5261_p6)
}
 0x13c   : > { %4817 = dma.hbm_to_vmem [thread:$0]  (%p7599_p0), %s6400_s8, 256, %s6403_s21, %s6190_s26, %s7604_s6, %s7604_s6, %s7603_s27  }
 0x13d   : > { %s6431_s20 = sshll.u32 %s5869_s30, 4  ;;  %s974_s3 = scalar_lea.vmem [#allocation15], %s6170_s2 }
 0x13e   : > { %7613 = sst [smem:[#allocation48_spill]] %s6431_s20  ;;  %s981_s10 = sshll.u32 %s974_s3, 4  ;;  %s982_s10 = int_to_ptr.vmem [resolvable:$true] %s981_s10 }
 0x13f   : > { %s7614_s9 = sld [smem:[#allocation58_spill]] }
 0x145   : > { %s7615_s23 = smov %s7614_s9  ;;  %s979_s22 = scalar_lea.hbm %s7614_s9, %s6431_s20 }
 0x146   : > { %s5265_s19 = scalar_lea.hbm %s979_s22, 16  ;;  %s5269_s24 = scalar_lea.hbm %s7615_s23, 32 }
 0x147   : > { %p5266_p2 = scmp.ne.s32.totalorder %s979_s22, %s5265_s19  ;;  %p5270_p13 = scmp.lt.u32.totalorder %s979_s22, %s7615_s23 }
 0x148   : > { %p5271_p11 = scmp.lt.u32.totalorder %s5269_s24, %s5265_s19  ;;  %p5273_p8 = scmp.lt.u32.totalorder %s5265_s19, %s979_s22 }
 0x149   : > { %p5267_p3 = pnand %p5266_p2, %p7599_p0 }
 0x14a   : > { %p5272_p12 = por %p5271_p11, %p5270_p13 }
 0x14b   : > { %p5268_p7 = pneg %p5267_p3 }
 0x14c   : > { %p5274_p4 = por %p5273_p8, %p5272_p12 }
 0x14e   : > { %p5275_p5 = pnand %p5274_p4, %p5268_p7 }
 0x150   : > { %5278 = shalt.err (!%p5275_p5)
}
 0x151   : > { %s5279_s21 = scalar_lea.vmem %s982_s10, 16  ;;  %s5888_s3 = smov [#allocation15]  }
 0x152   : > { %p5280_p1 = scmp.ne.s32.totalorder %s982_s10, %s5279_s21  ;;  %s5283_s11 = sshll.u32 %s5888_s3, 4  ;;  %s5284_s11 = int_to_ptr.vmem [resolvable:$false] %s5283_s11 }
 0x153   : > { %s5285_s18 = scalar_lea.vmem %s5284_s11, 32  ;;  %p5286_p6 = scmp.lt.s32.totalorder %s982_s10, %s5284_s11 }
 0x154   : > { %p5281_p9 = pnand %p5280_p1, %p7599_p0  ;;  %p5287_p2 = scmp.lt.s32.totalorder %s5285_s18, %s5279_s21 }
 0x156   : > { %p5282_p10 = pneg %p5281_p9  ;;  %p5288_p3 = por %p5287_p2, %p5286_p6 }
 0x158   : > { %p5289_p11 = pnand %p5288_p3, %p5282_p10 }
 0x15a   : > { %5292 = shalt.err (!%p5289_p11)
}
 0x15b   : > { %4818 = dma.hbm_to_vmem [thread:$0]  (%p7599_p0), %s979_s22, 16, %s982_s10, %s6190_s26  }
 0x15c   : > { %s7616_s24 = sld [smem:[#allocation59_spill]]  ;;  %s991_s9 = scalar_lea.vmem [#allocation16], %s6170_s2 }
 0x15d   : > { %s998_s8 = sshll.u32 %s991_s9, 4  ;;  %s7617_s3 = sld [smem:[#allocation60_spill]]  ;;  %s999_s8 = int_to_ptr.vmem [resolvable:$true] %s998_s8 }
 0x162   : > { %s6455_s0 = scalar_lea.hbm %s7616_s24, %s6431_s20  ;;  %s5297_s19 = scalar_lea.hbm %s7616_s24, 32 }
 0x163   : > { %s6462_s11 = scalar_lea.hbm %s7617_s3, %s6431_s20  ;;  %s5293_s18 = scalar_lea.hbm %s6455_s0, 16 }
 0x164   : > { %p5294_p7 = scmp.ne.s32.totalorder %s6455_s0, %s5293_s18  ;;  %p5298_p8 = scmp.lt.u32.totalorder %s6455_s0, %s7616_s24 }
 0x165   : > { %p5299_p4 = scmp.lt.u32.totalorder %s5297_s19, %s5293_s18  ;;  %p5301_p1 = scmp.lt.u32.totalorder %s5293_s18, %s6455_s0 }
 0x166   : > { %p5295_p13 = pnand %p5294_p7, %p7599_p0 }
 0x167   : > { %p5300_p5 = por %p5299_p4, %p5298_p8 }
 0x168   : > { %p5296_p12 = pneg %p5295_p13 }
 0x169   : > { %p5302_p9 = por %p5301_p1, %p5300_p5 }
 0x16b   : > { %p5303_p10 = pnand %p5302_p9, %p5296_p12 }
 0x16d   : > { %5306 = shalt.err (!%p5303_p10)
}
 0x16e   : > { %s5307_s9 = scalar_lea.vmem %s999_s8, 16  ;;  %s5889_s30 = smov [#allocation16]  }
 0x16f   : > { %p5308_p6 = scmp.ne.s32.totalorder %s999_s8, %s5307_s9  ;;  %s5311_s21 = sshll.u32 %s5889_s30, 4  ;;  %s5312_s21 = int_to_ptr.vmem [resolvable:$false] %s5311_s21 }
 0x170   : > { %s5313_s22 = scalar_lea.vmem %s5312_s21, 32  ;;  %p5314_p11 = scmp.lt.s32.totalorder %s999_s8, %s5312_s21 }
 0x171   : > { %p5309_p2 = pnand %p5308_p6, %p7599_p0  ;;  %p5315_p7 = scmp.lt.s32.totalorder %s5313_s22, %s5307_s9 }
 0x173   : > { %p5310_p3 = pneg %p5309_p2  ;;  %p5316_p13 = por %p5315_p7, %p5314_p11 }
 0x175   : > { %p5317_p4 = pnand %p5316_p13, %p5310_p3 }
 0x177   : > { %5320 = shalt.err (!%p5317_p4)
}
 0x178   : > { %4819 = dma.hbm_to_vmem [thread:$0]  (%p7599_p0), %s6455_s0, 16, %s999_s8, %s6190_s26  }
 0x179   : > { %s1008_s23 = scalar_lea.vmem [#allocation17], %s6170_s2  ;;  %s7618_s7 = sld [smem:[#allocation61_spill]] }
 0x17a   : > { %s1015_s18 = sshll.u32 %s1008_s23, 4  ;;  %s5321_s30 = scalar_lea.hbm %s6462_s11, 16  ;;  %s1016_s18 = int_to_ptr.vmem [resolvable:$true] %s1015_s18 }
 0x17b   : > { %p5322_p12 = scmp.ne.s32.totalorder %s6462_s11, %s5321_s30  ;;  %s5325_s24 = scalar_lea.hbm %s7617_s3, 32 }
 0x17c   : > { %p5326_p1 = scmp.lt.u32.totalorder %s6462_s11, %s7617_s3  ;;  %p5327_p9 = scmp.lt.u32.totalorder %s5325_s24, %s5321_s30 }
 0x17d   : > { %p5323_p8 = pnand %p5322_p12, %p7599_p0  ;;  %p5329_p6 = scmp.lt.u32.totalorder %s5321_s30, %s6462_s11 }
 0x17e   : > { %p5328_p10 = por %p5327_p9, %p5326_p1 }
 0x17f   : > { %s6487_s9 = scalar_lea.hbm %s7618_s7, %s6176_s4  ;;  %p5324_p5 = pneg %p5323_p8 }
 0x180   : > { %p5330_p2 = por %p5329_p6, %p5328_p10 }
 0x182   : > { %p5331_p3 = pnand %p5330_p2, %p5324_p5 }
 0x184   : > { %5334 = shalt.err (!%p5331_p3)
}
 0x185   : > { %s5335_s0 = scalar_lea.vmem %s1016_s18, 16  ;;  %s5890_s8 = smov [#allocation17]  }
 0x186   : > { %p5336_p11 = scmp.ne.s32.totalorder %s1016_s18, %s5335_s0  ;;  %s5339_s23 = sshll.u32 %s5890_s8, 4  ;;  %s5340_s23 = int_to_ptr.vmem [resolvable:$false] %s5339_s23 }
 0x187   : > { %s5341_s10 = scalar_lea.vmem %s5340_s23, 32  ;;  %p5342_p4 = scmp.lt.s32.totalorder %s1016_s18, %s5340_s23 }
 0x188   : > { %p5337_p7 = pnand %p5336_p11, %p7599_p0  ;;  %p5343_p12 = scmp.lt.s32.totalorder %s5341_s10, %s5335_s0 }
 0x18a   : > { %p5338_p13 = pneg %p5337_p7  ;;  %p5344_p8 = por %p5343_p12, %p5342_p4 }
 0x18c   : > { %p5345_p1 = pnand %p5344_p8, %p5338_p13 }
 0x18e   : > { %5348 = shalt.err (!%p5345_p1)
}
 0x18f   : > { %4820 = dma.hbm_to_vmem [thread:$0]  (%p7599_p0), %s6462_s11, 16, %s1016_s18, %s6190_s26  }
 0x190   : > { %s1026_s17 = scalar_lea.vmem [#allocation18], %s6173_s28  ;;  %s7619_s13 = sld [smem:[#allocation62_spill]] }
 0x191   : > { %s1033_s20 = sshll.u32 %s1026_s17, 4  ;;  %s5349_s21 = scalar_lea.hbm %s6487_s9, 512  ;;  %s6508_s20 = int_to_ptr.vmem [resolvable:$true] %s1033_s20 }
 0x192   : > { %p5350_p5 = scmp.ne.s32.totalorder %s6487_s9, %s5349_s21  ;;  %s5353_s8 = scalar_lea.hbm %s7618_s7, 1024 }
 0x193   : > { %p5354_p6 = scmp.lt.u32.totalorder %s6487_s9, %s7618_s7  ;;  %p5355_p2 = scmp.lt.u32.totalorder %s5353_s8, %s5349_s21 }
 0x194   : > { %p5351_p9 = pnand %p5350_p5, %p7599_p0  ;;  %p5357_p11 = scmp.lt.u32.totalorder %s5349_s21, %s6487_s9 }
 0x195   : > { %p5356_p3 = por %p5355_p2, %p5354_p6 }
 0x196   : > { %s6514_s30 = scalar_lea.hbm %s7619_s13, %s6218_s5  ;;  %p5352_p10 = pneg %p5351_p9 }
 0x197   : > { %p5358_p7 = por %p5357_p11, %p5356_p3 }
 0x199   : > { %p5359_p13 = pnand %p5358_p7, %p5352_p10 }
 0x19b   : > { %5362 = shalt.err (!%p5359_p13)
}
 0x19c   : > { %s5363_s18 = scalar_lea.vmem %s6508_s20, 512  ;;  %s5891_s10 = smov [#allocation18]  }
 0x19d   : > { %p5364_p4 = scmp.ne.s32.totalorder %s6508_s20, %s5363_s18  ;;  %s5367_s17 = sshll.u32 %s5891_s10, 4  ;;  %s5368_s17 = int_to_ptr.vmem [resolvable:$false] %s5367_s17 }
 0x19e   : > { %s5369_s24 = scalar_lea.vmem %s5368_s17, 1024  ;;  %p5370_p1 = scmp.lt.s32.totalorder %s6508_s20, %s5368_s17 }
 0x19f   : > { %p5365_p12 = pnand %p5364_p4, %p7599_p0  ;;  %p5371_p5 = scmp.lt.s32.totalorder %s5369_s24, %s5363_s18 }
 0x1a1   : > { %p5366_p8 = pneg %p5365_p12  ;;  %p5372_p9 = por %p5371_p5, %p5370_p1 }
 0x1a3   : > { %p5373_p6 = pnand %p5372_p9, %p5366_p8 }
 0x1a5   : > { %5376 = shalt.err (!%p5373_p6)
}
 0x1a6   : > { %4821 = dma.hbm_to_vmem [thread:$0]  (%p7599_p0), %s6487_s9, 512, %s6508_s20, %s6190_s26, %s7604_s6, %s7604_s6, %s7603_s27  }
 0x1a7   : > { %s1047_s19 = scalar_lea.vmem [#allocation19], %s6188_s25  ;;  %s7620_s14 = sld [smem:[#allocation63_spill]] }
 0x1a8   : > { %s1054_s21 = sshll.u32 %s1047_s19, 4  ;;  %s5377_s23 = scalar_lea.hbm %s6514_s30, 32  ;;  %s6542_s21 = int_to_ptr.vmem [resolvable:$true] %s1054_s21 }
 0x1a9   : > { %p5378_p10 = scmp.ne.s32.totalorder %s6514_s30, %s5377_s23  ;;  %s5381_s10 = scalar_lea.hbm %s7619_s13, 64 }
 0x1aa   : > { %p5382_p11 = scmp.lt.u32.totalorder %s6514_s30, %s7619_s13  ;;  %p5383_p7 = scmp.lt.u32.totalorder %s5381_s10, %s5377_s23 }
 0x1ab   : > { %p5379_p2 = pnand %p5378_p10, %p7599_p0  ;;  %p5385_p4 = scmp.lt.u32.totalorder %s5377_s23, %s6514_s30 }
 0x1ac   : > { %p5384_p13 = por %p5383_p7, %p5382_p11 }
 0x1ad   : > { %s6548_s8 = scalar_lea.hbm %s7620_s14, %s6176_s4  ;;  %p5380_p3 = pneg %p5379_p2 }
 0x1ae   : > { %p5386_p12 = por %p5385_p4, %p5384_p13 }
 0x1b0   : > { %p5387_p8 = pnand %p5386_p12, %p5380_p3 }
 0x1b2   : > { %5390 = shalt.err (!%p5387_p8)
}
 0x1b3   : > { %s5391_s20 = scalar_lea.vmem %s6542_s21, 32  ;;  %s5892_s24 = smov [#allocation19]  }
 0x1b4   : > { %p5392_p1 = scmp.ne.s32.totalorder %s6542_s21, %s5391_s20  ;;  %s5395_s19 = sshll.u32 %s5892_s24, 4  ;;  %s5396_s19 = int_to_ptr.vmem [resolvable:$false] %s5395_s19 }
 0x1b5   : > { %s5397_s22 = scalar_lea.vmem %s5396_s19, 64  ;;  %p5398_p6 = scmp.lt.s32.totalorder %s6542_s21, %s5396_s19 }
 0x1b6   : > { %p5393_p5 = pnand %p5392_p1, %p7599_p0  ;;  %p5399_p10 = scmp.lt.s32.totalorder %s5397_s22, %s5391_s20 }
 0x1b8   : > { %p5394_p9 = pneg %p5393_p5  ;;  %p5400_p2 = por %p5399_p10, %p5398_p6 }
 0x1ba   : > { %p5401_p11 = pnand %p5400_p2, %p5394_p9 }
 0x1bc   : > { %5404 = shalt.err (!%p5401_p11)
}
 0x1bd   : > { %4822 = dma.hbm_to_vmem [thread:$0]  (%p7599_p0), %s6514_s30, 32, %s6542_s21, %s6190_s26, %s7607_s1, %s7607_s1, %s7606_s12  }
 0x1be   : > { %s1068_s0 = scalar_lea.vmem [#allocation20], %s6173_s28  ;;  %s7621_s15 = sld [smem:[#allocation64_spill]] }
 0x1bf   : > { %s1075_s23 = sshll.u32 %s1068_s0, 4  ;;  %s5405_s17 = scalar_lea.hbm %s6548_s8, 512  ;;  %s6576_s23 = int_to_ptr.vmem [resolvable:$true] %s1075_s23 }
 0x1c0   : > { %p5406_p3 = scmp.ne.s32.totalorder %s6548_s8, %s5405_s17  ;;  %s5409_s24 = scalar_lea.hbm %s7620_s14, 1024 }
 0x1c1   : > { %p5410_p4 = scmp.lt.u32.totalorder %s6548_s8, %s7620_s14  ;;  %p5411_p12 = scmp.lt.u32.totalorder %s5409_s24, %s5405_s17 }
 0x1c2   : > { %p5407_p7 = pnand %p5406_p3, %p7599_p0  ;;  %p5413_p1 = scmp.lt.u32.totalorder %s5405_s17, %s6548_s8 }
 0x1c3   : > { %p5412_p8 = por %p5411_p12, %p5410_p4 }
 0x1c4   : > { %s6582_s10 = scalar_lea.hbm %s7621_s15, %s6218_s5  ;;  %p5408_p13 = pneg %p5407_p7 }
 0x1c5   : > { %p5414_p5 = por %p5413_p1, %p5412_p8 }
 0x1c7   : > { %p5415_p9 = pnand %p5414_p5, %p5408_p13 }
 0x1c9   : > { %5418 = shalt.err (!%p5415_p9)
}
 0x1ca   : > { %s5419_s21 = scalar_lea.vmem %s6576_s23, 512  ;;  %s5893_s22 = smov [#allocation20]  }
 0x1cb   : > { %p5420_p6 = scmp.ne.s32.totalorder %s6576_s23, %s5419_s21  ;;  %s5423_s0 = sshll.u32 %s5893_s22, 4  ;;  %s5424_s0 = int_to_ptr.vmem [resolvable:$false] %s5423_s0 }
 0x1cc   : > { %s5425_s11 = scalar_lea.vmem %s5424_s0, 1024  ;;  %p5426_p11 = scmp.lt.s32.totalorder %s6576_s23, %s5424_s0 }
 0x1cd   : > { %p5421_p10 = pnand %p5420_p6, %p7599_p0  ;;  %p5427_p3 = scmp.lt.s32.totalorder %s5425_s11, %s5419_s21 }
 0x1cf   : > { %p5422_p2 = pneg %p5421_p10  ;;  %p5428_p7 = por %p5427_p3, %p5426_p11 }
 0x1d1   : > { %p5429_p4 = pnand %p5428_p7, %p5422_p2 }
 0x1d3   : > { %5432 = shalt.err (!%p5429_p4)
}
 0x1d4   : > { %4823 = dma.hbm_to_vmem [thread:$0]  (%p7599_p0), %s6548_s8, 512, %s6576_s23, %s6190_s26, %s7604_s6, %s7604_s6, %s7603_s27  }
 0x1d5   : > { %s1089_s18 = scalar_lea.vmem [#allocation21], %s6188_s25  ;;  %s6616_s24 = scalar_lea.hbm %s7473_s16, %s6176_s4 }
 0x1d6   : > { %s1096_s17 = sshll.u32 %s1089_s18, 4  ;;  %s5433_s19 = scalar_lea.hbm %s6582_s10, 32  ;;  %s6610_s17 = int_to_ptr.vmem [resolvable:$true] %s1096_s17 }
 0x1d7   : > { %p5434_p13 = scmp.ne.s32.totalorder %s6582_s10, %s5433_s19  ;;  %s5437_s22 = scalar_lea.hbm %s7621_s15, 64 }
 0x1d8   : > { %p5438_p1 = scmp.lt.u32.totalorder %s6582_s10, %s7621_s15  ;;  %p5439_p5 = scmp.lt.u32.totalorder %s5437_s22, %s5433_s19 }
 0x1d9   : > { %p5435_p12 = pnand %p5434_p13, %p7599_p0  ;;  %p5441_p6 = scmp.lt.u32.totalorder %s5433_s19, %s6582_s10 }
 0x1da   : > { %p5440_p9 = por %p5439_p5, %p5438_p1 }
 0x1db   : > { %p5436_p8 = pneg %p5435_p12 }
 0x1dc   : > { %p5442_p10 = por %p5441_p6, %p5440_p9 }
 0x1de   : > { %p5443_p2 = pnand %p5442_p10, %p5436_p8 }
 0x1e0   : > { %5446 = shalt.err (!%p5443_p2)
}
 0x1e1   : > { %s5447_s23 = scalar_lea.vmem %s6610_s17, 32  ;;  %s5894_s11 = smov [#allocation21]  }
 0x1e2   : > { %p5448_p11 = scmp.ne.s32.totalorder %s6610_s17, %s5447_s23  ;;  %s5451_s18 = sshll.u32 %s5894_s11, 4  ;;  %s5452_s18 = int_to_ptr.vmem [resolvable:$false] %s5451_s18 }
 0x1e3   : > { %s5453_s9 = scalar_lea.vmem %s5452_s18, 64  ;;  %p5454_p4 = scmp.lt.s32.totalorder %s6610_s17, %s5452_s18 }
 0x1e4   : > { %p5449_p3 = pnand %p5448_p11, %p7599_p0  ;;  %p5455_p13 = scmp.lt.s32.totalorder %s5453_s9, %s5447_s23 }
 0x1e6   : > { %p5450_p7 = pneg %p5449_p3  ;;  %p5456_p12 = por %p5455_p13, %p5454_p4 }
 0x1e8   : > { %p5457_p1 = pnand %p5456_p12, %p5450_p7 }
 0x1ea   : > { %5460 = shalt.err (!%p5457_p1)
}
 0x1eb   : > { %4824 = dma.hbm_to_vmem [thread:$0]  (%p7599_p0), %s6582_s10, 32, %s6610_s17, %s6190_s26, %s7607_s1, %s7607_s1, %s7606_s12  }
 0x1ec   : > { %s1110_s20 = scalar_lea.vmem [#allocation22], %s6173_s28  ;;  %s7622_s22 = sld [smem:[#allocation65_spill]] }
 0x1ed   : > { %s1117_s19 = sshll.u32 %s1110_s20, 4  ;;  %s5461_s8 = scalar_lea.hbm %s6616_s24, 512  ;;  %s6644_s19 = int_to_ptr.vmem [resolvable:$true] %s1117_s19 }
 0x1ee   : > { %p5462_p8 = scmp.ne.s32.totalorder %s6616_s24, %s5461_s8  ;;  %s5465_s18 = scalar_lea.hbm %s7473_s16, 1024 }
 0x1ef   : > { %p5466_p6 = scmp.lt.u32.totalorder %s6616_s24, %s7473_s16  ;;  %p5467_p10 = scmp.lt.u32.totalorder %s5465_s18, %s5461_s8 }
 0x1f0   : > { %p5463_p5 = pnand %p5462_p8, %p7599_p0  ;;  %p5469_p11 = scmp.lt.u32.totalorder %s5461_s8, %s6616_s24 }
 0x1f1   : > { %p5468_p2 = por %p5467_p10, %p5466_p6 }
 0x1f2   : > { %s6650_s0 = scalar_lea.hbm %s7622_s22, %s6218_s5  ;;  %p5464_p9 = pneg %p5463_p5 }
 0x1f3   : > { %p5470_p3 = por %p5469_p11, %p5468_p2 }
 0x1f5   : > { %p5471_p7 = pnand %p5470_p3, %p5464_p9 }
 0x1f7   : > { %5474 = shalt.err (!%p5471_p7)
}
 0x1f8   : > { %s5475_s5 = scalar_lea.vmem %s6644_s19, 512  ;;  %s5895_s17 = smov [#allocation22]  }
 0x1f9   : > { %p5476_p4 = scmp.ne.s32.totalorder %s6644_s19, %s5475_s5  ;;  %s5479_s20 = sshll.u32 %s5895_s17, 4  ;;  %s5480_s20 = int_to_ptr.vmem [resolvable:$false] %s5479_s20 }
 0x1fa   : > { %s5481_s30 = scalar_lea.vmem %s5480_s20, 1024  ;;  %p5482_p1 = scmp.lt.s32.totalorder %s6644_s19, %s5480_s20 }
 0x1fb   : > { %p5477_p13 = pnand %p5476_p4, %p7599_p0  ;;  %p5483_p8 = scmp.lt.s32.totalorder %s5481_s30, %s5475_s5 }
 0x1fd   : > { %p5478_p12 = pneg %p5477_p13  ;;  %p5484_p5 = por %p5483_p8, %p5482_p1 }
 0x1ff   : > { %p5485_p6 = pnand %p5484_p5, %p5478_p12 }
 0x201   : > { %5488 = shalt.err (!%p5485_p6)
}
 0x202   : > { %s7623_s21 = sld [smem:[#allocation47_spill]]  ;;  %s1131_s8 = scalar_lea.vmem [#allocation23], %s6188_s25 }
 0x203   : > { %4825 = dma.hbm_to_vmem [thread:$0]  (%p7599_p0), %s6616_s24, 512, %s6644_s19, %s6190_s26, %s7604_s6, %s7604_s6, %s7603_s27  }
 0x204   : > { %s1138_s23 = sshll.u32 %s1131_s8, 4  ;;  %s7624_s9 = sld [smem:[#allocation66_spill]]  ;;  %s6678_s23 = int_to_ptr.vmem [resolvable:$true] %s1138_s23 }
 0x205   : > { %s5489_s17 = scalar_lea.hbm %s6650_s0, 32  ;;  %s5493_s3 = scalar_lea.hbm %s7622_s22, 64 }
 0x206   : > { %p5490_p9 = scmp.ne.s32.totalorder %s6650_s0, %s5489_s17  ;;  %p5494_p11 = scmp.lt.u32.totalorder %s6650_s0, %s7622_s22 }
 0x207   : > { %p5495_p3 = scmp.lt.u32.totalorder %s5493_s3, %s5489_s17  ;;  %p5497_p4 = scmp.lt.u32.totalorder %s5489_s17, %s6650_s0 }
 0x208   : > { %p5491_p10 = pnand %p5490_p9, %p7599_p0 }
 0x209   : > { %p5496_p7 = por %p5495_p3, %p5494_p11 }
 0x20a   : > { %s7625_s10 = smov %s7624_s9  ;;  %s6684_s5 = scalar_lea.hbm %s7624_s9, %s7623_s21 }
 0x20b   : > { %p5492_p2 = pneg %p5491_p10  ;;  %p5498_p13 = por %p5497_p4, %p5496_p7 }
 0x20d   : > { %p5499_p12 = pnand %p5498_p13, %p5492_p2 }
 0x20f   : > { %5502 = shalt.err (!%p5499_p12)
}
 0x210   : > { %s5503_s25 = scalar_lea.vmem %s6678_s23, 32  ;;  %s5896_s19 = smov [#allocation23]  }
 0x211   : > { %p5504_p1 = scmp.ne.s32.totalorder %s6678_s23, %s5503_s25  ;;  %s5507_s8 = sshll.u32 %s5896_s19, 4  ;;  %s5508_s8 = int_to_ptr.vmem [resolvable:$false] %s5507_s8 }
 0x212   : > { %s5509_s7 = scalar_lea.vmem %s5508_s8, 64  ;;  %p5510_p6 = scmp.lt.s32.totalorder %s6678_s23, %s5508_s8 }
 0x213   : > { %p5505_p8 = pnand %p5504_p1, %p7599_p0  ;;  %p5511_p9 = scmp.lt.s32.totalorder %s5509_s7, %s5503_s25 }
 0x215   : > { %p5506_p5 = pneg %p5505_p8  ;;  %p5512_p10 = por %p5511_p9, %p5510_p6 }
 0x217   : > { %p5513_p11 = pnand %p5512_p10, %p5506_p5 }
 0x219   : > { %5516 = shalt.err (!%p5513_p11)
}
 0x21a   : > { %s7626_s3 = sld [smem:[#allocation46_spill]]  ;;  %s7627_s11 = sld [smem:[#allocation48_spill]] }
 0x21b   : > { %4826 = dma.hbm_to_vmem [thread:$0]  (%p7599_p0), %s6650_s0, 32, %s6678_s23, %s6190_s26, %s7607_s1, %s7607_s1, %s7606_s12  }
 0x21c   : > { %s7628_s30 = sld [smem:[#allocation67_spill]]  ;;  %s5517_s19 = scalar_lea.hbm %s6684_s5, 256 }
 0x21d   : > { %p5518_p2 = scmp.ne.s32.totalorder %s6684_s5, %s5517_s19  ;;  %s5521_s13 = scalar_lea.hbm %s7625_s10, 512 }
 0x21e   : > { %p5522_p4 = scmp.lt.u32.totalorder %s6684_s5, %s7625_s10  ;;  %p5523_p13 = scmp.lt.u32.totalorder %s5521_s13, %s5517_s19 }
 0x21f   : > { %p5519_p3 = pnand %p5518_p2, %p7599_p0  ;;  %p5525_p1 = scmp.lt.u32.totalorder %s5517_s19, %s6684_s5 }
 0x220   : > { %s1152_s18 = scalar_lea.vmem [#allocation24], %s7626_s3  ;;  %p5524_p12 = por %p5523_p13, %p5522_p4 }
 0x221   : > { %s1159_s9 = sshll.u32 %s1152_s18, 4  ;;  %p5520_p7 = pneg %p5519_p3  ;;  %s6712_s9 = int_to_ptr.vmem [resolvable:$true] %s1159_s9 }
 0x222   : > { %s7629_s24 = smov %s7628_s30  ;;  %s6718_s25 = scalar_lea.hbm %s7628_s30, %s7627_s11 }
 0x223   : > { %p5526_p8 = por %p5525_p1, %p5524_p12 }
 0x225   : > { %p5527_p5 = pnand %p5526_p8, %p5520_p7 }
 0x227   : > { %5530 = shalt.err (!%p5527_p5)
}
 0x228   : > { %s5531_s1 = scalar_lea.vmem %s6712_s9, 256  ;;  %s5897_s0 = smov [#allocation24]  }
 0x229   : > { %p5532_p6 = scmp.ne.s32.totalorder %s6712_s9, %s5531_s1  ;;  %s5535_s23 = sshll.u32 %s5897_s0, 4  ;;  %s5536_s23 = int_to_ptr.vmem [resolvable:$false] %s5535_s23 }
 0x22a   : > { %s5537_s14 = scalar_lea.vmem %s5536_s23, 512  ;;  %p5538_p11 = scmp.lt.s32.totalorder %s6712_s9, %s5536_s23 }
 0x22b   : > { %p5533_p9 = pnand %p5532_p6, %p7599_p0  ;;  %p5539_p2 = scmp.lt.s32.totalorder %s5537_s14, %s5531_s1 }
 0x22d   : > { %p5534_p10 = pneg %p5533_p9  ;;  %p5540_p3 = por %p5539_p2, %p5538_p11 }
 0x22f   : > { %p5541_p4 = pnand %p5540_p3, %p5534_p10 }
 0x231   : > { %5544 = shalt.err (!%p5541_p4)
}
 0x232   : > { %4827 = dma.hbm_to_vmem [thread:$0]  (%p7599_p0), %s6684_s5, 256, %s6712_s9, %s6190_s26, %s7604_s6, %s7604_s6, %s7603_s27  }
 0x233   : > { %s1172_s13 = scalar_lea.vmem [#allocation25], %s6170_s2  ;;  %s7630_s30 = sld [smem:[#allocation68_spill]] }
 0x234   : > { %s1179_s18 = sshll.u32 %s1172_s13, 4  ;;  %s5545_s7 = scalar_lea.hbm %s6718_s25, 16  ;;  %s1180_s18 = int_to_ptr.vmem [resolvable:$true] %s1179_s18 }
 0x235   : > { %p5546_p7 = scmp.ne.s32.totalorder %s6718_s25, %s5545_s7  ;;  %s5549_s0 = scalar_lea.hbm %s7629_s24, 32 }
 0x236   : > { %p5550_p1 = scmp.lt.u32.totalorder %s6718_s25, %s7629_s24  ;;  %p5551_p8 = scmp.lt.u32.totalorder %s5549_s0, %s5545_s7 }
 0x237   : > { %p5547_p13 = pnand %p5546_p7, %p7599_p0  ;;  %p5553_p6 = scmp.lt.u32.totalorder %s5545_s7, %s6718_s25 }
 0x238   : > { %p5552_p5 = por %p5551_p8, %p5550_p1 }
 0x239   : > { %s7631_s19 = smov %s7630_s30  ;;  %s6750_s8 = scalar_lea.hbm %s7630_s30, %s7627_s11 }
 0x23a   : > { %p5548_p12 = pneg %p5547_p13  ;;  %p5554_p9 = por %p5553_p6, %p5552_p5 }
 0x23c   : > { %p5555_p10 = pnand %p5554_p9, %p5548_p12 }
 0x23e   : > { %5558 = shalt.err (!%p5555_p10)
}
 0x23f   : > { %s5559_s5 = scalar_lea.vmem %s1180_s18, 16  ;;  %s5898_s9 = smov [#allocation25]  }
 0x240   : > { %p5560_p11 = scmp.ne.s32.totalorder %s1180_s18, %s5559_s5  ;;  %s5563_s13 = sshll.u32 %s5898_s9, 4  ;;  %s5564_s13 = int_to_ptr.vmem [resolvable:$false] %s5563_s13 }
 0x241   : > { %s5565_s17 = scalar_lea.vmem %s5564_s13, 32  ;;  %p5566_p4 = scmp.lt.s32.totalorder %s1180_s18, %s5564_s13 }
 0x242   : > { %p5561_p2 = pnand %p5560_p11, %p7599_p0  ;;  %p5567_p7 = scmp.lt.s32.totalorder %s5565_s17, %s5559_s5 }
 0x244   : > { %p5562_p3 = pneg %p5561_p2  ;;  %p5568_p13 = por %p5567_p7, %p5566_p4 }
 0x246   : > { %p5569_p1 = pnand %p5568_p13, %p5562_p3 }
 0x248   : > { %5572 = shalt.err (!%p5569_p1)
}
 0x249   : > { %4828 = dma.hbm_to_vmem [thread:$0]  (%p7599_p0), %s6718_s25, 16, %s1180_s18, %s6190_s26  }
 0x24a   : > { %s1189_s20 = scalar_lea.vmem [#allocation26], %s6170_s2  ;;  %s7632_s1 = sld [smem:[#allocation69_spill]] }
 0x24b   : > { %s1196_s30 = sshll.u32 %s1189_s20, 4  ;;  %s5573_s23 = scalar_lea.hbm %s6750_s8, 16  ;;  %s1197_s30 = int_to_ptr.vmem [resolvable:$true] %s1196_s30 }
 0x24c   : > { %p5574_p12 = scmp.ne.s32.totalorder %s6750_s8, %s5573_s23  ;;  %s5577_s9 = scalar_lea.hbm %s7631_s19, 32 }
 0x24d   : > { %p5578_p6 = scmp.lt.u32.totalorder %s6750_s8, %s7631_s19  ;;  %p5579_p9 = scmp.lt.u32.totalorder %s5577_s9, %s5573_s23 }
 0x24e   : > { %p5575_p8 = pnand %p5574_p12, %p7599_p0  ;;  %p5581_p11 = scmp.lt.u32.totalorder %s5573_s23, %s6750_s8 }
 0x24f   : > { %p5580_p10 = por %p5579_p9, %p5578_p6 }
 0x250   : > { %s6775_s0 = scalar_lea.hbm %s7632_s1, %s7627_s11  ;;  %p5576_p5 = pneg %p5575_p8 }
 0x251   : > { %p5582_p2 = por %p5581_p11, %p5580_p10 }
 0x253   : > { %p5583_p3 = pnand %p5582_p2, %p5576_p5 }
 0x255   : > { %5586 = shalt.err (!%p5583_p3)
}
 0x256   : > { %s5587_s25 = scalar_lea.vmem %s1197_s30, 16  ;;  %s5899_s18 = smov [#allocation26]  }
 0x257   : > { %p5588_p4 = scmp.ne.s32.totalorder %s1197_s30, %s5587_s25  ;;  %s5591_s20 = sshll.u32 %s5899_s18, 4  ;;  %s5592_s20 = int_to_ptr.vmem [resolvable:$false] %s5591_s20 }
 0x258   : > { %s5593_s7 = scalar_lea.vmem %s5592_s20, 32  ;;  %p5594_p1 = scmp.lt.s32.totalorder %s1197_s30, %s5592_s20 }
 0x259   : > { %p5589_p7 = pnand %p5588_p4, %p7599_p0  ;;  %p5595_p12 = scmp.lt.s32.totalorder %s5593_s7, %s5587_s25 }
 0x25b   : > { %p5590_p13 = pneg %p5589_p7  ;;  %p5596_p8 = por %p5595_p12, %p5594_p1 }
 0x25d   : > { %p5597_p6 = pnand %p5596_p8, %p5590_p13 }
 0x25f   : > { %5600 = shalt.err (!%p5597_p6)
}
 0x260   : > { %4829 = dma.hbm_to_vmem [thread:$0]  (%p7599_p0), %s6750_s8, 16, %s1197_s30, %s6190_s26  }
 0x261   : > { %s1206_s12 = scalar_lea.vmem [#allocation27], %s6170_s2  ;;  %s7633_s9 = sld [smem:[#allocation70_spill]] }
 0x262   : > { %s1213_s23 = sshll.u32 %s1206_s12, 4  ;;  %s5601_s25 = scalar_lea.hbm %s6775_s0, 16  ;;  %s1214_s23 = int_to_ptr.vmem [resolvable:$true] %s1213_s23 }
 0x263   : > { %p5602_p5 = scmp.ne.s32.totalorder %s6775_s0, %s5601_s25  ;;  %s5605_s7 = scalar_lea.hbm %s7632_s1, 32 }
 0x264   : > { %p5606_p11 = scmp.lt.u32.totalorder %s6775_s0, %s7632_s1  ;;  %p5607_p2 = scmp.lt.u32.totalorder %s5605_s7, %s5601_s25 }
 0x265   : > { %p5603_p9 = pnand %p5602_p5, %p7599_p0  ;;  %p5609_p4 = scmp.lt.u32.totalorder %s5601_s25, %s6775_s0 }
 0x266   : > { %p5608_p3 = por %p5607_p2, %p5606_p11 }
 0x267   : > { %s7634_s13 = smov %s7633_s9  ;;  %s6800_s17 = scalar_lea.hbm %s7633_s9, %s7623_s21 }
 0x268   : > { %p5604_p10 = pneg %p5603_p9  ;;  %p5610_p7 = por %p5609_p4, %p5608_p3 }
 0x26a   : > { %p5611_p13 = pnand %p5610_p7, %p5604_p10 }
 0x26c   : > { %5614 = shalt.err (!%p5611_p13)
}
 0x26d   : > { %s5615_s21 = scalar_lea.vmem %s1214_s23, 16  ;;  %s5900_s8 = smov [#allocation27]  }
 0x26e   : > { %p5616_p1 = scmp.ne.s32.totalorder %s1214_s23, %s5615_s21  ;;  %s5619_s30 = sshll.u32 %s5900_s8, 4  ;;  %s5620_s30 = int_to_ptr.vmem [resolvable:$false] %s5619_s30 }
 0x26f   : > { %s5621_s12 = scalar_lea.vmem %s5620_s30, 32  ;;  %p5622_p6 = scmp.lt.s32.totalorder %s1214_s23, %s5620_s30 }
 0x270   : > { %p5617_p12 = pnand %p5616_p1, %p7599_p0  ;;  %p5623_p5 = scmp.lt.s32.totalorder %s5621_s12, %s5615_s21 }
 0x272   : > { %p5618_p8 = pneg %p5617_p12  ;;  %p5624_p9 = por %p5623_p5, %p5622_p6 }
 0x274   : > { %p5625_p2 = pnand %p5624_p9, %p5618_p8 }
 0x276   : > { %5628 = shalt.err (!%p5625_p2)
}
 0x277   : > { %4830 = dma.hbm_to_vmem [thread:$0]  (%p7599_p0), %s6775_s0, 16, %s1214_s23, %s6190_s26  }
 0x278   : > { %s1224_s15 = scalar_lea.vmem [#allocation28], %s7626_s3  ;;  %s7635_s9 = sld [smem:[#allocation71_spill]] }
 0x279   : > { %s1231_s10 = sshll.u32 %s1224_s15, 4  ;;  %s5629_s20 = scalar_lea.hbm %s6800_s17, 256  ;;  %s6821_s10 = int_to_ptr.vmem [resolvable:$true] %s1231_s10 }
 0x27a   : > { %p5630_p10 = scmp.ne.s32.totalorder %s6800_s17, %s5629_s20  ;;  %s5633_s8 = scalar_lea.hbm %s7634_s13, 512 }
 0x27b   : > { %p5634_p4 = scmp.lt.u32.totalorder %s6800_s17, %s7634_s13  ;;  %p5635_p7 = scmp.lt.u32.totalorder %s5633_s8, %s5629_s20 }
 0x27c   : > { %p5631_p11 = pnand %p5630_p10, %p7599_p0  ;;  %p5637_p1 = scmp.lt.u32.totalorder %s5629_s20, %s6800_s17 }
 0x27d   : > { %p5636_p13 = por %p5635_p7, %p5634_p4 }
 0x27e   : > { %s7636_s25 = smov %s7635_s9  ;;  %s6827_s18 = scalar_lea.hbm %s7635_s9, %s7627_s11 }
 0x27f   : > { %p5632_p3 = pneg %p5631_p11  ;;  %p5638_p12 = por %p5637_p1, %p5636_p13 }
 0x281   : > { %p5639_p8 = pnand %p5638_p12, %p5632_p3 }
 0x283   : > { %5642 = shalt.err (!%p5639_p8)
}
 0x284   : > { %s5643_s3 = scalar_lea.vmem %s6821_s10, 256  ;;  %s5901_s23 = smov [#allocation28]  }
 0x285   : > { %p5644_p6 = scmp.ne.s32.totalorder %s6821_s10, %s5643_s3  ;;  %s5647_s12 = sshll.u32 %s5901_s23, 4  ;;  %s5648_s12 = int_to_ptr.vmem [resolvable:$false] %s5647_s12 }
 0x286   : > { %s5649_s15 = scalar_lea.vmem %s5648_s12, 512  ;;  %p5650_p2 = scmp.lt.s32.totalorder %s6821_s10, %s5648_s12 }
 0x287   : > { %p5645_p5 = pnand %p5644_p6, %p7599_p0  ;;  %p5651_p10 = scmp.lt.s32.totalorder %s5649_s15, %s5643_s3 }
 0x289   : > { %p5646_p9 = pneg %p5645_p5  ;;  %p5652_p11 = por %p5651_p10, %p5650_p2 }
 0x28b   : > { %p5653_p4 = pnand %p5652_p11, %p5646_p9 }
 0x28d   : > { %5656 = shalt.err (!%p5653_p4)
}
 0x28e   : > { %4831 = dma.hbm_to_vmem [thread:$0]  (%p7599_p0), %s6800_s17, 256, %s6821_s10, %s6190_s26, %s7604_s6, %s7604_s6, %s7603_s27  }
 0x28f   : > { %s1244_s14 = scalar_lea.vmem [#allocation29], %s6170_s2  ;;  %s7637_s7 = sld [smem:[#allocation72_spill]] }
 0x290   : > { %s1251_s5 = sshll.u32 %s1244_s14, 4  ;;  %s5657_s8 = scalar_lea.hbm %s6827_s18, 16  ;;  %s1252_s5 = int_to_ptr.vmem [resolvable:$true] %s1251_s5 }
 0x291   : > { %p5658_p3 = scmp.ne.s32.totalorder %s6827_s18, %s5657_s8  ;;  %s5661_s3 = scalar_lea.hbm %s7636_s25, 32 }
 0x292   : > { %p5662_p1 = scmp.lt.u32.totalorder %s6827_s18, %s7636_s25  ;;  %p5663_p12 = scmp.lt.u32.totalorder %s5661_s3, %s5657_s8 }
 0x293   : > { %p5659_p7 = pnand %p5658_p3, %p7599_p0  ;;  %p5665_p6 = scmp.lt.u32.totalorder %s5657_s8, %s6827_s18 }
 0x294   : > { %p5664_p8 = por %p5663_p12, %p5662_p1 }
 0x295   : > { %s6859_s21 = scalar_lea.hbm %s7637_s7, %s6176_s4  ;;  %p5660_p13 = pneg %p5659_p7 }
 0x296   : > { %p5666_p5 = por %p5665_p6, %p5664_p8 }
 0x298   : > { %p5667_p9 = pnand %p5666_p5, %p5660_p13 }
 0x29a   : > { %5670 = shalt.err (!%p5667_p9)
}
 0x29b   : > { %s5671_s4 = scalar_lea.vmem %s1252_s5, 16  ;;  %s5902_s17 = smov [#allocation29]  }
 0x29c   : > { %p5672_p2 = scmp.ne.s32.totalorder %s1252_s5, %s5671_s4  ;;  %s5675_s10 = sshll.u32 %s5902_s17, 4  ;;  %s5676_s10 = int_to_ptr.vmem [resolvable:$false] %s5675_s10 }
 0x29d   : > { %s5677_s15 = scalar_lea.vmem %s5676_s10, 32  ;;  %p5678_p4 = scmp.lt.s32.totalorder %s1252_s5, %s5676_s10 }
 0x29e   : > { %p5673_p10 = pnand %p5672_p2, %p7599_p0  ;;  %p5679_p3 = scmp.lt.s32.totalorder %s5677_s15, %s5671_s4 }
 0x2a0   : > { %p5674_p11 = pneg %p5673_p10  ;;  %p5680_p7 = por %p5679_p3, %p5678_p4 }
 0x2a2   : > { %p5681_p1 = pnand %p5680_p7, %p5674_p11 }
 0x2a4   : > { %5684 = shalt.err (!%p5681_p1)
}
 0x2a5   : > { %4832 = dma.hbm_to_vmem [thread:$0]  (%p7599_p0), %s6827_s18, 16, %s1252_s5, %s6190_s26  }
 0x2a6   : > { %s1262_s14 = scalar_lea.vmem [#allocation30], %s6173_s28  ;;  %s7638_s30 = sld [smem:[#allocation73_spill]] }
 0x2a7   : > { %s1269_s9 = sshll.u32 %s1262_s14, 4  ;;  %s5685_s23 = scalar_lea.hbm %s6859_s21, 512  ;;  %s6880_s9 = int_to_ptr.vmem [resolvable:$true] %s1269_s9 }
 0x2a8   : > { %p5686_p13 = scmp.ne.s32.totalorder %s6859_s21, %s5685_s23  ;;  %s5689_s17 = scalar_lea.hbm %s7637_s7, 1024 }
 0x2a9   : > { %p5690_p6 = scmp.lt.u32.totalorder %s6859_s21, %s7637_s7  ;;  %p5691_p5 = scmp.lt.u32.totalorder %s5689_s17, %s5685_s23 }
 0x2aa   : > { %p5687_p12 = pnand %p5686_p13, %p7599_p0  ;;  %p5693_p2 = scmp.lt.u32.totalorder %s5685_s23, %s6859_s21 }
 0x2ab   : > { %p5692_p9 = por %p5691_p5, %p5690_p6 }
 0x2ac   : > { %s7639_s0 = smov %s7638_s30  ;;  %s6886_s3 = scalar_lea.hbm %s7638_s30, %s7627_s11 }
 0x2ad   : > { %p5688_p8 = pneg %p5687_p12  ;;  %p5694_p10 = por %p5693_p2, %p5692_p9 }
 0x2af   : > { %p5695_p11 = pnand %p5694_p10, %p5688_p8 }
 0x2b1   : > { %5698 = shalt.err (!%p5695_p11)
}
 0x2b2   : > { %s5699_s28 = scalar_lea.vmem %s6880_s9, 512  ;;  %s5903_s5 = smov [#allocation30]  }
 0x2b3   : > { %p5700_p4 = scmp.ne.s32.totalorder %s6880_s9, %s5699_s28  ;;  %s5703_s15 = sshll.u32 %s5903_s5, 4  ;;  %s5704_s15 = int_to_ptr.vmem [resolvable:$false] %s5703_s15 }
 0x2b4   : > { %s5705_s14 = scalar_lea.vmem %s5704_s15, 1024  ;;  %p5706_p1 = scmp.lt.s32.totalorder %s6880_s9, %s5704_s15 }
 0x2b5   : > { %p5701_p3 = pnand %p5700_p4, %p7599_p0  ;;  %p5707_p13 = scmp.lt.s32.totalorder %s5705_s14, %s5699_s28 }
 0x2b7   : > { %p5702_p7 = pneg %p5701_p3  ;;  %p5708_p12 = por %p5707_p13, %p5706_p1 }
 0x2b9   : > { %p5709_p6 = pnand %p5708_p12, %p5702_p7 }
 0x2bb   : > { %5712 = shalt.err (!%p5709_p6)
}
 0x2bc   : > { %4833 = dma.hbm_to_vmem [thread:$0]  (%p7599_p0), %s6859_s21, 512, %s6880_s9, %s6190_s26, %s7604_s6, %s7604_s6, %s7603_s27  }
 0x2bd   : > { %s1282_s20 = scalar_lea.vmem [#allocation31], %s6170_s2  ;;  %s7640_s12 = sld [smem:[#allocation74_spill]] }
 0x2be   : > { %s1289_s8 = sshll.u32 %s1282_s20, 4  ;;  %s5713_s17 = scalar_lea.hbm %s6886_s3, 16  ;;  %s1290_s8 = int_to_ptr.vmem [resolvable:$true] %s1289_s8 }
 0x2bf   : > { %p5714_p8 = scmp.ne.s32.totalorder %s6886_s3, %s5713_s17  ;;  %s5717_s28 = scalar_lea.hbm %s7639_s0, 32 }
 0x2c0   : > { %p5718_p2 = scmp.lt.u32.totalorder %s6886_s3, %s7639_s0  ;;  %p5719_p10 = scmp.lt.u32.totalorder %s5717_s28, %s5713_s17 }
 0x2c1   : > { %p5715_p5 = pnand %p5714_p8, %p7599_p0  ;;  %p5721_p4 = scmp.lt.u32.totalorder %s5713_s17, %s6886_s3 }
 0x2c2   : > { %p5720_p11 = por %p5719_p10, %p5718_p2 }
 0x2c3   : > { %s6918_s4 = scalar_lea.hbm %s7640_s12, %s7627_s11  ;;  %p5716_p9 = pneg %p5715_p5 }
 0x2c4   : > { %p5722_p3 = por %p5721_p4, %p5720_p11 }
 0x2c6   : > { %p5723_p7 = pnand %p5722_p3, %p5716_p9 }
 0x2c8   : > { %5726 = shalt.err (!%p5723_p7)
}
 0x2c9   : > { %s5727_s27 = scalar_lea.vmem %s1290_s8, 16  ;;  %s5904_s6 = smov [#allocation31]  }
 0x2ca   : > { %p5728_p1 = scmp.ne.s32.totalorder %s1290_s8, %s5727_s27  ;;  %s5731_s21 = sshll.u32 %s5904_s6, 4  ;;  %s5732_s21 = int_to_ptr.vmem [resolvable:$false] %s5731_s21 }
 0x2cb   : > { %s5733_s9 = scalar_lea.vmem %s5732_s21, 32  ;;  %p5734_p6 = scmp.lt.s32.totalorder %s1290_s8, %s5732_s21 }
 0x2cc   : > { %p5729_p13 = pnand %p5728_p1, %p7599_p0  ;;  %p5735_p8 = scmp.lt.s32.totalorder %s5733_s9, %s5727_s27 }
 0x2ce   : > { %p5730_p12 = pneg %p5729_p13  ;;  %p5736_p5 = por %p5735_p8, %p5734_p6 }
 0x2d0   : > { %p5737_p2 = pnand %p5736_p5, %p5730_p12 }
 0x2d2   : > { %5740 = shalt.err (!%p5737_p2)
}
 0x2d3   : > { %4834 = dma.hbm_to_vmem [thread:$0]  (%p7599_p0), %s6886_s3, 16, %s1290_s8, %s6190_s26  }
 0x2d4   : > { %s1299_s14 = scalar_lea.vmem [#allocation32], %s6170_s2  ;;  %s7641_s17 = sld [smem:[#allocation75_spill]] }
 0x2d5   : > { %s1306_s20 = sshll.u32 %s1299_s14, 4  ;;  %s5741_s18 = scalar_lea.hbm %s6918_s4, 16  ;;  %s1307_s20 = int_to_ptr.vmem [resolvable:$true] %s1306_s20 }
 0x2d6   : > { %p5742_p9 = scmp.ne.s32.totalorder %s6918_s4, %s5741_s18  ;;  %s5745_s15 = scalar_lea.hbm %s7640_s12, 32 }
 0x2d7   : > { %p5746_p4 = scmp.lt.u32.totalorder %s6918_s4, %s7640_s12  ;;  %p5747_p3 = scmp.lt.u32.totalorder %s5745_s15, %s5741_s18 }
 0x2d8   : > { %p5743_p10 = pnand %p5742_p9, %p7599_p0  ;;  %p5749_p1 = scmp.lt.u32.totalorder %s5741_s18, %s6918_s4 }
 0x2d9   : > { %p5748_p7 = por %p5747_p3, %p5746_p4 }
 0x2da   : > { %s6943_s10 = scalar_lea.hbm %s7641_s17, %s7627_s11  ;;  %p5744_p11 = pneg %p5743_p10 }
 0x2db   : > { %p5750_p13 = por %p5749_p1, %p5748_p7 }
 0x2dd   : > { %p5751_p12 = pnand %p5750_p13, %p5744_p11 }
 0x2df   : > { %5754 = shalt.err (!%p5751_p12)
}
 0x2e0   : > { %s5755_s11 = scalar_lea.vmem %s1307_s20, 16  ;;  %s5905_s3 = smov [#allocation32]  }
 0x2e1   : > { %p5756_p6 = scmp.ne.s32.totalorder %s1307_s20, %s5755_s11  ;;  %s5759_s8 = sshll.u32 %s5905_s3, 4  ;;  %s5760_s8 = int_to_ptr.vmem [resolvable:$false] %s5759_s8 }
 0x2e2   : > { %s5761_s21 = scalar_lea.vmem %s5760_s8, 32  ;;  %p5762_p2 = scmp.lt.s32.totalorder %s1307_s20, %s5760_s8 }
 0x2e3   : > { %p5757_p8 = pnand %p5756_p6, %p7599_p0  ;;  %p5763_p9 = scmp.lt.s32.totalorder %s5761_s21, %s5755_s11 }
 0x2e5   : > { %p5758_p5 = pneg %p5757_p8  ;;  %p5764_p10 = por %p5763_p9, %p5762_p2 }
 0x2e7   : > { %p5765_p3 = pnand %p5764_p10, %p5758_p5 }
 0x2e9   : > { %5768 = shalt.err (!%p5765_p3)
}
 0x2ea   : > { %4835 = dma.hbm_to_vmem [thread:$0]  (%p7599_p0), %s6918_s4, 16, %s1307_s20, %s6190_s26  }
 0x2eb   : > { %s1316_s9 = scalar_lea.vmem [#allocation33], %s6170_s2  ;;  %s5769_s30 = scalar_lea.hbm %s6943_s10, 16 }
 0x2ec   : > { %s1323_s14 = sshll.u32 %s1316_s9, 4  ;;  %p5770_p11 = scmp.ne.s32.totalorder %s6943_s10, %s5769_s30  ;;  %s1324_s14 = int_to_ptr.vmem [resolvable:$true] %s1323_s14 }
 0x2ed   : > { %s5773_s28 = scalar_lea.hbm %s7641_s17, 32  ;;  %p5774_p1 = scmp.lt.u32.totalorder %s6943_s10, %s7641_s17 }
 0x2ee   : > { %p5771_p4 = pnand %p5770_p11, %p7599_p0  ;;  %p5775_p13 = scmp.lt.u32.totalorder %s5773_s28, %s5769_s30 }
 0x2ef   : > { %p5777_p6 = scmp.lt.u32.totalorder %s5769_s30, %s6943_s10 }
 0x2f0   : > { %p5772_p7 = pneg %p5771_p4  ;;  %p5776_p12 = por %p5775_p13, %p5774_p1 }
 0x2f2   : > { %p5778_p8 = por %p5777_p6, %p5776_p12 }
 0x2f4   : > { %p5779_p5 = pnand %p5778_p8, %p5772_p7 }
 0x2f6   : > { %5782 = shalt.err (!%p5779_p5)
}
 0x2f7   : > { %s5783_s2 = scalar_lea.vmem %s1324_s14, 16  ;;  %s5906_s4 = smov [#allocation33]  }
 0x2f8   : > { %p5784_p2 = scmp.ne.s32.totalorder %s1324_s14, %s5783_s2  ;;  %s5787_s20 = sshll.u32 %s5906_s4, 4  ;;  %s5788_s20 = int_to_ptr.vmem [resolvable:$false] %s5787_s20 }
 0x2f9   : > { %s5789_s27 = scalar_lea.vmem %s5788_s20, 32  ;;  %p5790_p3 = scmp.lt.s32.totalorder %s1324_s14, %s5788_s20 }
 0x2fa   : > { %p5785_p9 = pnand %p5784_p2, %p7599_p0  ;;  %p5791_p11 = scmp.lt.s32.totalorder %s5789_s27, %s5783_s2 }
 0x2fc   : > { %p5786_p10 = pneg %p5785_p9  ;;  %p5792_p4 = por %p5791_p11, %p5790_p3 }
 0x2fe   : > { %p5793_p1 = pnand %p5792_p4, %p5786_p10 }
 0x300   : > { %5796 = shalt.err (!%p5793_p1)
}
 0x301   : > { %4836 = dma.hbm_to_vmem [thread:$0]  (%p7599_p0), %s6943_s10, 16, %s1324_s14, %s6190_s26  }
 0x302 PF: > { %s7642_s6 = sld [smem:[#allocation45_spill]] }
 0x308   : > { %p7643_p7 = scmp.ne.s32.totalorder %s7642_s6, 0 }
 0x309   : > { %s7644_s11 = sld [smem:[#allocation41_spill]] (!%p7643_p7) }
 0x30a   : > { %1332 = sbr.rel (%p7643_p7) target bundleno = 6175 (0x181f), region = 132 }
 0x30f   : > { %p7645_p13 = scmp.eq.s32.totalorder (!%p7643_p7), %s7644_s11, 0 }
 0x311   : > { %5840 = dma.done.wait (%p7645_p13), [#allocation4], 256   ;;  %p7646_p12 = pmov %p7645_p13 }
 0x313   : > { %5842 = vsyncadd (%p7646_p12), [#allocation4], 4294967040  ;;  %p7647_p6 = pmov %p7646_p12 }
 0x315   : > { %5844 = dma.done.wait (%p7647_p6), [#allocation7], 384   ;;  %p7648_p8 = pmov %p7647_p6 }
 0x316   : > { %s7649_s29 = sld [smem:[#allocation39_spill]]  ;;  %s7650_s3 = sld [smem:[#allocation44_spill]] }
 0x317   : > { %5846 = vsyncadd (%p7648_p8), [#allocation7], 4294966912  ;;  %s1342_s26 = sand.u32 1, %s7644_s11  }
 0x318   : > { %s1343_s21 = scalar_lea.sflag [#allocation4], %s1342_s26 }
 0x31c   : > { %s6994_s10 = sand.u32 1, %s7649_s29   ;;  %p7651_p0 = scmp.ne.s32.totalorder %s7650_s3, 0 }
 0x31d   : > { %s4314_s8 = sshll.u32 %s6994_s10, 5 }
 0x31e   : > { %s6997_s9 = scalar_lea.vmem [#allocation8], %s4314_s8 }
 0x31f   : > { %5848 = dma.done.wait (%p7651_p0), %s1343_s21, 4704  }
 0x320   : > { %5850 = vsyncadd (%p7651_p0), %s1343_s21, 4294962592  ;;  %s7004_s14 = sshll.u32 %s6994_s10, 1  ;;  %s7007_s30 = sshll.u32 %s6994_s10, 4 }
 0x321   : > { %s7010_s18 = scalar_lea.vmem [#allocation10], %s4314_s8  ;;  %s7013_s5 = scalar_lea.vmem [#allocation12], %s4314_s8 }
 0x322   : > { %s7020_s6 = scalar_lea.vmem [#allocation18], %s4314_s8  ;;  %s1442_s29 = scalar_lea.vmem [#allocation19], %s7004_s14 }
 0x323   : > { %s7023_s3 = scalar_lea.vmem [#allocation20], %s4314_s8  ;;  %s1460_s26 = scalar_lea.vmem [#allocation21], %s7004_s14 }
 0x324   : > { %s7026_s21 = scalar_lea.vmem [#allocation22], %s4314_s8  ;;  %s1478_s23 = scalar_lea.vmem [#allocation23], %s7004_s14 }
 0x325   : > { %s1487_s28 = scalar_lea.vmem [#allocation24], %s7007_s30  ;;  %s1495_s0 = scalar_lea.vmem [#allocation25], %s6994_s10 }
 0x326   : > { %s1503_s15 = scalar_lea.vmem [#allocation26], %s6994_s10  ;;  %s1511_s1 = scalar_lea.vmem [#allocation27], %s6994_s10 }
 0x327   : > { %s1520_s2 = scalar_lea.vmem [#allocation28], %s7007_s30  ;;  %s1528_s4 = scalar_lea.vmem [#allocation29], %s6994_s10 }
 0x328   : > { %s7035_s7 = scalar_lea.vmem [#allocation30], %s4314_s8  ;;  %s1545_s20 = scalar_lea.vmem [#allocation31], %s6994_s10 }
 0x329   : > { %s1553_s27 = scalar_lea.vmem [#allocation32], %s6994_s10  ;;  %s1561_s12 = scalar_lea.vmem [#allocation33], %s6994_s10 }
 0x32a   : > { %p7652_p5 = scmp.ne.s32.totalorder %s7644_s11, 0 }
 0x32b   : > { %v1749_v0 = vld [vmem:[#allocation3] sm:$0xff] (!%p7652_p5)  ;;  %vm1751_vm0 = vcmask (!%p7652_p5), 261120   ;;  %v1750_v1 = vld [vmem:[#allocation3 + $0x8] sm:$0xff] (!%p7652_p5) }
 0x32c   : > { %1748 = sbr.rel (%p7652_p5) target bundleno = 819 (0x333), region = 248  ;;  %1752 = vst.msk [vmem:[#allocation2] sm:$0xff] (!%p7652_p5), %vm1751_vm0, %v1749_v0  ;;  %1753 = vst.msk [vmem:[#allocation2 + $0x8] sm:$0xff] (!%p7652_p5), %vm1751_vm0, %v1750_v1 }
 0x333 PF: > { %v4932_v2 = vld [vmem:[%s7010_s18] sm:$0xff]   ;;  %v5907_v3 = vmov 0.0   ;;  %v4933_v4 = vld [vmem:[%s7010_s18 + $0x8] sm:$0xff]   ;;  %vm5908_vm1 = vmmov 0   ;;  %vm1823_vm2 = vcmask 261120   ;;  %s7653_s11 = scalar_lea.vmem [#allocation11], %s7004_s14  ;;  %v1762_v29 = vlaneseq }
 0x334   : > { %4571 = vmatprep.subr.bf16.mxu1 %v5907_v3  ;;  %4563 = vmatprep.subr.bf16.mxu0 %v5907_v3  ;;  %v4934_v5 = vld [vmem:[%s6997_s9] sm:$0xff]   ;;  %v7050_v6 = vld [vmem:[#allocation2] sm:$0xff]  ;;  %v7052_v7 = vld [vmem:[#allocation2 + $0x8] sm:$0xff]  ;;  %s7654_s8 = scalar_lea.vmem [#allocation9], %s7004_s14  ;;  %vm1998_vm3 = vcmask 130048   ;;  %vm2901_vm12 = vcmask 392192  }
 0x335   : > { %4572 = vmatpush3.bf16.msra.mxu1 %v4932_v2  ;;  %4575 = vmatprep.mubr.msk.bf16.mxu1 %vm5908_vm1, %v5907_v3  ;;  %v4935_v8 = vld [vmem:[%s6997_s9 + $0x8] sm:$0xff]   ;;  %v7059_v9 = vpack.c.bf16 %v7052_v7, %v7050_v6  ;;  %v4335_v10 = vld [vmem:[%s7653_s11] ss:$0 sm:$0xff]  ;;  %v4331_v12 = vld [vmem:[%s7654_s8] ss:$0 sm:$0xff]  ;;  %v1763_v30 = vshrl.u32 %v1762_v29, 7 }
 0x336   : > { %4573 = vmatprep.subr.bf16.mxu1 %v5907_v3  ;;  %4567 = vmatprep.mubr.msk.bf16.mxu0 %vm5908_vm1, %v5907_v3  ;;  %v4936_v27 = vld [vmem:[%s7013_s5] sm:$0xff]   ;;  %v4937_v28 = vld [vmem:[%s7013_s5 + $0x8] sm:$0xff]   ;;  %v1766_v31 = vand.u32 127, %v1762_v29  ;;  %v5909_v54 = vmov -1e+30   ;;  %s7655_s11 = scalar_lea.vmem [#allocation13], %s7004_s14 }
 0x337   : > { %4564 = vmatpush3.bf16.msra.mxu0 %v4934_v5  ;;  %v1764_v32 = vadd.s32 8, %v1763_v30  ;;  %v1767_v33 = vcvt.s32.f32 %v1763_v30  ;;  %vm3601_vm13 = vcmask 523264  }
 0x338   : > { %4565 = vmatprep.subr.bf16.mxu0 %v5907_v3  ;;  %v1775_v34 = vcvt.s32.f32 %v1766_v31 }
 0x339   : > { %4574 = vmatpush3.bf16.msra.mxu1 %v4933_v4  ;;  %v1768_v35 = vcvt.s32.f32 %v1764_v32  ;;  %v1769_v36 = vadd.f32 0.5, %v1767_v33  ;;  %v4939_v33 = vld [vmem:[%s7010_s18 + $0x18] sm:$0xff]  }
 0x33a   : > { %4587 = vmatprep.subr.bf16.mxu1 %v5907_v3  ;;  %v7089_v37 = vadd.f32 0.5, %v1775_v34 }
 0x33b   : > { %4566 = vmatpush3.bf16.msra.mxu0 %v4935_v8  ;;  %v1770_v38 = vadd.f32 0.5, %v1768_v35  ;;  %v1771_v39 = vmul.f32 0.5, %v1769_v36 }
 0x33c   : > { %4576 = vmatmul.mubr.msk.bf16.vlgmr.msra.gmra.mrb[0].mxu1 %vm1823_vm2, %v7059_v9  ;;  %4579 = vmatprep.subr.bf16.mxu0 %v5907_v3  ;;  %v1777_v40 = vmul.f32 0.5, %v7089_v37 }
 0x33d   : > { %4589 = vmatprep.mubr.msk.bf16.mxu1 %vm5908_vm1, %v5907_v3  ;;  %v1772_v41 = vmul.f32 0.5, %v1770_v38  ;;  %v4799_v42 = vtrunc.f32 %v1771_v39 }
 0x33e   : > { %4568 = vmatmul.mubr.msk.bf16.vlgmr.msra.gmra.mrb[0].mxu0 %vm1823_vm2, %v7059_v9  ;;  %v4803_v43 = vtrunc.f32 %v1777_v40 }
 0x33f   : > { %4583 = vmatprep.mubr.msk.bf16.mxu0 %vm5908_vm1, %v5907_v3  ;;  %4580 = vmatpush3.bf16.msra.mxu0 %v4936_v27  ;;  %v4801_v44 = vtrunc.f32 %v1772_v41  ;;  %v7092_v45 = vcvt.f32.s32 %v4799_v42 }
 0x340   : > { %4581 = vmatprep.subr.bf16.mxu0 %v5907_v3  ;;  %v4804_v46 = vcvt.f32.s32 %v4803_v43 }
 0x341   : > { %v7094_v47 = vcvt.f32.s32 %v4801_v44  ;;  %v1779_v48 = vmul.u32 2, %v7092_v45 }
 0x342   : > { %v1783_v49 = vmul.u32 2, %v4804_v46  ;;  %vm1787_vm5 = vcmp.le.s32.totalorder %v4804_v46, %v7092_v45 }
 0x343   : > { %4582 = vmatpush3.bf16.msra.mxu0 %v4937_v28  ;;  %v1780_v50 = vmul.u32 2, %v7094_v47  ;;  %v1781_v51 = vsub.s32 %v1763_v30, %v1779_v48  ;;  %vm1788_vm7 = vcmp.le.s32.totalorder %v4804_v46, %v7094_v47 }
 0x344   : > { %4593 = vmatprep.subr.bf16.mxu0 %v5907_v3  ;;  %v1784_v52 = vsub.s32 %v1766_v31, %v1783_v49  ;;  %v4938_v31 = vld [vmem:[%s7010_s18 + $0x10] sm:$0xff]   ;;  %s7657_s18 = scalar_lea.vmem [#allocation11], %s7004_s14 }
 0x345   : > { %v1782_v53 = vsub.s32 %v1764_v32, %v1780_v50  ;;  %v4359_v50 = vld [vmem:[%s7657_s18 + $0x1] ss:$0 sm:$0xff]  ;;  %s7662_s18 = scalar_lea.vmem [#allocation16], %s6994_s10 }
 0x346   : > { %4584 = vmatmul.mubr.msk.bf16.vlgmr.msra.gmra.mrb[4].mxu0 %vm1823_vm2, %v7059_v9  ;;  %vm1785_vm4 = vcmp.eq.s32.totalorder %v1781_v51, %v1784_v52 }
 0x347   : > { %4595 = vmatprep.mubr.msk.bf16.mxu0 %vm5908_vm1, %v5907_v3  ;;  %vm1786_vm6 = vcmp.eq.s32.totalorder %v1782_v53, %v1784_v52  ;;  %vm1789_vm8 = vmand %vm1785_vm4, %vm1787_vm5 }
 0x348   : > { %vm1790_vm9 = vmand %vm1786_vm6, %vm1788_vm7  ;;  %v7101_v55 = vsel %vm1789_vm8, 0.0, %v5909_v54 }
 0x349   : > { %v7104_v57 = vsel %vm1790_vm9, 0.0, %v5909_v54 }
 0x40f   : > { %v1925_v11 = vpop.f32.mrb[0].mxu1 }
 0x410   : > { %v4577_v13 = vpop.f32.mrb[1].mxu1  ;;  %v1926_v16 = vadd.f32 %v4335_v10, %v1925_v11 }
 0x411   : > { %v1928_v14 = vpop.f32.mrb[2].mxu1  ;;  %v1861_v15 = vpop.f32.mrb[0].mxu0 }
 0x412   : > { %v1929_v17 = vadd.f32 %v4335_v10, %v1928_v14  ;;  %v4578_v18 = vpop.f32.mrb[3].mxu1  ;;  %v1862_v19 = vadd.f32 %v4331_v12, %v1861_v15  ;;  %v4569_v20 = vpop.f32.mrb[1].mxu0 }
 0x413   : > { %v1864_v21 = vpop.f32.mrb[2].mxu0  ;;  %v4339_v18 = vld [vmem:[%s7655_s11] ss:$0 sm:$0xff] }
 0x414   : > { %v1997_v22 = vpack.c.bf16 %v1929_v17, %v1926_v16  ;;  %v1865_v23 = vadd.f32 %v4331_v12, %v1864_v21  ;;  %v4570_v24 = vpop.f32.mrb[3].mxu0 }
 0x415   : > { %v4941_v24 = vld [vmem:[%s6997_s9 + $0x18] sm:$0xff]  }
 0x416   : > { %v1996_v25 = vpack.c.bf16 %v1865_v23, %v1862_v19  ;;  %v2003_v26 = vsel %vm1998_vm3, %v1997_v22, 0  ;;  %v4940_v23 = vld [vmem:[%s6997_s9 + $0x10] sm:$0xff]   ;;  %s7656_s9 = smov %s7654_s8  ;;  %s7659_s8 = scalar_lea.vmem [#allocation14], %s7007_s30 }
 0x417   : > { %4588 = vmatpush3.bf16.xpose.msra.mxu1 %v2003_v26  ;;  %v4350_v34 = vld [vmem:[%s7656_s9 + $0x1] ss:$0 sm:$0xff]  ;;  %s7661_s9 = scalar_lea.vmem [#allocation15], %s6994_s10 }
 0x418   : > { %4599 = vmatprep.subr.bf16.mxu1 %v5907_v3 }
 0x419   : > { %v1989_v15 = vpop.f32.mrb[4].mxu0 }
 0x41a   : > { %v4585_v16 = vpop.f32.mrb[5].mxu0  ;;  %v1990_v20 = vadd.f32 %v4339_v18, %v1989_v15 }
 0x41b   : > { %v1992_v17 = vpop.f32.mrb[6].mxu0 }
 0x41c   : > { %v4586_v19 = vpop.f32.mrb[7].mxu0  ;;  %v1993_v21 = vadd.f32 %v4339_v18, %v1992_v17 }
 0x41e   : > { %4590 = vmatmul.mubr.msk.bf16.vlgmr.msra.gmra.mrb[4].mxu1 %vm1998_vm3, %v1996_v25  ;;  %v2069_v22 = vpack.c.bf16 %v1993_v21, %v1990_v20 }
 0x41f   : > { %4603 = vmatprep.mubr.msk.bf16.mxu1 %vm5908_vm1, %v5907_v3  ;;  %4600 = vmatpush3.bf16.msra.mxu1 %v4940_v23 }
 0x420   : > { %4594 = vmatpush3.bf16.msra.mxu0 %v2069_v22  ;;  %4601 = vmatprep.subr.bf16.mxu1 %v5907_v3 }
 0x421   : > { %4607 = vmatprep.subr.bf16.mxu0 %v5907_v3 }
 0x423   : > { %4602 = vmatpush3.bf16.msra.mxu1 %v4941_v24 }
 0x424   : > { %4615 = vmatprep.subr.bf16.mxu1 %v5907_v3 }
 0x426   : > { %4604 = vmatmul.mubr.msk.bf16.vlgmr.msra.gmra.mrb[8].mxu1 %vm1823_vm2, %v7059_v9 }
 0x427   : > { %4619 = vmatprep.mubr.msk.bf16.mxu1 %vm5908_vm1, %v5907_v3 }
 0x4f1   : > { %v2039_v56 = vpop.f32.mrb[4].mxu1 }
 0x4f2   : > { %v2040_v58 = vadd.f32 %v2039_v56, %v7101_v55  ;;  %v4591_v59 = vpop.f32.mrb[5].mxu1 }
 0x4f3   : > { %v2042_v60 = vpop.f32.mrb[6].mxu1 }
 0x4f4   : > { %v2043_v61 = vadd.f32 %v2042_v60, %v7104_v57  ;;  %v4592_v62 = vpop.f32.mrb[7].mxu1  ;;  %v2046_v63 = vsel %vm1998_vm3, %v2040_v58, -inf }
 0x4f5   : > { %2047 = vmax.xlane.f32.xlu0 %v2046_v63  ;;  %v4942_v62 = vld [vmem:[%s7013_s5 + $0x10] sm:$0xff]   ;;  %v4943_v63 = vld [vmem:[%s7013_s5 + $0x18] sm:$0xff]   ;;  %s7658_s5 = smov %s7655_s11  ;;  %s7660_s11 = smov %s7659_s8 }
 0x4f6   : > { %v2049_v0 = vsel %vm1998_vm3, %v2043_v61, -inf  ;;  %4616 = vmatpush3.bf16.msra.mxu1 %v4942_v62  ;;  %v4368_v22 = vld [vmem:[%s7658_s5 + $0x1] ss:$0 sm:$0xff]  ;;  %s7663_s5 = scalar_lea.vmem [#allocation17], %s6994_s10 }
 0x4f7   : > { %4617 = vmatprep.subr.bf16.mxu1 %v5907_v3 }
 0x4f9   : > { %2050 = vmax.xlane.f32.xlu0 %v2049_v0  ;;  %v2176_v35 = vpop.f32.mrb[8].mxu1 }
 0x4fa   : > { %v2177_v36 = vadd.f32 %v4350_v34, %v2176_v35  ;;  %v4605_v38 = vpop.f32.mrb[9].mxu1  ;;  %4618 = vmatpush3.bf16.msra.mxu1 %v4943_v63 }
 0x4fb   : > { %v2179_v39 = vpop.f32.mrb[10].mxu1  ;;  %4629 = vmatprep.subr.bf16.mxu1 %v5907_v3 }
 0x4fc   : > { %v2180_v40 = vadd.f32 %v4350_v34, %v2179_v39  ;;  %v4606_v41 = vpop.f32.mrb[11].mxu1  ;;  %v4944_v34 = vld [vmem:[%s7660_s11] sm:$0xff]  }
 0x4fd   : > { %4620 = vmatmul.mubr.msk.bf16.vlgmr.msra.gmra.mrb[12].mxu1 %vm1823_vm2, %v7059_v9 }
 0x4fe   : > { %v2315_v42 = vpack.c.bf16 %v2180_v40, %v2177_v36  ;;  %4631 = vmatprep.mubr.msk.bf16.mxu1 %vm5908_vm1, %v5907_v3 }
 0x582   : > { %v2048_v1 = vpop.xlane.xlu0 %2047 }
 0x583   : > { %v2052_v2 = vsub.f32 %v2040_v58, %v2048_v1 }
 0x585   : > { %v2054_v4 = vmul.f32 1.442695, %v2052_v2 }
 0x586   : > { %v2051_v5 = vpop.xlane.xlu0 %2050 }
 0x587   : > { %4969 = vpow2.f32 %v2054_v4  ;;  %v2053_v8 = vsub.f32 %v2043_v61, %v2051_v5 }
 0x589   : > { %v2056_v10 = vmul.f32 1.442695, %v2053_v8 }
 0x58b   : > { %4971 = vpow2.f32 %v2056_v10 }
 0x591   : > { %v4970_v11 = vpop.eup %4969 }
 0x592   : > { %v2058_v12 = vsel %vm1998_vm3, %v4970_v11, 0.0 }
 0x593   : > { %2059 = vadd.xlane.f32.xlu1 %v2058_v12 }
 0x595   : > { %v4972_v13 = vpop.eup %4971 }
 0x596   : > { %v2061_v14 = vsel %vm1998_vm3, %v4972_v13, 0.0 }
 0x597   : > { %2062 = vadd.xlane.f32.xlu1 %v2061_v14 }
 0x5d0   : > { %v2308_v19 = vpop.f32.mrb[12].mxu1 }
 0x5d1   : > { %v4621_v20 = vpop.f32.mrb[13].mxu1  ;;  %v2309_v24 = vadd.f32 %v4368_v22, %v2308_v19 }
 0x5d2   : > { %v2311_v21 = vpop.f32.mrb[14].mxu1 }
 0x5d3   : > { %v4622_v23 = vpop.f32.mrb[15].mxu1 }
 0x620   : > { %v2060_v25 = vpop.xlane.xlu1 %2059 }
 0x621   : > { %4973 = vrcp.f32 %v2060_v25  ;;  %v2312_v25 = vadd.f32 %v4368_v22, %v2311_v21 }
 0x624   : > { %v2063_v26 = vpop.xlane.xlu1 %2062 }
 0x625   : > { %4975 = vrcp.f32 %v2063_v26  ;;  %v2387_v26 = vpack.c.bf16 %v2312_v25, %v2309_v24 }
 0x627   : > { %4630 = vmatpush3.bf16.msra.mxu1 %v2387_v26 }
 0x628   : > { %4641 = vmatprep.subr.bf16.mxu1 %v5907_v3 }
 0x62b   : > { %v4974_v27 = vpop.eup %4973 }
 0x62c   : > { %v2066_v29 = vmul.f32 %v4974_v27, %v4970_v11  ;;  %v4945_v27 = vld [vmem:[%s7659_s8 + $0x8] sm:$0xff]  }
 0x62f   : > { %v4976_v28 = vpop.eup %4975 }
 0x630   : > { %v2067_v30 = vmul.f32 %v4976_v28, %v4972_v13 }
 0x632   : > { %v2068_v32 = vpack.c.bf16 %v2067_v30, %v2066_v29 }
 0x634   : > { %4596 = vmatmul.mubr.msk.bf16.vlgmr.msra.gmra.mrb[8].mxu0 %vm1998_vm3, %v2068_v32 }
 0x635   : > { %4608 = vmatpush3.bf16.msra.mxu0 %v4938_v31  ;;  %4611 = vmatprep.mubr.msk.bf16.mxu0 %vm5908_vm1, %v5907_v3 }
 0x636   : > { %4609 = vmatprep.subr.bf16.mxu0 %v5907_v3 }
 0x639   : > { %4610 = vmatpush3.bf16.msra.mxu0 %v4939_v33 }
 0x63a   : > { %4623 = vmatprep.subr.bf16.mxu0 %v5907_v3 }
 0x63c   : > { %4612 = vmatmul.mubr.msk.bf16.vlgmr.msra.gmra.mrb[12].mxu0 %vm1823_vm2, %v7059_v9 }
 0x63d   : > { %4625 = vmatprep.mubr.msk.bf16.mxu0 %vm5908_vm1, %v5907_v3 }
 0x707   : > { %v7136_v43 = vpop.f32.mrb[8].mxu0 }
 0x708   : > { %v4597_v44 = vpop.f32.mrb[9].mxu0 }
 0x709   : > { %v7138_v46 = vpop.f32.mrb[10].mxu0 }
 0x70a   : > { %v2114_v48 = vpack.c.bf16 %v7138_v46, %v7136_v43  ;;  %v4598_v49 = vpop.f32.mrb[11].mxu0  ;;  %v4380_v46 = vld [vmem:[%s7661_s9] ss:$0 sm:$0xff] }
 0x70f   : > { %v2242_v51 = vpop.f32.mrb[12].mxu0 }
 0x710   : > { %v4613_v52 = vpop.f32.mrb[13].mxu0  ;;  %v2243_v56 = vadd.f32 %v4359_v50, %v2242_v51 }
 0x711   : > { %v2245_v53 = vpop.f32.mrb[14].mxu0 }
 0x712   : > { %v2246_v58 = vadd.f32 %v4359_v50, %v2245_v53  ;;  %v4614_v59 = vpop.f32.mrb[15].mxu0 }
 0x714   : > { %v2316_v60 = vpack.c.bf16 %v2246_v58, %v2243_v56 }
 0x716   : > { %v2321_v61 = vsel %vm1998_vm3, %v2316_v60, 0 }
 0x717   : > { %4624 = vmatpush3.bf16.xpose.msra.mxu0 %v2321_v61 }
 0x718   : > { %4635 = vmatprep.subr.bf16.mxu0 %v5907_v3 }
 0x71e   : > { %4626 = vmatmul.mubr.msk.bf16.vlgmr.msra.gmra.mrb[16].mxu0 %vm1998_vm3, %v2315_v42 }
 0x71f   : > { %4637 = vmatprep.mubr.msk.bf16.mxu0 %vm5908_vm1, %v5907_v3  ;;  %4636 = vmatpush3.bf16.msra.mxu0 %v4945_v27 }
 0x720   : > { %4647 = vmatprep.subr.bf16.mxu0 %v5907_v3 }
 0x7f1   : > { %v2357_v0 = vpop.f32.mrb[16].mxu0 }
 0x7f2   : > { %v2358_v1 = vadd.f32 %v2357_v0, %v7101_v55  ;;  %v4627_v2 = vpop.f32.mrb[17].mxu0  ;;  %v4946_v0 = vld [vmem:[%s7023_s3] sm:$0xff]  }
 0x7f3   : > { %v2360_v4 = vpop.f32.mrb[18].mxu0  ;;  %v7193_v2 = vld [vmem:[#allocation6] sm:$0xff]  }
 0x7f4   : > { %v2361_v5 = vadd.f32 %v2360_v4, %v7104_v57  ;;  %v4628_v8 = vpop.f32.mrb[19].mxu0  ;;  %v2364_v10 = vsel %vm1998_vm3, %v2358_v1, -inf }
 0x7f5   : > { %2365 = vmax.xlane.f32.xlu0 %v2364_v10 }
 0x7f6   : > { %v2367_v11 = vsel %vm1998_vm3, %v2361_v5, -inf }
 0x7f7   : > { %2368 = vmax.xlane.f32.xlu1 %v2367_v11 }
 0x882   : > { %v2366_v12 = vpop.xlane.xlu0 %2365 }
 0x883   : > { %v2370_v13 = vsub.f32 %v2358_v1, %v2366_v12  ;;  %v4947_v1 = vld [vmem:[%s7023_s3 + $0x8] sm:$0xff]  }
 0x884   : > { %v2369_v9 = vpop.xlane.xlu1 %2368 }
 0x885   : > { %v2372_v14 = vmul.f32 1.442695, %v2370_v13  ;;  %v2371_v15 = vsub.f32 %v2361_v5, %v2369_v9 }
 0x887   : > { %4977 = vpow2.f32 %v2372_v14  ;;  %v2374_v16 = vmul.f32 1.442695, %v2371_v15  ;;  %v7202_v14 = vld [vmem:[#allocation6 + $0x8] sm:$0xff]   ;;  %v7208_v15 = vld [vmem:[#allocation6 + $0x10] sm:$0xff]  }
 0x889   : > { %4979 = vpow2.f32 %v2374_v16  ;;  %v4951_v16 = vld [vmem:[%s7020_s6] sm:$0xff]  }
 0x891   : > { %v4978_v55 = vpop.eup %4977 }
 0x892   : > { %v2376_v57 = vsel %vm1998_vm3, %v4978_v55, 0.0 }
 0x893   : > { %v4980_v17 = vpop.eup %4979  ;;  %2377 = vadd.xlane.f32.xlu0 %v2376_v57  ;;  %v4387_v57 = vld [vmem:[%s1460_s26] ss:$0 sm:$0xff] }
 0x894   : > { %v2379_v18 = vsel %vm1998_vm3, %v4980_v17, 0.0 }
 0x895   : > { %2380 = vadd.xlane.f32.xlu1 %v2379_v18 }
 0x920   : > { %v2378_v28 = vpop.xlane.xlu0 %2377 }
 0x921   : > { %4981 = vrcp.f32 %v2378_v28 }
 0x922   : > { %v2381_v29 = vpop.xlane.xlu1 %2380 }
 0x923   : > { %4983 = vrcp.f32 %v2381_v29 }
 0x92b   : > { %v4982_v30 = vpop.eup %4981 }
 0x92c   : > { %v2384_v32 = vmul.f32 %v4982_v30, %v4978_v55  ;;  %v4952_v55 = vld [vmem:[%s7020_s6 + $0x8] sm:$0xff]  }
 0x92d   : > { %v4984_v31 = vpop.eup %4983 }
 0x92e   : > { %v2385_v33 = vmul.f32 %v4984_v31, %v4980_v17 }
 0x930   : > { %v2386_v35 = vpack.c.bf16 %v2385_v33, %v2384_v32  ;;  %v4381_v32 = vld [vmem:[%s7662_s18] ss:$0 sm:$0xff] }
 0x932   : > { %4632 = vmatmul.mubr.msk.bf16.vlgmr.msra.gmra.mrb[16].mxu1 %vm1998_vm3, %v2386_v35 }
 0x933   : > { %4642 = vmatpush3.bf16.msra.mxu1 %v4944_v34  ;;  %4643 = vmatprep.mubr.msk.bf16.mxu1 %vm5908_vm1, %v5907_v3 }
 0x934   : > { %4655 = vmatprep.subr.bf16.mxu1 %v5907_v3 }
 0x93a   : > { %4644 = vmatmul.mubr.msk.bf16.vlgmr.msra.gmra.mrb[20].mxu1 %vm1998_vm3, %v2114_v48 }
 0x93b   : > { %4659 = vmatprep.mubr.msk.bf16.mxu1 %vm5908_vm1, %v5907_v3  ;;  %4656 = vmatpush3.bf16.msra.mxu1 %v4946_v0  ;;  %v4383_v0 = vld [vmem:[%s1442_s29] ss:$0 sm:$0xff] }
 0x93c   : > { %4657 = vmatprep.subr.bf16.mxu1 %v5907_v3 }
 0x93f   : > { %4658 = vmatpush3.bf16.msra.mxu1 %v4947_v1 }
 0x940   : > { %4687 = vmatprep.subr.bf16.mxu1 %v5907_v3 }
 0x942   : > { %4660 = vmatmul.mubr.msk.bf16.vlgmr.msra.gmra.mrb[24].mxu1 %vm1823_vm2, %v7193_v2 }
 0x943   : > { %4663 = vmatprep.mubr.msk.bf16.mxu1 %vm5908_vm1, %v5907_v3 }
 0x94a   : > { %4664 = vmatmul.mubr.msk.bf16.gmra.mrb[28].mxu1 %vm1823_vm2, %v7202_v14 }
 0x94b   : > { %4667 = vmatprep.mubr.msk.bf16.mxu1 %vm5908_vm1, %v5907_v3 }
 0x952   : > { %4668 = vmatmul.mubr.msk.bf16.gmra.mrb[32].mxu1 %vm1823_vm2, %v7208_v15 }
 0x953   : > { %4693 = vmatprep.mubr.msk.bf16.mxu1 %vm5908_vm1, %v5907_v3 }
 0xa05   : > { %v2425_v36 = vpop.f32.mrb[16].mxu1 }
 0xa06   : > { %v4633_v38 = vpop.f32.mrb[17].mxu1 }
 0xa07   : > { %v2428_v39 = vpop.f32.mrb[18].mxu1  ;;  %v4382_v38 = vld [vmem:[%s7663_s5] ss:$0 sm:$0xff] }
 0xa08   : > { %v2432_v40 = vpack.c.bf16 %v2428_v39, %v2425_v36  ;;  %v4634_v41 = vpop.f32.mrb[19].mxu1 }
 0xa0a   : > { %4638 = vmatmul.mubr.msk.bf16.vlgmr.msra.gmra.mrb[20].mxu0 %vm1998_vm3, %v2432_v40 }
 0xa0b   : > { %4651 = vmatprep.mubr.msk.bf16.mxu0 %vm5908_vm1, %v5907_v3  ;;  %4648 = vmatpush3.bf16.msra.mxu0 %v4951_v16  ;;  %v1793_v16 = vmul.f32 0.16666667, %v7089_v37 }
 0xa0c   : > { %4649 = vmatprep.subr.bf16.mxu0 %v5907_v3 }
 0xa0d   : > { %v2529_v42 = vpop.f32.mrb[20].mxu1 }
 0xa0e   : > { %v4645_v44 = vpop.f32.mrb[21].mxu1 }
 0xa0f   : > { %v2532_v49 = vpop.f32.mrb[22].mxu1  ;;  %4650 = vmatpush3.bf16.msra.mxu0 %v4952_v55  ;;  %v4805_v55 = vtrunc.f32 %v1793_v16 }
 0xa10   : > { %v4646_v50 = vpop.f32.mrb[23].mxu1  ;;  %4671 = vmatprep.subr.bf16.mxu0 %v5907_v3 }
 0xa15   : > { %v2741_v17 = vpop.f32.mrb[24].mxu1 }
 0xa16   : > { %v2742_v18 = vadd.f32 %v4387_v57, %v2741_v17  ;;  %v4661_v19 = vpop.f32.mrb[25].mxu1 }
 0xa17   : > { %v2744_v20 = vpop.f32.mrb[26].mxu1 }
 0xa18   : > { %v2745_v21 = vadd.f32 %v4387_v57, %v2744_v20  ;;  %v4662_v22 = vpop.f32.mrb[27].mxu1 }
 0xa1a   : > { %v2845_v23 = vpack.c.bf16 %v2745_v21, %v2742_v18 }
 0xa1c   : > { %v2852_v24 = vsel %vm1998_vm3, %v2845_v23, 0 }
 0xa1d   : > { %4688 = vmatpush3.bf16.xpose.msra.mxu1 %v2852_v24  ;;  %v2749_v44 = vpop.f32.mrb[28].mxu1  ;;  %v4409_v24 = vld [vmem:[%s1442_s29 + $0x1] ss:$0 sm:$0xff] }
 0xa1e   : > { %4689 = vmatprep.subr.bf16.mxu1 %v5907_v3  ;;  %v4665_v50 = vpop.f32.mrb[29].mxu1 }
 0xadd   : > { %v2479_v43 = vpop.f32.mrb[20].mxu0 }
 0xade   : > { %v2530_v48 = vadd.f32 %v2529_v42, %v2479_v43  ;;  %v4639_v51 = vpop.f32.mrb[21].mxu0  ;;  %v2752_v43 = vpop.f32.mrb[30].mxu1 }
 0xadf   : > { %v2482_v52 = vpop.f32.mrb[22].mxu0 }
 0xae0   : > { %v2543_v53 = vadd.f32 %v4380_v46, %v2530_v48  ;;  %v2533_v56 = vadd.f32 %v2532_v49, %v2482_v52  ;;  %v4640_v58 = vpop.f32.mrb[23].mxu0  ;;  %v2750_v49 = vadd.f32 %v4387_v57, %v2749_v44  ;;  %v4666_v48 = vpop.f32.mrb[31].mxu1 }
 0xae2   : > { %v2544_v59 = vadd.f32 %v4380_v46, %v2533_v56  ;;  %v2545_v60 = vadd.f32 %v2543_v53, %v7050_v6  ;;  %v2753_v46 = vadd.f32 %v4387_v57, %v2752_v43  ;;  %v2757_v53 = vpop.f32.mrb[32].mxu1 }
 0xae3   : > { %v2758_v56 = vadd.f32 %v4387_v57, %v2757_v53  ;;  %v4669_v58 = vpop.f32.mrb[33].mxu1 }
 0xae4   : > { %v2547_v61 = vsel %vm1823_vm2, %v2545_v60, 0.0  ;;  %v2546_v62 = vadd.f32 %v2544_v59, %v7052_v7  ;;  %v2846_v51 = vpack.c.bf16 %v2753_v46, %v2750_v49  ;;  %v2760_v59 = vpop.f32.mrb[34].mxu1 }
 0xae5   : > { %2548 = vadd.xlane.f32.xlu0 %v2547_v61  ;;  %v4670_v61 = vpop.f32.mrb[35].mxu1 }
 0xae6   : > { %v2550_v63 = vsel %vm1823_vm2, %v2546_v62, 0.0  ;;  %v2855_v52 = vsel %vm1998_vm3, %v2846_v51, 0 }
 0xae7   : > { %2551 = vadd.xlane.f32.xlu1 %v2550_v63  ;;  %4690 = vmatpush3.bf16.xpose.msra.mxu1 %v2855_v52 }
 0xae8   : > { %4691 = vmatprep.subr.bf16.mxu1 %v5907_v3 }
 0xb72   : > { %v2549_v6 = vpop.xlane.xlu0 %2548 }
 0xb73   : > { %v2554_v7 = vmul.f32 0.03125, %v2549_v6 }
 0xb74   : > { %v2552_v4 = vpop.xlane.xlu1 %2551 }
 0xb75   : > { %v2556_v5 = vsub.f32 %v2545_v60, %v2554_v7  ;;  %v2555_v8 = vmul.f32 0.03125, %v2552_v4  ;;  %v2761_v60 = vadd.f32 %v4387_v57, %v2760_v59  ;;  %v4806_v57 = vcvt.f32.s32 %v4805_v55  ;;  %v4957_v55 = vld [vmem:[%s7023_s3 + $0x10] sm:$0xff]  }
 0xb77   : > { %v2557_v10 = vsub.f32 %v2546_v62, %v2555_v8  ;;  %v2558_v11 = vmul.f32 %v2556_v5, %v2556_v5  ;;  %v2847_v62 = vpack.c.bf16 %v2761_v60, %v2758_v56  ;;  %vm1795_vm10 = vcmp.eq.s32.totalorder %v7092_v45, %v4806_v57 }
 0xb78   : > { %vm1796_vm11 = vcmp.eq.s32.totalorder %v7094_v47, %v4806_v57  ;;  %v7271_v17 = vsel %vm1795_vm10, 0.0, %v5909_v54 }
 0xb79   : > { %v2560_v12 = vsel %vm1823_vm2, %v2558_v11, 0.0  ;;  %v2559_v13 = vmul.f32 %v2557_v10, %v2557_v10  ;;  %v2858_v63 = vsel %vm1998_vm3, %v2847_v62, 0  ;;  %v7274_v19 = vsel %vm1796_vm11, 0.0, %v5909_v54 }
 0xb7a   : > { %2561 = vadd.xlane.f32.xlu0 %v2560_v12  ;;  %4692 = vmatpush3.bf16.xpose.msra.mxu1 %v2858_v63  ;;  %v4954_v12 = vld [vmem:[%s7020_s6 + $0x18] sm:$0xff]  }
 0xb7b   : > { %v2563_v9 = vsel %vm1823_vm2, %v2559_v13, 0.0  ;;  %4707 = vmatprep.subr.bf16.mxu1 %v5907_v3  ;;  %v4955_v13 = vld [vmem:[%s7026_s21] sm:$0xff]  }
 0xb7c   : > { %2564 = vadd.xlane.f32.xlu1 %v2563_v9  ;;  %v4956_v9 = vld [vmem:[%s7026_s21 + $0x8] sm:$0xff]  }
 0xc07   : > { %v2562_v25 = vpop.xlane.xlu0 %2561 }
 0xc08   : > { %v2566_v26 = vmul.f32 0.03125, %v2562_v25 }
 0xc09   : > { %v2565_v27 = vpop.xlane.xlu1 %2564 }
 0xc0a   : > { %v2568_v28 = vadd.f32 1e-05, %v2566_v26  ;;  %v2567_v29 = vmul.f32 0.03125, %v2565_v27 }
 0xc0c   : > { %4985 = vrsqrt.f32 %v2568_v28  ;;  %v2569_v30 = vadd.f32 1e-05, %v2567_v29 }
 0xc0e   : > { %4987 = vrsqrt.f32 %v2569_v30 }
 0xc16   : > { %v4986_v31 = vpop.eup %4985 }
 0xc17   : > { %v2572_v33 = vmul.f32 %v4986_v31, %v2556_v5  ;;  %v4396_v31 = vld [vmem:[%s1478_s23] ss:$0 sm:$0xff] }
 0xc18   : > { %v4988_v34 = vpop.eup %4987 }
 0xc19   : > { %v2581_v35 = vmul.f32 %v4381_v32, %v2572_v33  ;;  %v2573_v36 = vmul.f32 %v4988_v34, %v2557_v10  ;;  %v4953_v10 = vld [vmem:[%s7020_s6 + $0x10] sm:$0xff]  }
 0xc1b   : > { %v2582_v39 = vmul.f32 %v4381_v32, %v2573_v36  ;;  %v7226_v40 = vadd.f32 %v4382_v38, %v2581_v35 }
 0xc1d   : > { %v7228_v41 = vadd.f32 %v4382_v38, %v2582_v39 }
 0xc1f   : > { %v2592_v42 = vpack.c.bf16 %v7228_v41, %v7226_v40 }
 0xc21   : > { %4652 = vmatmul.mubr.msk.bf16.vlgmr.msra.gmra.mrb[24].mxu0 %vm1823_vm2, %v2592_v42 }
 0xc22   : > { %4675 = vmatprep.mubr.msk.bf16.mxu0 %vm5908_vm1, %v5907_v3  ;;  %4672 = vmatpush3.bf16.msra.mxu0 %v4955_v13 }
 0xc23   : > { %4673 = vmatprep.subr.bf16.mxu0 %v5907_v3 }
 0xc26   : > { %4674 = vmatpush3.bf16.msra.mxu0 %v4956_v9 }
 0xc27   : > { %4697 = vmatprep.subr.bf16.mxu0 %v5907_v3 }
 0xc29   : > { %4676 = vmatmul.mubr.msk.bf16.vlgmr.msra.gmra.mrb[28].mxu0 %vm1823_vm2, %v7193_v2 }
 0xc2a   : > { %4679 = vmatprep.mubr.msk.bf16.mxu0 %vm5908_vm1, %v5907_v3 }
 0xc31   : > { %4680 = vmatmul.mubr.msk.bf16.gmra.mrb[32].mxu0 %vm1823_vm2, %v7202_v14 }
 0xc32   : > { %4683 = vmatprep.mubr.msk.bf16.mxu0 %vm5908_vm1, %v5907_v3 }
 0xc39   : > { %4684 = vmatmul.mubr.msk.bf16.gmra.mrb[36].mxu0 %vm1823_vm2, %v7208_v15 }
 0xc3a   : > { %4703 = vmatprep.mubr.msk.bf16.mxu0 %vm5908_vm1, %v5907_v3 }
 0xcf4   : > { %v2653_v1 = vpop.f32.mrb[24].mxu0 }
 0xcf5   : > { %v4653_v6 = vpop.f32.mrb[25].mxu0  ;;  %v2654_v4 = vadd.f32 %v4383_v0, %v2653_v1 }
 0xcf6   : > { %v2656_v7 = vpop.f32.mrb[26].mxu0 }
 0xcf7   : > { %v2657_v5 = vadd.f32 %v4383_v0, %v2656_v7  ;;  %v4654_v8 = vpop.f32.mrb[27].mxu0 }
 0xcf9   : > { %v2844_v11 = vpack.c.bf16 %v2657_v5, %v2654_v4 }
 0xcfb   : > { %4694 = vmatmul.mubr.msk.bf16.vlgmr.msra.gmra.mrb[36].mxu1 %vm1998_vm3, %v2844_v11 }
 0xcfc   : > { %4708 = vmatpush3.bf16.msra.mxu1 %v4953_v10  ;;  %4711 = vmatprep.mubr.msk.bf16.mxu1 %vm5908_vm1, %v5907_v3  ;;  %v2821_v32 = vpop.f32.mrb[28].mxu0 }
 0xcfd   : > { %4709 = vmatprep.subr.bf16.mxu1 %v5907_v3  ;;  %v2822_v33 = vadd.f32 %v4396_v31, %v2821_v32  ;;  %v4677_v34 = vpop.f32.mrb[29].mxu0 }
 0xcfe   : > { %v2824_v35 = vpop.f32.mrb[30].mxu0 }
 0xcff   : > { %v2825_v36 = vadd.f32 %v4396_v31, %v2824_v35  ;;  %v4678_v38 = vpop.f32.mrb[31].mxu0 }
 0xd00   : > { %4710 = vmatpush3.bf16.msra.mxu1 %v4954_v12 }
 0xd01   : > { %4731 = vmatprep.subr.bf16.mxu1 %v5907_v3  ;;  %v2925_v39 = vpack.c.bf16 %v2825_v36, %v2822_v33 }
 0xd03   : > { %4712 = vmatmul.mubr.msk.bf16.vlgmr.msra.gmra.mrb[40].mxu1 %vm1823_vm2, %v2592_v42  ;;  %4698 = vmatpush3.bf16.msra.mxu0 %v2925_v39 }
 0xd04   : > { %4735 = vmatprep.mubr.msk.bf16.mxu1 %vm5908_vm1, %v5907_v3  ;;  %v2829_v42 = vpop.f32.mrb[32].mxu0  ;;  %4699 = vmatprep.subr.bf16.mxu0 %v5907_v3 }
 0xd05   : > { %v2830_v44 = vadd.f32 %v4396_v31, %v2829_v42  ;;  %v4681_v49 = vpop.f32.mrb[33].mxu0 }
 0xd06   : > { %v2832_v50 = vpop.f32.mrb[34].mxu0 }
 0xd07   : > { %v2833_v43 = vadd.f32 %v4396_v31, %v2832_v50  ;;  %v4682_v46 = vpop.f32.mrb[35].mxu0 }
 0xd09   : > { %v2926_v48 = vpack.c.bf16 %v2833_v43, %v2830_v44 }
 0xd0b   : > { %4700 = vmatpush3.bf16.msra.mxu0 %v2926_v48 }
 0xd0c   : > { %4701 = vmatprep.subr.bf16.mxu0 %v5907_v3  ;;  %v2837_v0 = vpop.f32.mrb[36].mxu0 }
 0xd0d   : > { %v4685_v1 = vpop.f32.mrb[37].mxu0  ;;  %v2838_v4 = vadd.f32 %v4396_v31, %v2837_v0 }
 0xd0e   : > { %v2840_v6 = vpop.f32.mrb[38].mxu0 }
 0xd0f   : > { %v4686_v7 = vpop.f32.mrb[39].mxu0  ;;  %v2841_v5 = vadd.f32 %v4396_v31, %v2840_v6 }
 0xd11   : > { %v2927_v8 = vpack.c.bf16 %v2841_v5, %v2838_v4 }
 0xd13   : > { %4702 = vmatpush3.bf16.msra.mxu0 %v2927_v8 }
 0xd14   : > { %4715 = vmatprep.subr.bf16.mxu0 %v5907_v3 }
 0xdce   : > { %v2894_v18 = vpop.f32.mrb[36].mxu1 }
 0xdcf   : > { %v2895_v20 = vadd.f32 %v2894_v18, %v7271_v17  ;;  %v4695_v21 = vpop.f32.mrb[37].mxu1  ;;  %v4958_v18 = vld [vmem:[%s7023_s3 + $0x18] sm:$0xff]  }
 0xdd0   : > { %v2897_v37 = vpop.f32.mrb[38].mxu1 }
 0xdd1   : > { %v2898_v22 = vadd.f32 %v2897_v37, %v7274_v19  ;;  %v4696_v23 = vpop.f32.mrb[39].mxu1  ;;  %v2902_v45 = vsel %vm2901_vm12, %v2895_v20, -inf }
 0xdd2   : > { %2903 = vmax.xlane.f32.xlu0 %v2902_v45  ;;  %v4418_v45 = vld [vmem:[%s1460_s26 + $0x1] ss:$0 sm:$0xff] }
 0xdd3   : > { %v2905_v47 = vsel %vm2901_vm12, %v2898_v22, -inf }
 0xdd4   : > { %2906 = vmax.xlane.f32.xlu1 %v2905_v47 }
 0xdd6   : > { %v3034_v25 = vpop.f32.mrb[40].mxu1 }
 0xdd7   : > { %v4713_v54 = vpop.f32.mrb[41].mxu1  ;;  %v7282_v27 = vadd.f32 %v4409_v24, %v3034_v25 }
 0xdd8   : > { %v3037_v26 = vpop.f32.mrb[42].mxu1 }
 0xdd9   : > { %v7284_v28 = vadd.f32 %v4409_v24, %v3037_v26  ;;  %v4714_v29 = vpop.f32.mrb[43].mxu1 }
 0xddb   : > { %v3205_v30 = vpack.c.bf16 %v7284_v28, %v7282_v27 }
 0xe5f   : > { %v2904_v51 = vpop.xlane.xlu0 %2903 }
 0xe60   : > { %v2908_v52 = vsub.f32 %v2895_v20, %v2904_v51 }
 0xe61   : > { %v2907_v53 = vpop.xlane.xlu1 %2906 }
 0xe62   : > { %v2910_v56 = vmul.f32 1.442695, %v2908_v52  ;;  %v2909_v58 = vsub.f32 %v2898_v22, %v2907_v53 }
 0xe64   : > { %4989 = vpow2.f32 %v2910_v56  ;;  %v2912_v59 = vmul.f32 1.442695, %v2909_v58  ;;  %v4959_v56 = vld [vmem:[%s7026_s21 + $0x10] sm:$0xff]   ;;  %v4960_v58 = vld [vmem:[%s7026_s21 + $0x18] sm:$0xff]  }
 0xe65   : > { %4732 = vmatpush3.bf16.msra.mxu1 %v4959_v56 }
 0xe66   : > { %4991 = vpow2.f32 %v2912_v59  ;;  %4733 = vmatprep.subr.bf16.mxu1 %v5907_v3 }
 0xe69   : > { %4734 = vmatpush3.bf16.msra.mxu1 %v4960_v58 }
 0xe6a   : > { %4757 = vmatprep.subr.bf16.mxu1 %v5907_v3 }
 0xe6c   : > { %4736 = vmatmul.mubr.msk.bf16.vlgmr.msra.gmra.mrb[44].mxu1 %vm1823_vm2, %v7193_v2 }
 0xe6d   : > { %4739 = vmatprep.mubr.msk.bf16.mxu1 %vm5908_vm1, %v5907_v3 }
 0xe6e   : > { %v4990_v60 = vpop.eup %4989 }
 0xe6f   : > { %v2914_v61 = vsel %vm2901_vm12, %v4990_v60, 0.0 }
 0xe70   : > { %v4992_v62 = vpop.eup %4991  ;;  %2915 = vadd.xlane.f32.xlu0 %v2914_v61 }
 0xe71   : > { %v2917_v63 = vsel %vm2901_vm12, %v4992_v62, 0.0 }
 0xe72   : > { %2918 = vadd.xlane.f32.xlu1 %v2917_v63 }
 0xe74   : > { %4740 = vmatmul.mubr.msk.bf16.gmra.mrb[48].mxu1 %vm1823_vm2, %v7202_v14 }
 0xe75   : > { %4743 = vmatprep.mubr.msk.bf16.mxu1 %vm5908_vm1, %v5907_v3 }
 0xe7c   : > { %4744 = vmatmul.mubr.msk.bf16.gmra.mrb[52].mxu1 %vm1823_vm2, %v7208_v15 }
 0xe7d   : > { %4763 = vmatprep.mubr.msk.bf16.mxu1 %vm5908_vm1, %v5907_v3 }
 0xefd   : > { %v2916_v10 = vpop.xlane.xlu0 %2915 }
 0xefe   : > { %4993 = vrcp.f32 %v2916_v10 }
 0xeff   : > { %v2919_v11 = vpop.xlane.xlu1 %2918 }
 0xf00   : > { %4995 = vrcp.f32 %v2919_v11 }
 0xf08   : > { %v4994_v12 = vpop.eup %4993 }
 0xf09   : > { %v2922_v9 = vmul.f32 %v4994_v12, %v4990_v60 }
 0xf0a   : > { %v4996_v13 = vpop.eup %4995 }
 0xf0b   : > { %v2923_v16 = vmul.f32 %v4996_v13, %v4992_v62  ;;  %v4429_v62 = vld [vmem:[%s1478_s23 + $0x1] ss:$0 sm:$0xff] }
 0xf0d   : > { %v2924_v57 = vpack.c.bf16 %v2923_v16, %v2922_v9 }
 0xf0f   : > { %4704 = vmatmul.mubr.msk.bf16.vlgmr.msra.gmra.mrb[40].mxu0 %vm2901_vm12, %v2924_v57 }
 0xf10   : > { %4716 = vmatpush3.bf16.msra.mxu0 %v4957_v55  ;;  %4719 = vmatprep.mubr.msk.bf16.mxu0 %vm5908_vm1, %v5907_v3 }
 0xf11   : > { %4717 = vmatprep.subr.bf16.mxu0 %v5907_v3 }
 0xf14   : > { %4718 = vmatpush3.bf16.msra.mxu0 %v4958_v18 }
 0xf15   : > { %4747 = vmatprep.subr.bf16.mxu0 %v5907_v3 }
 0xf17   : > { %4720 = vmatmul.mubr.msk.bf16.vlgmr.msra.gmra.mrb[44].mxu0 %vm1823_vm2, %v7193_v2 }
 0xf18   : > { %4723 = vmatprep.mubr.msk.bf16.mxu0 %vm5908_vm1, %v5907_v3 }
 0xf1f   : > { %4724 = vmatmul.mubr.msk.bf16.gmra.mrb[48].mxu0 %vm1823_vm2, %v7202_v14 }
 0xf20   : > { %4727 = vmatprep.mubr.msk.bf16.mxu0 %vm5908_vm1, %v5907_v3 }
 0xf27   : > { %4728 = vmatmul.mubr.msk.bf16.gmra.mrb[52].mxu0 %vm1823_vm2, %v7208_v15 }
 0xf28   : > { %4753 = vmatprep.mubr.msk.bf16.mxu0 %vm5908_vm1, %v5907_v3 }
 0xf3f   : > { %v3182_v15 = vpop.f32.mrb[44].mxu1 }
 0xf40   : > { %v3183_v63 = vadd.f32 %v4429_v62, %v3182_v15  ;;  %v4737_v0 = vpop.f32.mrb[45].mxu1 }
 0xf41   : > { %v3185_v1 = vpop.f32.mrb[46].mxu1 }
 0xf42   : > { %v3186_v6 = vadd.f32 %v4429_v62, %v3185_v1  ;;  %v4738_v7 = vpop.f32.mrb[47].mxu1 }
 0xf47   : > { %v3190_v4 = vpop.f32.mrb[48].mxu1 }
 0xf48   : > { %v4741_v5 = vpop.f32.mrb[49].mxu1 }
 0xf49   : > { %v3193_v8 = vpop.f32.mrb[50].mxu1  ;;  %v4963_v5 = vld [vmem:[%s1520_s2] sm:$0xff]  }
 0xf4a   : > { %v3194_v10 = vadd.f32 %v4429_v62, %v3193_v8  ;;  %v4742_v11 = vpop.f32.mrb[51].mxu1  ;;  %v4964_v8 = vld [vmem:[%s1520_s2 + $0x8] sm:$0xff]  }
 0xf4b   : > { %v4966_v11 = vld [vmem:[%s7035_s7 + $0x8] sm:$0xff]  }
 0xfe2   : > { %v7314_v20 = vpop.f32.mrb[40].mxu0 }
 0xfe3   : > { %v4705_v21 = vpop.f32.mrb[41].mxu0 }
 0xfe4   : > { %v7316_v37 = vpop.f32.mrb[42].mxu0 }
 0xfe5   : > { %v2972_v22 = vpack.c.bf16 %v7316_v37, %v7314_v20  ;;  %v4706_v23 = vpop.f32.mrb[43].mxu0  ;;  %v4443_v37 = vld [vmem:[%s1495_s0] ss:$0 sm:$0xff] }
 0xfea   : > { %v3100_v47 = vpop.f32.mrb[44].mxu0 }
 0xfeb   : > { %v4721_v24 = vpop.f32.mrb[45].mxu0  ;;  %v3101_v54 = vadd.f32 %v4418_v45, %v3100_v47 }
 0xfec   : > { %v3103_v25 = vpop.f32.mrb[46].mxu0  ;;  %v3198_v24 = vpop.f32.mrb[52].mxu1 }
 0xfed   : > { %v3104_v26 = vadd.f32 %v4418_v45, %v3103_v25  ;;  %v4722_v29 = vpop.f32.mrb[47].mxu0  ;;  %v4745_v25 = vpop.f32.mrb[53].mxu1 }
 0xfee   : > { %v3199_v29 = vadd.f32 %v4429_v62, %v3198_v24  ;;  %v4445_v25 = vld [vmem:[%s1511_s1] ss:$0 sm:$0xff]  ;;  %s7664_s1 = sld [smem:[#allocation41_spill]] }
 0xfef   : > { %v3206_v31 = vpack.c.bf16 %v3104_v26, %v3101_v54  ;;  %v3201_v54 = vpop.f32.mrb[54].mxu1 }
 0xff0   : > { %v4746_v26 = vpop.f32.mrb[55].mxu1 }
 0xff1   : > { %v3213_v32 = vsel %vm1998_vm3, %v3206_v31, 0  ;;  %v3202_v31 = vadd.f32 %v4429_v62, %v3201_v54 }
 0xff2   : > { %v3108_v33 = vpop.f32.mrb[48].mxu0  ;;  %4748 = vmatpush3.bf16.xpose.msra.mxu0 %v3213_v32 }
 0xff3   : > { %v4725_v34 = vpop.f32.mrb[49].mxu0  ;;  %4749 = vmatprep.subr.bf16.mxu0 %v5907_v3  ;;  %v3109_v36 = vadd.f32 %v4418_v45, %v3108_v33  ;;  %v3287_v32 = vpack.c.bf16 %v3202_v31, %v3199_v29  ;;  %v4962_v33 = vld [vmem:[%s1487_s28 + $0x8] sm:$0xff]  }
 0xff4   : > { %v3111_v35 = vpop.f32.mrb[50].mxu0  ;;  %p4458_p2 = scmp.ne.s32.totalorder %s7664_s1, 1 }
 0xff5   : > { %v3112_v38 = vadd.f32 %v4418_v45, %v3111_v35  ;;  %v4726_v39 = vpop.f32.mrb[51].mxu0 }
 0xff7   : > { %v3207_v42 = vpack.c.bf16 %v3112_v38, %v3109_v36 }
 0xff9   : > { %v3216_v44 = vsel %vm1998_vm3, %v3207_v42, 0 }
 0xffa   : > { %v3116_v49 = vpop.f32.mrb[52].mxu0  ;;  %4750 = vmatpush3.bf16.xpose.msra.mxu0 %v3216_v44  ;;  %v4961_v44 = vld [vmem:[%s1487_s28] sm:$0xff]  }
 0xffb   : > { %v4729_v50 = vpop.f32.mrb[53].mxu0  ;;  %4751 = vmatprep.subr.bf16.mxu0 %v5907_v3  ;;  %v3117_v46 = vadd.f32 %v4418_v45, %v3116_v49 }
 0xffc   : > { %v3119_v43 = vpop.f32.mrb[54].mxu0 }
 0xffd   : > { %v3120_v48 = vadd.f32 %v4418_v45, %v3119_v43  ;;  %v4730_v51 = vpop.f32.mrb[55].mxu0 }
 0xfff   : > { %v3208_v52 = vpack.c.bf16 %v3120_v48, %v3117_v46 }
0x1001   : > { %v3219_v53 = vsel %vm1998_vm3, %v3208_v52, 0 }
0x1002   : > { %4752 = vmatpush3.bf16.xpose.msra.mxu0 %v3219_v53 }
0x1003   : > { %4767 = vmatprep.subr.bf16.mxu0 %v5907_v3 }
0x1009   : > { %4754 = vmatmul.mubr.msk.bf16.vlgmr.msra.gmra.mrb[56].mxu0 %vm1998_vm3, %v3205_v30 }
0x100a   : > { %4769 = vmatprep.mubr.msk.bf16.mxu0 %vm5908_vm1, %v5907_v3  ;;  %4768 = vmatpush3.bf16.msra.mxu0 %v4962_v33  ;;  %v4968_v33 = vld [vmem:[%s7035_s7 + $0x18] sm:$0xff]  }
0x100b   : > { %4779 = vmatprep.subr.bf16.mxu0 %v5907_v3 }
0x10dc   : > { %v3255_v27 = vpop.f32.mrb[56].mxu0 }
0x10dd   : > { %v3256_v28 = vadd.f32 %v3255_v27, %v7271_v17  ;;  %v4755_v2 = vpop.f32.mrb[57].mxu0  ;;  %v3285_v17 = vpack.c.bf16 %v3186_v6, %v3183_v63 }
0x10de   : > { %v3258_v30 = vpop.f32.mrb[58].mxu0 }
0x10df   : > { %v3259_v59 = vadd.f32 %v3258_v30, %v7274_v19  ;;  %v4756_v60 = vpop.f32.mrb[59].mxu0  ;;  %v3262_v61 = vsel %vm2901_vm12, %v3256_v28, -inf  ;;  %4758 = vmatpush3.bf16.msra.mxu1 %v3285_v17  ;;  %v3191_v19 = vadd.f32 %v4429_v62, %v3190_v4 }
0x10e0   : > { %3263 = vmax.xlane.f32.xlu0 %v3262_v61  ;;  %4759 = vmatprep.subr.bf16.mxu1 %v5907_v3 }
0x10e1   : > { %v3265_v14 = vsel %vm2901_vm12, %v3259_v59, -inf  ;;  %v3286_v12 = vpack.c.bf16 %v3194_v10, %v3191_v19  ;;  %v4965_v10 = vld [vmem:[%s7035_s7] sm:$0xff]  }
0x10e2   : > { %3266 = vmax.xlane.f32.xlu1 %v3265_v14 }
0x10e3   : > { %4760 = vmatpush3.bf16.msra.mxu1 %v3286_v12 }
0x10e4   : > { %4761 = vmatprep.subr.bf16.mxu1 %v5907_v3 }
0x10e7   : > { %4762 = vmatpush3.bf16.msra.mxu1 %v3287_v32  ;;  %v4967_v32 = vld [vmem:[%s7035_s7 + $0x10] sm:$0xff]  }
0x10e8   : > { %4773 = vmatprep.subr.bf16.mxu1 %v5907_v3 }
0x116d   : > { %v3264_v13 = vpop.xlane.xlu0 %3263 }
0x116e   : > { %v3268_v9 = vsub.f32 %v3256_v28, %v3264_v13 }
0x116f   : > { %v3267_v16 = vpop.xlane.xlu1 %3266 }
0x1170   : > { %v3270_v55 = vmul.f32 1.442695, %v3268_v9  ;;  %v3269_v57 = vsub.f32 %v3259_v59, %v3267_v16 }
0x1172   : > { %4997 = vpow2.f32 %v3270_v55  ;;  %v3272_v18 = vmul.f32 1.442695, %v3269_v57 }
0x1174   : > { %4999 = vpow2.f32 %v3272_v18 }
0x117c   : > { %v4998_v21 = vpop.eup %4997 }
0x117d   : > { %v3274_v23 = vsel %vm2901_vm12, %v4998_v21, 0.0 }
0x117e   : > { %v5000_v45 = vpop.eup %4999  ;;  %3275 = vadd.xlane.f32.xlu0 %v3274_v23 }
0x117f   : > { %v3277_v47 = vsel %vm2901_vm12, %v5000_v45, 0.0 }
0x1180   : > { %3278 = vadd.xlane.f32.xlu1 %v3277_v47 }
0x120b   : > { %v3276_v34 = vpop.xlane.xlu0 %3275 }
0x120c   : > { %5001 = vrcp.f32 %v3276_v34  ;;  %v4446_v34 = vld [vmem:[%s1528_s4] ss:$0 sm:$0xff] }
0x120d   : > { %v3279_v35 = vpop.xlane.xlu1 %3278 }
0x120e   : > { %5003 = vrcp.f32 %v3279_v35 }
0x1216   : > { %v5002_v36 = vpop.eup %5001 }
0x1217   : > { %v3282_v39 = vmul.f32 %v5002_v36, %v4998_v21  ;;  %v4444_v21 = vld [vmem:[%s1503_s15] ss:$0 sm:$0xff] }
0x1218   : > { %v5004_v38 = vpop.eup %5003 }
0x1219   : > { %v3283_v42 = vmul.f32 %v5004_v38, %v5000_v45 }
0x121b   : > { %v3284_v49 = vpack.c.bf16 %v3283_v42, %v3282_v39 }
0x121d   : > { %4764 = vmatmul.mubr.msk.bf16.vlgmr.msra.gmra.mrb[56].mxu1 %vm2901_vm12, %v3284_v49 }
0x121e   : > { %4774 = vmatpush3.bf16.msra.mxu1 %v4961_v44  ;;  %4775 = vmatprep.mubr.msk.bf16.mxu1 %vm5908_vm1, %v5907_v3 }
0x121f   : > { %4787 = vmatprep.subr.bf16.mxu1 %v5907_v3 }
0x1225   : > { %4776 = vmatmul.mubr.msk.bf16.vlgmr.msra.gmra.mrb[60].mxu1 %vm1998_vm3, %v2972_v22 }
0x1226   : > { %4795 = vmatprep.mubr.msk.bf16.mxu1 %vm5908_vm1, %v5907_v3  ;;  %4788 = vmatpush3.bf16.msra.mxu1 %v4965_v10 }
0x1227   : > { %4789 = vmatprep.subr.bf16.mxu1 %v5907_v3 }
0x122a   : > { %4790 = vmatpush3.bf16.msra.mxu1 %v4966_v11 }
0x122b   : > { %4791 = vmatprep.subr.bf16.mxu1 %v5907_v3 }
0x122e   : > { %4792 = vmatpush3.bf16.msra.mxu1 %v4967_v32 }
0x122f   : > { %4793 = vmatprep.subr.bf16.mxu1 %v5907_v3 }
0x1232   : > { %4794 = vmatpush3.bf16.msra.mxu1 %v4968_v33 }
0x12f0   : > { %v3325_v50 = vpop.f32.mrb[56].mxu1 }
0x12f1   : > { %v4765_v43 = vpop.f32.mrb[57].mxu1 }
0x12f2   : > { %v3328_v46 = vpop.f32.mrb[58].mxu1 }
0x12f3   : > { %v3332_v48 = vpack.c.bf16 %v3328_v46, %v3325_v50  ;;  %v4766_v51 = vpop.f32.mrb[59].mxu1  ;;  %v4450_v46 = vld [vmem:[%s1545_s20] ss:$0 sm:$0xff] }
0x12f5   : > { %4770 = vmatmul.mubr.msk.bf16.vlgmr.msra.gmra.mrb[60].mxu0 %vm1998_vm3, %v3332_v48 }
0x12f6   : > { %4783 = vmatprep.mubr.msk.bf16.mxu0 %vm5908_vm1, %v5907_v3  ;;  %4780 = vmatpush3.bf16.msra.mxu0 %v4963_v5  ;;  %v4457_v5 = vld [vmem:[%s1561_s12] ss:$0 sm:$0xff] }
0x12f7   : > { %4781 = vmatprep.subr.bf16.mxu0 %v5907_v3 }
0x12f8   : > { %v3429_v52 = vpop.f32.mrb[60].mxu1 }
0x12f9   : > { %v4777_v53 = vpop.f32.mrb[61].mxu1 }
0x12fa   : > { %v3432_v56 = vpop.f32.mrb[62].mxu1  ;;  %4782 = vmatpush3.bf16.msra.mxu0 %v4964_v8 }
0x12fb   : > { %v4778_v58 = vpop.f32.mrb[63].mxu1 }
0x13c8   : > { %v3379_v20 = vpop.f32.mrb[60].mxu0 }
0x13c9   : > { %v3430_v22 = vadd.f32 %v3429_v52, %v3379_v20  ;;  %v4771_v27 = vpop.f32.mrb[61].mxu0 }
0x13ca   : > { %v3382_v28 = vpop.f32.mrb[62].mxu0 }
0x13cb   : > { %v3443_v2 = vadd.f32 %v4443_v37, %v3430_v22  ;;  %v3433_v30 = vadd.f32 %v3432_v56, %v3382_v28  ;;  %v4772_v59 = vpop.f32.mrb[63].mxu0 }
0x13cd   : > { %v3444_v60 = vadd.f32 %v4443_v37, %v3433_v30  ;;  %v3445_v61 = vadd.f32 %v3443_v2, %v7226_v40 }
0x13cf   : > { %v3447_v14 = vsel %vm1823_vm2, %v3445_v61, 0.0  ;;  %v3446_v62 = vadd.f32 %v3444_v60, %v7228_v41 }
0x13d0   : > { %3448 = vadd.xlane.f32.xlu0 %v3447_v14 }
0x13d1   : > { %v3450_v15 = vsel %vm1823_vm2, %v3446_v62, 0.0 }
0x13d2   : > { %3451 = vadd.xlane.f32.xlu1 %v3450_v15 }
0x145d   : > { %v3449_v63 = vpop.xlane.xlu0 %3448 }
0x145e   : > { %v3453_v0 = vmul.f32 0.03125, %v3449_v63 }
0x145f   : > { %v3452_v1 = vpop.xlane.xlu1 %3451 }
0x1460   : > { %v3455_v6 = vsub.f32 %v3445_v61, %v3453_v0  ;;  %v3454_v7 = vmul.f32 0.03125, %v3452_v1 }
0x1462   : > { %v3456_v17 = vsub.f32 %v3446_v62, %v3454_v7  ;;  %v3457_v4 = vmul.f32 %v3455_v6, %v3455_v6 }
0x1464   : > { %v3459_v40 = vsel %vm1823_vm2, %v3457_v4, 0.0  ;;  %v3458_v19 = vmul.f32 %v3456_v17, %v3456_v17 }
0x1465   : > { %3460 = vadd.xlane.f32.xlu0 %v3459_v40  ;;  %v4456_v40 = vld [vmem:[%s1553_s27] ss:$0 sm:$0xff] }
0x1466   : > { %v3462_v41 = vsel %vm1823_vm2, %v3458_v19, 0.0 }
0x1467   : > { %3463 = vadd.xlane.f32.xlu1 %v3462_v41 }
0x14f2   : > { %v3461_v12 = vpop.xlane.xlu0 %3460 }
0x14f3   : > { %v3465_v13 = vmul.f32 0.03125, %v3461_v12 }
0x14f4   : > { %v3464_v9 = vpop.xlane.xlu1 %3463 }
0x14f5   : > { %v3467_v16 = vadd.f32 1e-05, %v3465_v13  ;;  %v3466_v55 = vmul.f32 0.03125, %v3464_v9 }
0x14f7   : > { %5005 = vrsqrt.f32 %v3467_v16  ;;  %v3468_v57 = vadd.f32 1e-05, %v3466_v55 }
0x14f9   : > { %5007 = vrsqrt.f32 %v3468_v57 }
0x1501   : > { %v5006_v18 = vpop.eup %5005 }
0x1502   : > { %v3471_v23 = vmul.f32 %v5006_v18, %v3455_v6 }
0x1503   : > { %v5008_v45 = vpop.eup %5007 }
0x1504   : > { %v3480_v47 = vmul.f32 %v4444_v21, %v3471_v23  ;;  %v3472_v24 = vmul.f32 %v5008_v45, %v3456_v17 }
0x1506   : > { %v3481_v54 = vmul.f32 %v4444_v21, %v3472_v24  ;;  %v3489_v26 = vadd.f32 %v4445_v25, %v3480_v47 }
0x1508   : > { %v3490_v29 = vadd.f32 %v4445_v25, %v3481_v54 }
0x150a   : > { %v3491_v31 = vpack.c.bf16 %v3490_v29, %v3489_v26 }
0x150c   : > { %4784 = vmatmul.mubr.msk.bf16.vlgmr.msra.gmra.mrb[64].mxu0 %vm1823_vm2, %v3491_v31 }
0x15df   : > { %v3552_v35 = vpop.f32.mrb[64].mxu0 }
0x15e0   : > { %v3553_v36 = vadd.f32 %v4446_v34, %v3552_v35  ;;  %v4785_v38 = vpop.f32.mrb[65].mxu0 }
0x15e1   : > { %v3555_v39 = vpop.f32.mrb[66].mxu0 }
0x15e2   : > { %v3556_v42 = vadd.f32 %v4446_v34, %v3555_v39  ;;  %v4786_v44 = vpop.f32.mrb[67].mxu0  ;;  %v3559_v49 = vmax.f32 %v3553_v36, 0.0 }
0x15e4   : > { %v3560_v50 = vmax.f32 %v3556_v42, 0.0 }
0x15e6   : > { %v3561_v43 = vpack.c.bf16 %v3560_v50, %v3559_v49 }
0x15e8   : > { %4796 = vmatmul.mubr.msk.bf16.vlgmr.msra.gmra.mrb[64].mxu1 %vm3601_vm13, %v3561_v43 }
0x16bb   : > { %v3639_v48 = vpop.f32.mrb[64].mxu1 }
0x16bc   : > { %v3640_v51 = vadd.f32 %v4450_v46, %v3639_v48  ;;  %v4797_v3 = vpop.f32.mrb[65].mxu1 }
0x16bd   : > { %v3642_v52 = vpop.f32.mrb[66].mxu1 }
0x16be   : > { %v3643_v53 = vadd.f32 %v4450_v46, %v3642_v52  ;;  %v4798_v56 = vpop.f32.mrb[67].mxu1  ;;  %v3646_v58 = vadd.f32 %v3640_v51, %v3489_v26 }
0x16c0   : > { %v3648_v20 = vsel %vm1823_vm2, %v3646_v58, 0.0  ;;  %v3647_v37 = vadd.f32 %v3643_v53, %v3490_v29 }
0x16c1   : > { %3649 = vadd.xlane.f32.xlu0 %v3648_v20 }
0x16c2   : > { %v3651_v22 = vsel %vm1823_vm2, %v3647_v37, 0.0 }
0x16c3   : > { %3652 = vadd.xlane.f32.xlu1 %v3651_v22 }
0x174e   : > { %v3650_v27 = vpop.xlane.xlu0 %3649 }
0x174f   : > { %v3654_v28 = vmul.f32 0.03125, %v3650_v27 }
0x1750   : > { %v3653_v2 = vpop.xlane.xlu1 %3652 }
0x1751   : > { %v3656_v30 = vsub.f32 %v3646_v58, %v3654_v28  ;;  %v3655_v59 = vmul.f32 0.03125, %v3653_v2 }
0x1753   : > { %v3657_v60 = vsub.f32 %v3647_v37, %v3655_v59  ;;  %v3658_v61 = vmul.f32 %v3656_v30, %v3656_v30 }
0x1755   : > { %v3660_v14 = vsel %vm1823_vm2, %v3658_v61, 0.0  ;;  %v3659_v62 = vmul.f32 %v3657_v60, %v3657_v60 }
0x1756   : > { %3661 = vadd.xlane.f32.xlu0 %v3660_v14 }
0x1757   : > { %v3663_v15 = vsel %vm1823_vm2, %v3659_v62, 0.0 }
0x1758   : > { %3664 = vadd.xlane.f32.xlu1 %v3663_v15 }
0x17e3   : > { %v3662_v63 = vpop.xlane.xlu0 %3661 }
0x17e4   : > { %v3666_v0 = vmul.f32 0.03125, %v3662_v63 }
0x17e5   : > { %v3665_v1 = vpop.xlane.xlu1 %3664 }
0x17e6   : > { %v3668_v6 = vadd.f32 1e-05, %v3666_v0  ;;  %v3667_v7 = vmul.f32 0.03125, %v3665_v1 }
0x17e8   : > { %5009 = vrsqrt.f32 %v3668_v6  ;;  %v3669_v17 = vadd.f32 1e-05, %v3667_v7 }
0x17ea   : > { %5011 = vrsqrt.f32 %v3669_v17 }
0x17f2   : > { %v5010_v4 = vpop.eup %5009 }
0x17f3   : > { %v3672_v19 = vmul.f32 %v5010_v4, %v3656_v30 }
0x17f4   : > { %v5012_v41 = vpop.eup %5011 }
0x17f5   : > { %v3681_v8 = vmul.f32 %v4456_v40, %v3672_v19  ;;  %v3673_v10 = vmul.f32 %v5012_v41, %v3657_v60  ;;  %3697 = sbr.rel (%p4458_p2) target bundleno = 6140 (0x17fc), region = 252 }
0x17f7   : > { %v3690_v11 = vadd.f32 %v4457_v5, %v3681_v8  ;;  %v3682_v12 = vmul.f32 %v4456_v40, %v3673_v10 }
0x17f9   : > { %3692 = vst.msk [vmem:[#allocation2] sm:$0xff] %vm1823_vm2, %v3690_v11  ;;  %v3691_v13 = vadd.f32 %v4457_v5, %v3682_v12  ;;  %3698 = vst.msk [vmem:[#allocation34] sm:$0xff] (!%p4458_p2), %vm1823_vm2, %v3690_v11 }
0x17fb   : > { %3693 = vst.msk [vmem:[#allocation2 + $0x8] sm:$0xff] %vm1823_vm2, %v3691_v13  ;;  %3699 = vst.msk [vmem:[#allocation34 + $0x8] sm:$0xff] (!%p4458_p2), %vm1823_vm2, %v3691_v13 }
0x17fc PF: > { %s7665_s7 = sld [smem:[#allocation41_spill]]  ;;  %s5910_s0 = smov [#allocation34]  }
0x17fd   : > { %s3706_s12 = sshll.u32 %s5910_s0, 4  ;;  %s3707_s12 = int_to_ptr.vmem [resolvable:$true] %s3706_s12 }
0x17fe   : > { %s5797_s10 = scalar_lea.vmem %s3707_s12, 256  ;;  %p5804_p4 = scmp.lt.s32.totalorder %s3707_s12, %s3707_s12 }
0x17ff   : > { %p5798_p10 = scmp.ne.s32.totalorder %s3707_s12, %s5797_s10  ;;  %p5805_p1 = scmp.lt.s32.totalorder %s5797_s10, %s5797_s10 }
0x1801   : > { %p5806_p7 = por %p5805_p1, %p5804_p4 }
0x1802   : > { %p4882_p9 = scmp.eq.s32.totalorder %s7665_s7, 1 }
0x1804   : > { %p5799_p3 = pnand %p5798_p10, %p4882_p9 }
0x1806   : > { %p5800_p11 = pneg %p5799_p3 }
0x1808   : > { %p5807_p13 = pnand %p5806_p7, %p5800_p11 }
0x180a   : > { %5810 = shalt.err (!%p5807_p13)
}
0x180b   : > { %s7666_s23 = sld [smem:[#allocation76_spill]] }
0x1811   : > { %s5811_s28 = scalar_lea.hbm %s7666_s23, 256 }
0x1812   : > { %p5812_p12 = scmp.ne.s32.totalorder %s7666_s23, %s5811_s28  ;;  %p5817_p0 = scmp.lt.u32.totalorder %s5811_s28, %s7666_s23 }
0x1814   : > { %p5813_p6 = pnand %p5812_p12, %p4882_p9 }
0x1816   : > { %p5814_p8 = pneg %p5813_p6 }
0x1818   : > { %p5819_p5 = pnand %p5817_p0, %p5814_p8 }
0x181a   : > { %5822 = shalt.err (!%p5819_p5)
}
0x181b   : > { %s5911_s27 = smov 128   ;;  %s5912_s6 = smov 8  }
0x181c   : > { %4868 = dma.vmem_to_hbm [thread:$0]  (%p4882_p9), %s3707_s12, 256, %s7666_s23, [#allocation5], %s5911_s27, %s5911_s27, %s5912_s6  }
0x181d   : > { %5852 = dma.done.wait (%p4882_p9), [#allocation5], 256  }
0x181e   : > { %5854 = vsyncadd (%p4882_p9), [#allocation5], 4294967040 }
0x181f PF: > { %s7667_s30 = sld [smem:[#allocation42_spill]]  ;;  %s7668_s8 = sld [smem:[#allocation39_spill]] }
0x1820   : > { %s7669_s5 = sld [smem:[#allocation40_spill]]  ;;  %s7670_s9 = sld [smem:[#allocation43_spill]] }
0x1825   : > { %p38_p2 = scmp.ge.s32.totalorder %s7667_s30, 4  }
0x1827   :  { %40 = sbr.rel (!%p38_p2) target bundleno = 33 (0x21), region = 473 }
0x182e   :  { %3722 = vsyncpa [#allocation4], 1 }
0x182f   :  { %3724 = vsyncpa [#allocation4 + $0x1], 1 }
0x1830   :  { %3725 = vsyncpa [#allocation7], 1 }
0x1831   :  { %3726 = vsyncpa [#allocation5], 1 }
0x1832   :  { %3728 = vsyncpa [#allocation5 + $0x1], 1 }

</bundles_post_ra>
